<compile_context>
chip_gen: v5e
topology: v5e:2x2
jax: 0.10.0
libtpu: 0.0.40
codegen_flags: <defaults>
</compile_context>

<pallas_src>
import functools

import jax
import jax.numpy as jnp
from jax.experimental import pallas as pl
from jax.experimental.pallas import tpu as pltpu


def _spatial_attention_kernel(x_ref, w_ref, o_ref, sc_ref, *, K, P, H, W, C, A, HW):
    # x_ref : (1, C, H*W)  VMEM, native dtype  -- one batch element, flattened
    # w_ref : (2*K*K,)     SMEM, f32           -- [avg-channel taps, max-channel taps]
    # o_ref : (1, C, H*W)  VMEM
    # sc_ref: (2, Lp)      VMEM f32 scratch; row 0 = avg map, row 1 = max map,
    #         flat row-major SAME-zero-padded layout, interior starts at a
    #         128-aligned lane offset `off`.
    KK = K * K
    off = A + P * W + P                 # 128-aligned interior start
    Lp = sc_ref.shape[1]
    tail = Lp - (off + HW)              # = P*W + P  (K in {3,7} -> tail > 0)

    x2d = x_ref[0]                      # (C, HW), native dtype (no f32 copy)

    # ---- channel reductions -> (1, HW) f32 maps ----------------------------
    if x2d.dtype != jnp.float32 and C >= 16:
        # large-C sub-f32: accumulate the channel sum in f32 on the MXU without
        # upcasting the block in vregs.
        sum_flat = jnp.dot(jnp.ones((1, C), dtype=x2d.dtype), x2d,
                           preferred_element_type=jnp.float32)
    else:
        # f32 / modest C: plain VPU sublane reduction (one streaming pass).
        sum_flat = jnp.sum(x2d.astype(jnp.float32), axis=0, keepdims=True)
    mean_flat = sum_flat * (1.0 / C)                                  # (1, HW)
    max_flat = jnp.max(x2d, axis=0, keepdims=True).astype(jnp.float32)

    # ---- write maps into the packed scratch; zero ONLY the pad slices ------
    sc_ref[:, :off] = jnp.zeros((2, off), jnp.float32)
    sc_ref[:, off + HW:off + HW + tail] = jnp.zeros((2, tail), jnp.float32)
    sc_ref[0:1, off:off + HW] = mean_flat          # lane-aligned full-width store
    sc_ref[1:2, off:off + HW] = max_flat

    # ---- hoisted helpers: per-pixel column index, sublane-row selector -----
    col = jax.lax.broadcasted_iota(jnp.int32, (1, HW), 1) % W          # (1, HW)
    row_id = jax.lax.broadcasted_iota(jnp.int32, (2, 1), 0)            # [[0],[1]]

    # ---- K x K "SAME" conv over the packed 2-row reduced map ---------------
    # Tap (ki, kj) is the contiguous slice [A + ki*W + kj, +HW) of BOTH rows at
    # once; vertical OOB taps land in the zeroed pad by construction, horizontal
    # row wrap-around is removed by the per-kj column mask.
    acc = jnp.zeros((2, HW), jnp.float32)
    for kj in range(K):                 # one column-validity mask per kj
        valid = (col >= (P - kj)) & (col < (W + P - kj))               # (1, HW)
        inner = jnp.zeros((2, HW), jnp.float32)
        for ki in range(K):
            a = A + ki * W + kj
            idx = ki * K + kj
            # (2,1) per-sublane weight: row 0 <- avg tap, row 1 <- max tap.
            wv = jnp.where(row_id == 0, w_ref[idx], w_ref[KK + idx])
            inner = inner + wv * sc_ref[:, a:a + HW]
        acc = acc + jnp.where(valid, inner, 0.0)
    conv = acc[0:1, :] + acc[1:2, :]    # (1, HW): avg-row + max-row contributions
    # TODO(synk): if profiling shows the tap loop VALU/XLU-bound (small C, bf16,
    # v7x), move the vertical taps onto the MXU (K lane-rolls + banded matmul).

    # ---- sigmoid gate, applied lane-dense in the input dtype ----------------
    att = jax.nn.sigmoid(conv).astype(o_ref.dtype)   # (1, HW)
    # Re-index x_ref here (instead of reusing x2d) to keep its live range short.
    o_ref[0] = x_ref[0] * att                        # (C, HW) broadcast multiply


def spatial_attention(x, weight, kernel_size=7):
    """x: (N, C, H, W); weight: (1, 2, K, K), i.e. Conv2d(2, 1, K, bias=False)."""
    assert kernel_size in (3, 7), "kernel size must be 3 or 7"
    N, C, H, W = x.shape
    K = kernel_size
    P = K // 2
    HW = H * W
    off0 = P * W + P                     # flat offset of map[0,0] (unaligned)
    A = (-off0) % 128                    # leading pad so the interior is lane-aligned
    L = (H + K - 1) * W + (K - 1)        # flat padded-map length
    Lp = A + L

    # glue (all free / tiny): flatten spatial dims (row-major => layout no-op),
    # flatten the conv weight for SMEM.
    x_flat = x.reshape(N, C, HW)
    w_flat = weight.reshape(2 * K * K).astype(jnp.float32)

    # VMEM budget: double-buffered in block + double-buffered out block + scratch
    # (padded to (8, ceil(Lp/128)*128) f32) + margin for compiler-internal scratch.
    itemsize = jnp.dtype(x.dtype).itemsize
    block_bytes = C * HW * itemsize
    scratch_bytes = 8 * (pl.cdiv(Lp, 128) * 128) * 4
    vmem_need = 4 * block_bytes + scratch_bytes + (2 << 20)
    vmem_limit = int(min(max(vmem_need, 16 << 20), 100 << 20))

    # Advisory cost: HBM-bound (read + write of x), ~3 passes of cheap VPU work
    # plus the 2*K*K-tap conv, one sigmoid per pixel.
    cost = pl.CostEstimate(
        flops=int(N * (3 * C * HW + 4 * K * K * HW)),
        transcendentals=int(N * HW),
        bytes_accessed=int(2 * N * C * HW * itemsize),
    )

    kernel = functools.partial(_spatial_attention_kernel,
                               K=K, P=P, H=H, W=W, C=C, A=A, HW=HW)
    out_flat = pl.pallas_call(
        kernel,
        out_shape=jax.ShapeDtypeStruct((N, C, HW), x.dtype),
        grid_spec=pltpu.PrefetchScalarGridSpec(
            num_scalar_prefetch=0,
            grid=(N,),
            in_specs=[
                pl.BlockSpec((1, C, HW), lambda n: (n, 0, 0)),
                pl.BlockSpec(memory_space=pltpu.MemorySpace.SMEM),
            ],
            out_specs=pl.BlockSpec((1, C, HW), lambda n: (n, 0, 0)),
            scratch_shapes=[pltpu.VMEM((2, Lp), jnp.float32)],
        ),
        compiler_params=pltpu.CompilerParams(
            dimension_semantics=("parallel",),
            vmem_limit_bytes=vmem_limit),
        cost_estimate=cost,
    )(x_flat, w_flat)
    # TODO(synk): v7x (64 MiB VMEM, 2 TCs) — when C*HW blocks outgrow VMEM or
    # N==1/odd leaves a core idle, add an H-row-tile "parallel" grid axis with a
    # P-row halo (overlapping reads via pl.ANY + pltpu.make_async_copy), keeping
    # a single HBM read+write pass instead of a two-pass channel tiling.
    return out_flat.reshape(N, C, H, W)


def spatial_attention_reference(x, weight):
    """Plain-JAX reference mirroring the PyTorch forward."""
    avg = jnp.mean(x, axis=1, keepdims=True)
    mx = jnp.max(x, axis=1, keepdims=True)
    out = jnp.concatenate([avg, mx], axis=1)
    conv = jax.lax.conv_general_dilated(
        out, weight, window_strides=(1, 1), padding="SAME",
        dimension_numbers=("NCHW", "OIHW", "NCHW"))
    return x * jax.nn.sigmoid(conv)


if __name__ == "__main__":
    key = jax.random.PRNGKey(0)
    kx, kw = jax.random.split(key)

    N, C, H, W, K = 2, 4, 16, 16, 7
    x = jax.random.normal(kx, (N, C, H, W), jnp.float32)

    # Deterministic Conv2d(2, 1, 7, bias=False) weight (kaiming-uniform-like scale).
    bound = 1.0 / (2 * K * K) ** 0.5
    weight = jax.random.uniform(kw, (1, 2, K, K), jnp.float32, -bound, bound)

    out = spatial_attention(x, weight, kernel_size=K)
    out = jax.block_until_ready(out)

    ref = spatial_attention_reference(x, weight)
    assert out.shape == x.shape and out.dtype == x.dtype
    max_err = float(jnp.max(jnp.abs(out - ref)))
    assert jnp.allclose(out, ref, atol=1e-4, rtol=1e-4), f"max_err={max_err}"
    print("KERNEL_OK")
</pallas_src>

<mosaic_0001>
module attributes {stable_mosaic.version = 11 : i64} {
  func.func @_spatial_attention_kernel(%arg0: i32, %arg1: memref<1x4x256xf32, #tpu.memory_space<vmem>>, %arg2: memref<98xf32, #tpu.memory_space<smem>>, %arg3: memref<1x4x256xf32, #tpu.memory_space<vmem>>, %arg4: memref<2x435xf32, #tpu.memory_space<vmem>>) attributes {dimension_semantics = [#tpu.dimension_semantics<parallel>], iteration_bounds = array<i64: 2>, scalar_prefetch = 0 : i64, scratch_operands = 1 : i64, tpu.core_type = #tpu.core_type<tc>, window_params = [{transform_indices = @transform_0, window_bounds = array<i64: 1, 4, 256>}, {transform_indices = @transform_1, window_bounds = array<i64: 98>}, {transform_indices = @transform_2, window_bounds = array<i64: 1, 4, 256>}]} {
    %c0 = arith.constant 0 : index
    %c0_0 = arith.constant 0 : index
    %c0_1 = arith.constant 0 : index
    %0 = vector.load %arg1[%c0, %c0_0, %c0_1] : memref<1x4x256xf32, #tpu.memory_space<vmem>>, vector<1x4x256xf32>
    %1 = vector.shape_cast %0 : vector<1x4x256xf32> to vector<4x256xf32>
    %cst = arith.constant dense<0.000000e+00> : vector<256xf32>
    %2 = vector.multi_reduction <add>, %1, %cst [0] : vector<4x256xf32> to vector<256xf32>
    %3 = vector.shape_cast %2 : vector<256xf32> to vector<1x256xf32>
    %cst_2 = arith.constant 2.500000e-01 : f32
    %4 = vector.broadcast %cst_2 : f32 to vector<1x256xf32>
    %5 = arith.mulf %3, %4 : vector<1x256xf32>
    %cst_3 = arith.constant dense<0xFF800000> : vector<256xf32>
    %6 = vector.multi_reduction <maximumf>, %1, %cst_3 [0] : vector<4x256xf32> to vector<256xf32>
    %7 = vector.shape_cast %6 : vector<256xf32> to vector<1x256xf32>
    %cst_4 = arith.constant 0.000000e+00 : f32
    %8 = vector.broadcast %cst_4 : f32 to vector<2x128xf32>
    %c0_5 = arith.constant 0 : index
    %c0_6 = arith.constant 0 : index
    %9 = vector.load %arg4[%c0_5, %c0_6] : memref<2x435xf32, #tpu.memory_space<vmem>>, vector<2x128xf32>
    tpu.vector_store %arg4[%c0_5, %c0_6], %8 {strides = array<i32>} : memref<2x435xf32, #tpu.memory_space<vmem>>, vector<2x128xf32>,
    %cst_7 = arith.constant 0.000000e+00 : f32
    %10 = vector.broadcast %cst_7 : f32 to vector<2x51xf32>
    %c0_8 = arith.constant 0 : index
    %c384 = arith.constant 384 : index
    %11 = vector.load %arg4[%c0_8, %c384] : memref<2x435xf32, #tpu.memory_space<vmem>>, vector<2x51xf32>
    tpu.vector_store %arg4[%c0_8, %c384], %10 {strides = array<i32>} : memref<2x435xf32, #tpu.memory_space<vmem>>, vector<2x51xf32>,
    %c0_9 = arith.constant 0 : index
    %c128 = arith.constant 128 : index
    %12 = vector.load %arg4[%c0_9, %c128] : memref<2x435xf32, #tpu.memory_space<vmem>>, vector<1x256xf32>
    tpu.vector_store %arg4[%c0_9, %c128], %5 {strides = array<i32>} : memref<2x435xf32, #tpu.memory_space<vmem>>, vector<1x256xf32>,
    %c1 = arith.constant 1 : index
    %c128_10 = arith.constant 128 : index
    %13 = vector.load %arg4[%c1, %c128_10] : memref<2x435xf32, #tpu.memory_space<vmem>>, vector<1x256xf32>
    tpu.vector_store %arg4[%c1, %c128_10], %7 {strides = array<i32>} : memref<2x435xf32, #tpu.memory_space<vmem>>, vector<1x256xf32>,
    %14 = tpu.iota {dimensions = array<i32: 1>} : vector<1x256xi32>
    %c16_i32 = arith.constant 16 : i32
    %c0_i32 = arith.constant 0 : i32
    %15 = arith.cmpi eq, %c16_i32, %c0_i32 : i32
    %c1_i32 = arith.constant 1 : i32
    %16 = arith.select %15, %c1_i32, %c16_i32 : i32
    %17 = vector.broadcast %16 : i32 to vector<1x256xi32>
    %18 = arith.remsi %14, %17 : vector<1x256xi32>
    %c0_i32_11 = arith.constant 0 : i32
    %19 = vector.broadcast %c0_i32_11 : i32 to vector<1x256xi32>
    %20 = arith.cmpi ne, %18, %19 : vector<1x256xi32>
    %c0_i32_12 = arith.constant 0 : i32
    %21 = vector.broadcast %c0_i32_12 : i32 to vector<1x256xi32>
    %22 = arith.cmpi slt, %18, %21 : vector<1x256xi32>
    %c0_i32_13 = arith.constant 0 : i32
    %23 = arith.cmpi slt, %16, %c0_i32_13 : i32
    %24 = vector.broadcast %23 : i1 to vector<1x256xi1>
    %25 = vector.broadcast %24 : vector<1x256xi1> to vector<1x256xi1>
    %26 = arith.xori %22, %25 : vector<1x256xi1>
    %27 = arith.andi %26, %20 : vector<1x256xi1>
    %28 = vector.broadcast %16 : i32 to vector<1x256xi32>
    %29 = arith.addi %18, %28 : vector<1x256xi32>
    %30 = arith.select %27, %29, %18 : vector<1x256xi1>, vector<1x256xi32>
    %31 = tpu.iota {dimensions = array<i32: 0>} : vector<2x1xi32>
    %cst_14 = arith.constant 0.000000e+00 : f32
    %32 = vector.broadcast %cst_14 : f32 to vector<2x256xf32>
    %c3_i32 = arith.constant 3 : i32
    %33 = vector.broadcast %c3_i32 : i32 to vector<1x256xi32>
    %34 = arith.cmpi sge, %30, %33 : vector<1x256xi32>
    %c19_i32 = arith.constant 19 : i32
    %35 = vector.broadcast %c19_i32 : i32 to vector<1x256xi32>
    %36 = arith.cmpi slt, %30, %35 : vector<1x256xi32>
    %37 = arith.andi %34, %36 : vector<1x256xi1>
    %cst_15 = arith.constant 0.000000e+00 : f32
    %38 = vector.broadcast %cst_15 : f32 to vector<2x256xf32>
    %c0_i32_16 = arith.constant 0 : i32
    %39 = vector.broadcast %c0_i32_16 : i32 to vector<2x1xi32>
    %40 = arith.cmpi eq, %31, %39 : vector<2x1xi32>
    %c0_17 = arith.constant 0 : index
    %41 = memref.load %arg2[%c0_17] : memref<98xf32, #tpu.memory_space<smem>>
    %c49 = arith.constant 49 : index
    %42 = memref.load %arg2[%c49] : memref<98xf32, #tpu.memory_space<smem>>
    %43 = vector.broadcast %41 : f32 to vector<2x1xf32>
    %44 = vector.broadcast %42 : f32 to vector<2x1xf32>
    %45 = arith.select %40, %43, %44 : vector<2x1xi1>, vector<2x1xf32>
    %c0_18 = arith.constant 0 : index
    %c77 = arith.constant 77 : index
    %46 = vector.load %arg4[%c0_18, %c77] : memref<2x435xf32, #tpu.memory_space<vmem>>, vector<2x256xf32>
    %47 = vector.broadcast %45 : vector<2x1xf32> to vector<2x256xf32>
    %48 = arith.mulf %47, %46 : vector<2x256xf32>
    %49 = arith.addf %38, %48 : vector<2x256xf32>
    %c0_i32_19 = arith.constant 0 : i32
    %50 = vector.broadcast %c0_i32_19 : i32 to vector<2x1xi32>
    %51 = arith.cmpi eq, %31, %50 : vector<2x1xi32>
    %c7 = arith.constant 7 : index
    %52 = memref.load %arg2[%c7] : memref<98xf32, #tpu.memory_space<smem>>
    %c56 = arith.constant 56 : index
    %53 = memref.load %arg2[%c56] : memref<98xf32, #tpu.memory_space<smem>>
    %54 = vector.broadcast %52 : f32 to vector<2x1xf32>
    %55 = vector.broadcast %53 : f32 to vector<2x1xf32>
    %56 = arith.select %51, %54, %55 : vector<2x1xi1>, vector<2x1xf32>
    %c0_20 = arith.constant 0 : index
    %c93 = arith.constant 93 : index
    %57 = vector.load %arg4[%c0_20, %c93] : memref<2x435xf32, #tpu.memory_space<vmem>>, vector<2x256xf32>
    %58 = vector.broadcast %56 : vector<2x1xf32> to vector<2x256xf32>
    %59 = arith.mulf %58, %57 : vector<2x256xf32>
    %60 = arith.addf %49, %59 : vector<2x256xf32>
    %c0_i32_21 = arith.constant 0 : i32
    %61 = vector.broadcast %c0_i32_21 : i32 to vector<2x1xi32>
    %62 = arith.cmpi eq, %31, %61 : vector<2x1xi32>
    %c14 = arith.constant 14 : index
    %63 = memref.load %arg2[%c14] : memref<98xf32, #tpu.memory_space<smem>>
    %c63 = arith.constant 63 : index
    %64 = memref.load %arg2[%c63] : memref<98xf32, #tpu.memory_space<smem>>
    %65 = vector.broadcast %63 : f32 to vector<2x1xf32>
    %66 = vector.broadcast %64 : f32 to vector<2x1xf32>
    %67 = arith.select %62, %65, %66 : vector<2x1xi1>, vector<2x1xf32>
    %c0_22 = arith.constant 0 : index
    %c109 = arith.constant 109 : index
    %68 = vector.load %arg4[%c0_22, %c109] : memref<2x435xf32, #tpu.memory_space<vmem>>, vector<2x256xf32>
    %69 = vector.broadcast %67 : vector<2x1xf32> to vector<2x256xf32>
    %70 = arith.mulf %69, %68 : vector<2x256xf32>
    %71 = arith.addf %60, %70 : vector<2x256xf32>
    %c0_i32_23 = arith.constant 0 : i32
    %72 = vector.broadcast %c0_i32_23 : i32 to vector<2x1xi32>
    %73 = arith.cmpi eq, %31, %72 : vector<2x1xi32>
    %c21 = arith.constant 21 : index
    %74 = memref.load %arg2[%c21] : memref<98xf32, #tpu.memory_space<smem>>
    %c70 = arith.constant 70 : index
    %75 = memref.load %arg2[%c70] : memref<98xf32, #tpu.memory_space<smem>>
    %76 = vector.broadcast %74 : f32 to vector<2x1xf32>
    %77 = vector.broadcast %75 : f32 to vector<2x1xf32>
    %78 = arith.select %73, %76, %77 : vector<2x1xi1>, vector<2x1xf32>
    %c0_24 = arith.constant 0 : index
    %c125 = arith.constant 125 : index
    %79 = vector.load %arg4[%c0_24, %c125] : memref<2x435xf32, #tpu.memory_space<vmem>>, vector<2x256xf32>
    %80 = vector.broadcast %78 : vector<2x1xf32> to vector<2x256xf32>
    %81 = arith.mulf %80, %79 : vector<2x256xf32>
    %82 = arith.addf %71, %81 : vector<2x256xf32>
    %c0_i32_25 = arith.constant 0 : i32
    %83 = vector.broadcast %c0_i32_25 : i32 to vector<2x1xi32>
    %84 = arith.cmpi eq, %31, %83 : vector<2x1xi32>
    %c28 = arith.constant 28 : index
    %85 = memref.load %arg2[%c28] : memref<98xf32, #tpu.memory_space<smem>>
    %c77_26 = arith.constant 77 : index
    %86 = memref.load %arg2[%c77_26] : memref<98xf32, #tpu.memory_space<smem>>
    %87 = vector.broadcast %85 : f32 to vector<2x1xf32>
    %88 = vector.broadcast %86 : f32 to vector<2x1xf32>
    %89 = arith.select %84, %87, %88 : vector<2x1xi1>, vector<2x1xf32>
    %c0_27 = arith.constant 0 : index
    %c141 = arith.constant 141 : index
    %90 = vector.load %arg4[%c0_27, %c141] : memref<2x435xf32, #tpu.memory_space<vmem>>, vector<2x256xf32>
    %91 = vector.broadcast %89 : vector<2x1xf32> to vector<2x256xf32>
    %92 = arith.mulf %91, %90 : vector<2x256xf32>
    %93 = arith.addf %82, %92 : vector<2x256xf32>
    %c0_i32_28 = arith.constant 0 : i32
    %94 = vector.broadcast %c0_i32_28 : i32 to vector<2x1xi32>
    %95 = arith.cmpi eq, %31, %94 : vector<2x1xi32>
    %c35 = arith.constant 35 : index
    %96 = memref.load %arg2[%c35] : memref<98xf32, #tpu.memory_space<smem>>
    %c84 = arith.constant 84 : index
    %97 = memref.load %arg2[%c84] : memref<98xf32, #tpu.memory_space<smem>>
    %98 = vector.broadcast %96 : f32 to vector<2x1xf32>
    %99 = vector.broadcast %97 : f32 to vector<2x1xf32>
    %100 = arith.select %95, %98, %99 : vector<2x1xi1>, vector<2x1xf32>
    %c0_29 = arith.constant 0 : index
    %c157 = arith.constant 157 : index
    %101 = vector.load %arg4[%c0_29, %c157] : memref<2x435xf32, #tpu.memory_space<vmem>>, vector<2x256xf32>
    %102 = vector.broadcast %100 : vector<2x1xf32> to vector<2x256xf32>
    %103 = arith.mulf %102, %101 : vector<2x256xf32>
    %104 = arith.addf %93, %103 : vector<2x256xf32>
    %c0_i32_30 = arith.constant 0 : i32
    %105 = vector.broadcast %c0_i32_30 : i32 to vector<2x1xi32>
    %106 = arith.cmpi eq, %31, %105 : vector<2x1xi32>
    %c42 = arith.constant 42 : index
    %107 = memref.load %arg2[%c42] : memref<98xf32, #tpu.memory_space<smem>>
    %c91 = arith.constant 91 : index
    %108 = memref.load %arg2[%c91] : memref<98xf32, #tpu.memory_space<smem>>
    %109 = vector.broadcast %107 : f32 to vector<2x1xf32>
    %110 = vector.broadcast %108 : f32 to vector<2x1xf32>
    %111 = arith.select %106, %109, %110 : vector<2x1xi1>, vector<2x1xf32>
    %c0_31 = arith.constant 0 : index
    %c173 = arith.constant 173 : index
    %112 = vector.load %arg4[%c0_31, %c173] : memref<2x435xf32, #tpu.memory_space<vmem>>, vector<2x256xf32>
    %113 = vector.broadcast %111 : vector<2x1xf32> to vector<2x256xf32>
    %114 = arith.mulf %113, %112 : vector<2x256xf32>
    %115 = arith.addf %104, %114 : vector<2x256xf32>
    %cst_32 = arith.constant 0.000000e+00 : f32
    %116 = vector.shape_cast %37 : vector<1x256xi1> to vector<1x256xi1>
    %117 = vector.broadcast %116 : vector<1x256xi1> to vector<2x256xi1>
    %118 = vector.broadcast %cst_32 : f32 to vector<2x256xf32>
    %119 = arith.select %117, %115, %118 : vector<2x256xi1>, vector<2x256xf32>
    %120 = arith.addf %32, %119 : vector<2x256xf32>
    %c2_i32 = arith.constant 2 : i32
    %121 = vector.broadcast %c2_i32 : i32 to vector<1x256xi32>
    %122 = arith.cmpi sge, %30, %121 : vector<1x256xi32>
    %c18_i32 = arith.constant 18 : i32
    %123 = vector.broadcast %c18_i32 : i32 to vector<1x256xi32>
    %124 = arith.cmpi slt, %30, %123 : vector<1x256xi32>
    %125 = arith.andi %122, %124 : vector<1x256xi1>
    %cst_33 = arith.constant 0.000000e+00 : f32
    %126 = vector.broadcast %cst_33 : f32 to vector<2x256xf32>
    %c0_i32_34 = arith.constant 0 : i32
    %127 = vector.broadcast %c0_i32_34 : i32 to vector<2x1xi32>
    %128 = arith.cmpi eq, %31, %127 : vector<2x1xi32>
    %c1_35 = arith.constant 1 : index
    %129 = memref.load %arg2[%c1_35] : memref<98xf32, #tpu.memory_space<smem>>
    %c50 = arith.constant 50 : index
    %130 = memref.load %arg2[%c50] : memref<98xf32, #tpu.memory_space<smem>>
    %131 = vector.broadcast %129 : f32 to vector<2x1xf32>
    %132 = vector.broadcast %130 : f32 to vector<2x1xf32>
    %133 = arith.select %128, %131, %132 : vector<2x1xi1>, vector<2x1xf32>
    %c0_36 = arith.constant 0 : index
    %c78 = arith.constant 78 : index
    %134 = vector.load %arg4[%c0_36, %c78] : memref<2x435xf32, #tpu.memory_space<vmem>>, vector<2x256xf32>
    %135 = vector.broadcast %133 : vector<2x1xf32> to vector<2x256xf32>
    %136 = arith.mulf %135, %134 : vector<2x256xf32>
    %137 = arith.addf %126, %136 : vector<2x256xf32>
    %c0_i32_37 = arith.constant 0 : i32
    %138 = vector.broadcast %c0_i32_37 : i32 to vector<2x1xi32>
    %139 = arith.cmpi eq, %31, %138 : vector<2x1xi32>
    %c8 = arith.constant 8 : index
    %140 = memref.load %arg2[%c8] : memref<98xf32, #tpu.memory_space<smem>>
    %c57 = arith.constant 57 : index
    %141 = memref.load %arg2[%c57] : memref<98xf32, #tpu.memory_space<smem>>
    %142 = vector.broadcast %140 : f32 to vector<2x1xf32>
    %143 = vector.broadcast %141 : f32 to vector<2x1xf32>
    %144 = arith.select %139, %142, %143 : vector<2x1xi1>, vector<2x1xf32>
    %c0_38 = arith.constant 0 : index
    %c94 = arith.constant 94 : index
    %145 = vector.load %arg4[%c0_38, %c94] : memref<2x435xf32, #tpu.memory_space<vmem>>, vector<2x256xf32>
    %146 = vector.broadcast %144 : vector<2x1xf32> to vector<2x256xf32>
    %147 = arith.mulf %146, %145 : vector<2x256xf32>
    %148 = arith.addf %137, %147 : vector<2x256xf32>
    %c0_i32_39 = arith.constant 0 : i32
    %149 = vector.broadcast %c0_i32_39 : i32 to vector<2x1xi32>
    %150 = arith.cmpi eq, %31, %149 : vector<2x1xi32>
    %c15 = arith.constant 15 : index
    %151 = memref.load %arg2[%c15] : memref<98xf32, #tpu.memory_space<smem>>
    %c64 = arith.constant 64 : index
    %152 = memref.load %arg2[%c64] : memref<98xf32, #tpu.memory_space<smem>>
    %153 = vector.broadcast %151 : f32 to vector<2x1xf32>
    %154 = vector.broadcast %152 : f32 to vector<2x1xf32>
    %155 = arith.select %150, %153, %154 : vector<2x1xi1>, vector<2x1xf32>
    %c0_40 = arith.constant 0 : index
    %c110 = arith.constant 110 : index
    %156 = vector.load %arg4[%c0_40, %c110] : memref<2x435xf32, #tpu.memory_space<vmem>>, vector<2x256xf32>
    %157 = vector.broadcast %155 : vector<2x1xf32> to vector<2x256xf32>
    %158 = arith.mulf %157, %156 : vector<2x256xf32>
    %159 = arith.addf %148, %158 : vector<2x256xf32>
    %c0_i32_41 = arith.constant 0 : i32
    %160 = vector.broadcast %c0_i32_41 : i32 to vector<2x1xi32>
    %161 = arith.cmpi eq, %31, %160 : vector<2x1xi32>
    %c22 = arith.constant 22 : index
    %162 = memref.load %arg2[%c22] : memref<98xf32, #tpu.memory_space<smem>>
    %c71 = arith.constant 71 : index
    %163 = memref.load %arg2[%c71] : memref<98xf32, #tpu.memory_space<smem>>
    %164 = vector.broadcast %162 : f32 to vector<2x1xf32>
    %165 = vector.broadcast %163 : f32 to vector<2x1xf32>
    %166 = arith.select %161, %164, %165 : vector<2x1xi1>, vector<2x1xf32>
    %c0_42 = arith.constant 0 : index
    %c126 = arith.constant 126 : index
    %167 = vector.load %arg4[%c0_42, %c126] : memref<2x435xf32, #tpu.memory_space<vmem>>, vector<2x256xf32>
    %168 = vector.broadcast %166 : vector<2x1xf32> to vector<2x256xf32>
    %169 = arith.mulf %168, %167 : vector<2x256xf32>
    %170 = arith.addf %159, %169 : vector<2x256xf32>
    %c0_i32_43 = arith.constant 0 : i32
    %171 = vector.broadcast %c0_i32_43 : i32 to vector<2x1xi32>
    %172 = arith.cmpi eq, %31, %171 : vector<2x1xi32>
    %c29 = arith.constant 29 : index
    %173 = memref.load %arg2[%c29] : memref<98xf32, #tpu.memory_space<smem>>
    %c78_44 = arith.constant 78 : index
    %174 = memref.load %arg2[%c78_44] : memref<98xf32, #tpu.memory_space<smem>>
    %175 = vector.broadcast %173 : f32 to vector<2x1xf32>
    %176 = vector.broadcast %174 : f32 to vector<2x1xf32>
    %177 = arith.select %172, %175, %176 : vector<2x1xi1>, vector<2x1xf32>
    %c0_45 = arith.constant 0 : index
    %c142 = arith.constant 142 : index
    %178 = vector.load %arg4[%c0_45, %c142] : memref<2x435xf32, #tpu.memory_space<vmem>>, vector<2x256xf32>
    %179 = vector.broadcast %177 : vector<2x1xf32> to vector<2x256xf32>
    %180 = arith.mulf %179, %178 : vector<2x256xf32>
    %181 = arith.addf %170, %180 : vector<2x256xf32>
    %c0_i32_46 = arith.constant 0 : i32
    %182 = vector.broadcast %c0_i32_46 : i32 to vector<2x1xi32>
    %183 = arith.cmpi eq, %31, %182 : vector<2x1xi32>
    %c36 = arith.constant 36 : index
    %184 = memref.load %arg2[%c36] : memref<98xf32, #tpu.memory_space<smem>>
    %c85 = arith.constant 85 : index
    %185 = memref.load %arg2[%c85] : memref<98xf32, #tpu.memory_space<smem>>
    %186 = vector.broadcast %184 : f32 to vector<2x1xf32>
    %187 = vector.broadcast %185 : f32 to vector<2x1xf32>
    %188 = arith.select %183, %186, %187 : vector<2x1xi1>, vector<2x1xf32>
    %c0_47 = arith.constant 0 : index
    %c158 = arith.constant 158 : index
    %189 = vector.load %arg4[%c0_47, %c158] : memref<2x435xf32, #tpu.memory_space<vmem>>, vector<2x256xf32>
    %190 = vector.broadcast %188 : vector<2x1xf32> to vector<2x256xf32>
    %191 = arith.mulf %190, %189 : vector<2x256xf32>
    %192 = arith.addf %181, %191 : vector<2x256xf32>
    %c0_i32_48 = arith.constant 0 : i32
    %193 = vector.broadcast %c0_i32_48 : i32 to vector<2x1xi32>
    %194 = arith.cmpi eq, %31, %193 : vector<2x1xi32>
    %c43 = arith.constant 43 : index
    %195 = memref.load %arg2[%c43] : memref<98xf32, #tpu.memory_space<smem>>
    %c92 = arith.constant 92 : index
    %196 = memref.load %arg2[%c92] : memref<98xf32, #tpu.memory_space<smem>>
    %197 = vector.broadcast %195 : f32 to vector<2x1xf32>
    %198 = vector.broadcast %196 : f32 to vector<2x1xf32>
    %199 = arith.select %194, %197, %198 : vector<2x1xi1>, vector<2x1xf32>
    %c0_49 = arith.constant 0 : index
    %c174 = arith.constant 174 : index
    %200 = vector.load %arg4[%c0_49, %c174] : memref<2x435xf32, #tpu.memory_space<vmem>>, vector<2x256xf32>
    %201 = vector.broadcast %199 : vector<2x1xf32> to vector<2x256xf32>
    %202 = arith.mulf %201, %200 : vector<2x256xf32>
    %203 = arith.addf %192, %202 : vector<2x256xf32>
    %cst_50 = arith.constant 0.000000e+00 : f32
    %204 = vector.shape_cast %125 : vector<1x256xi1> to vector<1x256xi1>
    %205 = vector.broadcast %204 : vector<1x256xi1> to vector<2x256xi1>
    %206 = vector.broadcast %cst_50 : f32 to vector<2x256xf32>
    %207 = arith.select %205, %203, %206 : vector<2x256xi1>, vector<2x256xf32>
    %208 = arith.addf %120, %207 : vector<2x256xf32>
    %c1_i32_51 = arith.constant 1 : i32
    %209 = vector.broadcast %c1_i32_51 : i32 to vector<1x256xi32>
    %210 = arith.cmpi sge, %30, %209 : vector<1x256xi32>
    %c17_i32 = arith.constant 17 : i32
    %211 = vector.broadcast %c17_i32 : i32 to vector<1x256xi32>
    %212 = arith.cmpi slt, %30, %211 : vector<1x256xi32>
    %213 = arith.andi %210, %212 : vector<1x256xi1>
    %cst_52 = arith.constant 0.000000e+00 : f32
    %214 = vector.broadcast %cst_52 : f32 to vector<2x256xf32>
    %c0_i32_53 = arith.constant 0 : i32
    %215 = vector.broadcast %c0_i32_53 : i32 to vector<2x1xi32>
    %216 = arith.cmpi eq, %31, %215 : vector<2x1xi32>
    %c2 = arith.constant 2 : index
    %217 = memref.load %arg2[%c2] : memref<98xf32, #tpu.memory_space<smem>>
    %c51 = arith.constant 51 : index
    %218 = memref.load %arg2[%c51] : memref<98xf32, #tpu.memory_space<smem>>
    %219 = vector.broadcast %217 : f32 to vector<2x1xf32>
    %220 = vector.broadcast %218 : f32 to vector<2x1xf32>
    %221 = arith.select %216, %219, %220 : vector<2x1xi1>, vector<2x1xf32>
    %c0_54 = arith.constant 0 : index
    %c79 = arith.constant 79 : index
    %222 = vector.load %arg4[%c0_54, %c79] : memref<2x435xf32, #tpu.memory_space<vmem>>, vector<2x256xf32>
    %223 = vector.broadcast %221 : vector<2x1xf32> to vector<2x256xf32>
    %224 = arith.mulf %223, %222 : vector<2x256xf32>
    %225 = arith.addf %214, %224 : vector<2x256xf32>
    %c0_i32_55 = arith.constant 0 : i32
    %226 = vector.broadcast %c0_i32_55 : i32 to vector<2x1xi32>
    %227 = arith.cmpi eq, %31, %226 : vector<2x1xi32>
    %c9 = arith.constant 9 : index
    %228 = memref.load %arg2[%c9] : memref<98xf32, #tpu.memory_space<smem>>
    %c58 = arith.constant 58 : index
    %229 = memref.load %arg2[%c58] : memref<98xf32, #tpu.memory_space<smem>>
    %230 = vector.broadcast %228 : f32 to vector<2x1xf32>
    %231 = vector.broadcast %229 : f32 to vector<2x1xf32>
    %232 = arith.select %227, %230, %231 : vector<2x1xi1>, vector<2x1xf32>
    %c0_56 = arith.constant 0 : index
    %c95 = arith.constant 95 : index
    %233 = vector.load %arg4[%c0_56, %c95] : memref<2x435xf32, #tpu.memory_space<vmem>>, vector<2x256xf32>
    %234 = vector.broadcast %232 : vector<2x1xf32> to vector<2x256xf32>
    %235 = arith.mulf %234, %233 : vector<2x256xf32>
    %236 = arith.addf %225, %235 : vector<2x256xf32>
    %c0_i32_57 = arith.constant 0 : i32
    %237 = vector.broadcast %c0_i32_57 : i32 to vector<2x1xi32>
    %238 = arith.cmpi eq, %31, %237 : vector<2x1xi32>
    %c16 = arith.constant 16 : index
    %239 = memref.load %arg2[%c16] : memref<98xf32, #tpu.memory_space<smem>>
    %c65 = arith.constant 65 : index
    %240 = memref.load %arg2[%c65] : memref<98xf32, #tpu.memory_space<smem>>
    %241 = vector.broadcast %239 : f32 to vector<2x1xf32>
    %242 = vector.broadcast %240 : f32 to vector<2x1xf32>
    %243 = arith.select %238, %241, %242 : vector<2x1xi1>, vector<2x1xf32>
    %c0_58 = arith.constant 0 : index
    %c111 = arith.constant 111 : index
    %244 = vector.load %arg4[%c0_58, %c111] : memref<2x435xf32, #tpu.memory_space<vmem>>, vector<2x256xf32>
    %245 = vector.broadcast %243 : vector<2x1xf32> to vector<2x256xf32>
    %246 = arith.mulf %245, %244 : vector<2x256xf32>
    %247 = arith.addf %236, %246 : vector<2x256xf32>
    %c0_i32_59 = arith.constant 0 : i32
    %248 = vector.broadcast %c0_i32_59 : i32 to vector<2x1xi32>
    %249 = arith.cmpi eq, %31, %248 : vector<2x1xi32>
    %c23 = arith.constant 23 : index
    %250 = memref.load %arg2[%c23] : memref<98xf32, #tpu.memory_space<smem>>
    %c72 = arith.constant 72 : index
    %251 = memref.load %arg2[%c72] : memref<98xf32, #tpu.memory_space<smem>>
    %252 = vector.broadcast %250 : f32 to vector<2x1xf32>
    %253 = vector.broadcast %251 : f32 to vector<2x1xf32>
    %254 = arith.select %249, %252, %253 : vector<2x1xi1>, vector<2x1xf32>
    %c0_60 = arith.constant 0 : index
    %c127 = arith.constant 127 : index
    %255 = vector.load %arg4[%c0_60, %c127] : memref<2x435xf32, #tpu.memory_space<vmem>>, vector<2x256xf32>
    %256 = vector.broadcast %254 : vector<2x1xf32> to vector<2x256xf32>
    %257 = arith.mulf %256, %255 : vector<2x256xf32>
    %258 = arith.addf %247, %257 : vector<2x256xf32>
    %c0_i32_61 = arith.constant 0 : i32
    %259 = vector.broadcast %c0_i32_61 : i32 to vector<2x1xi32>
    %260 = arith.cmpi eq, %31, %259 : vector<2x1xi32>
    %c30 = arith.constant 30 : index
    %261 = memref.load %arg2[%c30] : memref<98xf32, #tpu.memory_space<smem>>
    %c79_62 = arith.constant 79 : index
    %262 = memref.load %arg2[%c79_62] : memref<98xf32, #tpu.memory_space<smem>>
    %263 = vector.broadcast %261 : f32 to vector<2x1xf32>
    %264 = vector.broadcast %262 : f32 to vector<2x1xf32>
    %265 = arith.select %260, %263, %264 : vector<2x1xi1>, vector<2x1xf32>
    %c0_63 = arith.constant 0 : index
    %c143 = arith.constant 143 : index
    %266 = vector.load %arg4[%c0_63, %c143] : memref<2x435xf32, #tpu.memory_space<vmem>>, vector<2x256xf32>
    %267 = vector.broadcast %265 : vector<2x1xf32> to vector<2x256xf32>
    %268 = arith.mulf %267, %266 : vector<2x256xf32>
    %269 = arith.addf %258, %268 : vector<2x256xf32>
    %c0_i32_64 = arith.constant 0 : i32
    %270 = vector.broadcast %c0_i32_64 : i32 to vector<2x1xi32>
    %271 = arith.cmpi eq, %31, %270 : vector<2x1xi32>
    %c37 = arith.constant 37 : index
    %272 = memref.load %arg2[%c37] : memref<98xf32, #tpu.memory_space<smem>>
    %c86 = arith.constant 86 : index
    %273 = memref.load %arg2[%c86] : memref<98xf32, #tpu.memory_space<smem>>
    %274 = vector.broadcast %272 : f32 to vector<2x1xf32>
    %275 = vector.broadcast %273 : f32 to vector<2x1xf32>
    %276 = arith.select %271, %274, %275 : vector<2x1xi1>, vector<2x1xf32>
    %c0_65 = arith.constant 0 : index
    %c159 = arith.constant 159 : index
    %277 = vector.load %arg4[%c0_65, %c159] : memref<2x435xf32, #tpu.memory_space<vmem>>, vector<2x256xf32>
    %278 = vector.broadcast %276 : vector<2x1xf32> to vector<2x256xf32>
    %279 = arith.mulf %278, %277 : vector<2x256xf32>
    %280 = arith.addf %269, %279 : vector<2x256xf32>
    %c0_i32_66 = arith.constant 0 : i32
    %281 = vector.broadcast %c0_i32_66 : i32 to vector<2x1xi32>
    %282 = arith.cmpi eq, %31, %281 : vector<2x1xi32>
    %c44 = arith.constant 44 : index
    %283 = memref.load %arg2[%c44] : memref<98xf32, #tpu.memory_space<smem>>
    %c93_67 = arith.constant 93 : index
    %284 = memref.load %arg2[%c93_67] : memref<98xf32, #tpu.memory_space<smem>>
    %285 = vector.broadcast %283 : f32 to vector<2x1xf32>
    %286 = vector.broadcast %284 : f32 to vector<2x1xf32>
    %287 = arith.select %282, %285, %286 : vector<2x1xi1>, vector<2x1xf32>
    %c0_68 = arith.constant 0 : index
    %c175 = arith.constant 175 : index
    %288 = vector.load %arg4[%c0_68, %c175] : memref<2x435xf32, #tpu.memory_space<vmem>>, vector<2x256xf32>
    %289 = vector.broadcast %287 : vector<2x1xf32> to vector<2x256xf32>
    %290 = arith.mulf %289, %288 : vector<2x256xf32>
    %291 = arith.addf %280, %290 : vector<2x256xf32>
    %cst_69 = arith.constant 0.000000e+00 : f32
    %292 = vector.shape_cast %213 : vector<1x256xi1> to vector<1x256xi1>
    %293 = vector.broadcast %292 : vector<1x256xi1> to vector<2x256xi1>
    %294 = vector.broadcast %cst_69 : f32 to vector<2x256xf32>
    %295 = arith.select %293, %291, %294 : vector<2x256xi1>, vector<2x256xf32>
    %296 = arith.addf %208, %295 : vector<2x256xf32>
    %c0_i32_70 = arith.constant 0 : i32
    %297 = vector.broadcast %c0_i32_70 : i32 to vector<1x256xi32>
    %298 = arith.cmpi sge, %30, %297 : vector<1x256xi32>
    %c16_i32_71 = arith.constant 16 : i32
    %299 = vector.broadcast %c16_i32_71 : i32 to vector<1x256xi32>
    %300 = arith.cmpi slt, %30, %299 : vector<1x256xi32>
    %301 = arith.andi %298, %300 : vector<1x256xi1>
    %cst_72 = arith.constant 0.000000e+00 : f32
    %302 = vector.broadcast %cst_72 : f32 to vector<2x256xf32>
    %c0_i32_73 = arith.constant 0 : i32
    %303 = vector.broadcast %c0_i32_73 : i32 to vector<2x1xi32>
    %304 = arith.cmpi eq, %31, %303 : vector<2x1xi32>
    %c3 = arith.constant 3 : index
    %305 = memref.load %arg2[%c3] : memref<98xf32, #tpu.memory_space<smem>>
    %c52 = arith.constant 52 : index
    %306 = memref.load %arg2[%c52] : memref<98xf32, #tpu.memory_space<smem>>
    %307 = vector.broadcast %305 : f32 to vector<2x1xf32>
    %308 = vector.broadcast %306 : f32 to vector<2x1xf32>
    %309 = arith.select %304, %307, %308 : vector<2x1xi1>, vector<2x1xf32>
    %c0_74 = arith.constant 0 : index
    %c80 = arith.constant 80 : index
    %310 = vector.load %arg4[%c0_74, %c80] : memref<2x435xf32, #tpu.memory_space<vmem>>, vector<2x256xf32>
    %311 = vector.broadcast %309 : vector<2x1xf32> to vector<2x256xf32>
    %312 = arith.mulf %311, %310 : vector<2x256xf32>
    %313 = arith.addf %302, %312 : vector<2x256xf32>
    %c0_i32_75 = arith.constant 0 : i32
    %314 = vector.broadcast %c0_i32_75 : i32 to vector<2x1xi32>
    %315 = arith.cmpi eq, %31, %314 : vector<2x1xi32>
    %c10 = arith.constant 10 : index
    %316 = memref.load %arg2[%c10] : memref<98xf32, #tpu.memory_space<smem>>
    %c59 = arith.constant 59 : index
    %317 = memref.load %arg2[%c59] : memref<98xf32, #tpu.memory_space<smem>>
    %318 = vector.broadcast %316 : f32 to vector<2x1xf32>
    %319 = vector.broadcast %317 : f32 to vector<2x1xf32>
    %320 = arith.select %315, %318, %319 : vector<2x1xi1>, vector<2x1xf32>
    %c0_76 = arith.constant 0 : index
    %c96 = arith.constant 96 : index
    %321 = vector.load %arg4[%c0_76, %c96] : memref<2x435xf32, #tpu.memory_space<vmem>>, vector<2x256xf32>
    %322 = vector.broadcast %320 : vector<2x1xf32> to vector<2x256xf32>
    %323 = arith.mulf %322, %321 : vector<2x256xf32>
    %324 = arith.addf %313, %323 : vector<2x256xf32>
    %c0_i32_77 = arith.constant 0 : i32
    %325 = vector.broadcast %c0_i32_77 : i32 to vector<2x1xi32>
    %326 = arith.cmpi eq, %31, %325 : vector<2x1xi32>
    %c17 = arith.constant 17 : index
    %327 = memref.load %arg2[%c17] : memref<98xf32, #tpu.memory_space<smem>>
    %c66 = arith.constant 66 : index
    %328 = memref.load %arg2[%c66] : memref<98xf32, #tpu.memory_space<smem>>
    %329 = vector.broadcast %327 : f32 to vector<2x1xf32>
    %330 = vector.broadcast %328 : f32 to vector<2x1xf32>
    %331 = arith.select %326, %329, %330 : vector<2x1xi1>, vector<2x1xf32>
    %c0_78 = arith.constant 0 : index
    %c112 = arith.constant 112 : index
    %332 = vector.load %arg4[%c0_78, %c112] : memref<2x435xf32, #tpu.memory_space<vmem>>, vector<2x256xf32>
    %333 = vector.broadcast %331 : vector<2x1xf32> to vector<2x256xf32>
    %334 = arith.mulf %333, %332 : vector<2x256xf32>
    %335 = arith.addf %324, %334 : vector<2x256xf32>
    %c0_i32_79 = arith.constant 0 : i32
    %336 = vector.broadcast %c0_i32_79 : i32 to vector<2x1xi32>
    %337 = arith.cmpi eq, %31, %336 : vector<2x1xi32>
    %c24 = arith.constant 24 : index
    %338 = memref.load %arg2[%c24] : memref<98xf32, #tpu.memory_space<smem>>
    %c73 = arith.constant 73 : index
    %339 = memref.load %arg2[%c73] : memref<98xf32, #tpu.memory_space<smem>>
    %340 = vector.broadcast %338 : f32 to vector<2x1xf32>
    %341 = vector.broadcast %339 : f32 to vector<2x1xf32>
    %342 = arith.select %337, %340, %341 : vector<2x1xi1>, vector<2x1xf32>
    %c0_80 = arith.constant 0 : index
    %c128_81 = arith.constant 128 : index
    %343 = vector.load %arg4[%c0_80, %c128_81] : memref<2x435xf32, #tpu.memory_space<vmem>>, vector<2x256xf32>
    %344 = vector.broadcast %342 : vector<2x1xf32> to vector<2x256xf32>
    %345 = arith.mulf %344, %343 : vector<2x256xf32>
    %346 = arith.addf %335, %345 : vector<2x256xf32>
    %c0_i32_82 = arith.constant 0 : i32
    %347 = vector.broadcast %c0_i32_82 : i32 to vector<2x1xi32>
    %348 = arith.cmpi eq, %31, %347 : vector<2x1xi32>
    %c31 = arith.constant 31 : index
    %349 = memref.load %arg2[%c31] : memref<98xf32, #tpu.memory_space<smem>>
    %c80_83 = arith.constant 80 : index
    %350 = memref.load %arg2[%c80_83] : memref<98xf32, #tpu.memory_space<smem>>
    %351 = vector.broadcast %349 : f32 to vector<2x1xf32>
    %352 = vector.broadcast %350 : f32 to vector<2x1xf32>
    %353 = arith.select %348, %351, %352 : vector<2x1xi1>, vector<2x1xf32>
    %c0_84 = arith.constant 0 : index
    %c144 = arith.constant 144 : index
    %354 = vector.load %arg4[%c0_84, %c144] : memref<2x435xf32, #tpu.memory_space<vmem>>, vector<2x256xf32>
    %355 = vector.broadcast %353 : vector<2x1xf32> to vector<2x256xf32>
    %356 = arith.mulf %355, %354 : vector<2x256xf32>
    %357 = arith.addf %346, %356 : vector<2x256xf32>
    %c0_i32_85 = arith.constant 0 : i32
    %358 = vector.broadcast %c0_i32_85 : i32 to vector<2x1xi32>
    %359 = arith.cmpi eq, %31, %358 : vector<2x1xi32>
    %c38 = arith.constant 38 : index
    %360 = memref.load %arg2[%c38] : memref<98xf32, #tpu.memory_space<smem>>
    %c87 = arith.constant 87 : index
    %361 = memref.load %arg2[%c87] : memref<98xf32, #tpu.memory_space<smem>>
    %362 = vector.broadcast %360 : f32 to vector<2x1xf32>
    %363 = vector.broadcast %361 : f32 to vector<2x1xf32>
    %364 = arith.select %359, %362, %363 : vector<2x1xi1>, vector<2x1xf32>
    %c0_86 = arith.constant 0 : index
    %c160 = arith.constant 160 : index
    %365 = vector.load %arg4[%c0_86, %c160] : memref<2x435xf32, #tpu.memory_space<vmem>>, vector<2x256xf32>
    %366 = vector.broadcast %364 : vector<2x1xf32> to vector<2x256xf32>
    %367 = arith.mulf %366, %365 : vector<2x256xf32>
    %368 = arith.addf %357, %367 : vector<2x256xf32>
    %c0_i32_87 = arith.constant 0 : i32
    %369 = vector.broadcast %c0_i32_87 : i32 to vector<2x1xi32>
    %370 = arith.cmpi eq, %31, %369 : vector<2x1xi32>
    %c45 = arith.constant 45 : index
    %371 = memref.load %arg2[%c45] : memref<98xf32, #tpu.memory_space<smem>>
    %c94_88 = arith.constant 94 : index
    %372 = memref.load %arg2[%c94_88] : memref<98xf32, #tpu.memory_space<smem>>
    %373 = vector.broadcast %371 : f32 to vector<2x1xf32>
    %374 = vector.broadcast %372 : f32 to vector<2x1xf32>
    %375 = arith.select %370, %373, %374 : vector<2x1xi1>, vector<2x1xf32>
    %c0_89 = arith.constant 0 : index
    %c176 = arith.constant 176 : index
    %376 = vector.load %arg4[%c0_89, %c176] : memref<2x435xf32, #tpu.memory_space<vmem>>, vector<2x256xf32>
    %377 = vector.broadcast %375 : vector<2x1xf32> to vector<2x256xf32>
    %378 = arith.mulf %377, %376 : vector<2x256xf32>
    %379 = arith.addf %368, %378 : vector<2x256xf32>
    %cst_90 = arith.constant 0.000000e+00 : f32
    %380 = vector.shape_cast %301 : vector<1x256xi1> to vector<1x256xi1>
    %381 = vector.broadcast %380 : vector<1x256xi1> to vector<2x256xi1>
    %382 = vector.broadcast %cst_90 : f32 to vector<2x256xf32>
    %383 = arith.select %381, %379, %382 : vector<2x256xi1>, vector<2x256xf32>
    %384 = arith.addf %296, %383 : vector<2x256xf32>
    %c-1_i32 = arith.constant -1 : i32
    %385 = vector.broadcast %c-1_i32 : i32 to vector<1x256xi32>
    %386 = arith.cmpi sge, %30, %385 : vector<1x256xi32>
    %c15_i32 = arith.constant 15 : i32
    %387 = vector.broadcast %c15_i32 : i32 to vector<1x256xi32>
    %388 = arith.cmpi slt, %30, %387 : vector<1x256xi32>
    %389 = arith.andi %386, %388 : vector<1x256xi1>
    %cst_91 = arith.constant 0.000000e+00 : f32
    %390 = vector.broadcast %cst_91 : f32 to vector<2x256xf32>
    %c0_i32_92 = arith.constant 0 : i32
    %391 = vector.broadcast %c0_i32_92 : i32 to vector<2x1xi32>
    %392 = arith.cmpi eq, %31, %391 : vector<2x1xi32>
    %c4 = arith.constant 4 : index
    %393 = memref.load %arg2[%c4] : memref<98xf32, #tpu.memory_space<smem>>
    %c53 = arith.constant 53 : index
    %394 = memref.load %arg2[%c53] : memref<98xf32, #tpu.memory_space<smem>>
    %395 = vector.broadcast %393 : f32 to vector<2x1xf32>
    %396 = vector.broadcast %394 : f32 to vector<2x1xf32>
    %397 = arith.select %392, %395, %396 : vector<2x1xi1>, vector<2x1xf32>
    %c0_93 = arith.constant 0 : index
    %c81 = arith.constant 81 : index
    %398 = vector.load %arg4[%c0_93, %c81] : memref<2x435xf32, #tpu.memory_space<vmem>>, vector<2x256xf32>
    %399 = vector.broadcast %397 : vector<2x1xf32> to vector<2x256xf32>
    %400 = arith.mulf %399, %398 : vector<2x256xf32>
    %401 = arith.addf %390, %400 : vector<2x256xf32>
    %c0_i32_94 = arith.constant 0 : i32
    %402 = vector.broadcast %c0_i32_94 : i32 to vector<2x1xi32>
    %403 = arith.cmpi eq, %31, %402 : vector<2x1xi32>
    %c11 = arith.constant 11 : index
    %404 = memref.load %arg2[%c11] : memref<98xf32, #tpu.memory_space<smem>>
    %c60 = arith.constant 60 : index
    %405 = memref.load %arg2[%c60] : memref<98xf32, #tpu.memory_space<smem>>
    %406 = vector.broadcast %404 : f32 to vector<2x1xf32>
    %407 = vector.broadcast %405 : f32 to vector<2x1xf32>
    %408 = arith.select %403, %406, %407 : vector<2x1xi1>, vector<2x1xf32>
    %c0_95 = arith.constant 0 : index
    %c97 = arith.constant 97 : index
    %409 = vector.load %arg4[%c0_95, %c97] : memref<2x435xf32, #tpu.memory_space<vmem>>, vector<2x256xf32>
    %410 = vector.broadcast %408 : vector<2x1xf32> to vector<2x256xf32>
    %411 = arith.mulf %410, %409 : vector<2x256xf32>
    %412 = arith.addf %401, %411 : vector<2x256xf32>
    %c0_i32_96 = arith.constant 0 : i32
    %413 = vector.broadcast %c0_i32_96 : i32 to vector<2x1xi32>
    %414 = arith.cmpi eq, %31, %413 : vector<2x1xi32>
    %c18 = arith.constant 18 : index
    %415 = memref.load %arg2[%c18] : memref<98xf32, #tpu.memory_space<smem>>
    %c67 = arith.constant 67 : index
    %416 = memref.load %arg2[%c67] : memref<98xf32, #tpu.memory_space<smem>>
    %417 = vector.broadcast %415 : f32 to vector<2x1xf32>
    %418 = vector.broadcast %416 : f32 to vector<2x1xf32>
    %419 = arith.select %414, %417, %418 : vector<2x1xi1>, vector<2x1xf32>
    %c0_97 = arith.constant 0 : index
    %c113 = arith.constant 113 : index
    %420 = vector.load %arg4[%c0_97, %c113] : memref<2x435xf32, #tpu.memory_space<vmem>>, vector<2x256xf32>
    %421 = vector.broadcast %419 : vector<2x1xf32> to vector<2x256xf32>
    %422 = arith.mulf %421, %420 : vector<2x256xf32>
    %423 = arith.addf %412, %422 : vector<2x256xf32>
    %c0_i32_98 = arith.constant 0 : i32
    %424 = vector.broadcast %c0_i32_98 : i32 to vector<2x1xi32>
    %425 = arith.cmpi eq, %31, %424 : vector<2x1xi32>
    %c25 = arith.constant 25 : index
    %426 = memref.load %arg2[%c25] : memref<98xf32, #tpu.memory_space<smem>>
    %c74 = arith.constant 74 : index
    %427 = memref.load %arg2[%c74] : memref<98xf32, #tpu.memory_space<smem>>
    %428 = vector.broadcast %426 : f32 to vector<2x1xf32>
    %429 = vector.broadcast %427 : f32 to vector<2x1xf32>
    %430 = arith.select %425, %428, %429 : vector<2x1xi1>, vector<2x1xf32>
    %c0_99 = arith.constant 0 : index
    %c129 = arith.constant 129 : index
    %431 = vector.load %arg4[%c0_99, %c129] : memref<2x435xf32, #tpu.memory_space<vmem>>, vector<2x256xf32>
    %432 = vector.broadcast %430 : vector<2x1xf32> to vector<2x256xf32>
    %433 = arith.mulf %432, %431 : vector<2x256xf32>
    %434 = arith.addf %423, %433 : vector<2x256xf32>
    %c0_i32_100 = arith.constant 0 : i32
    %435 = vector.broadcast %c0_i32_100 : i32 to vector<2x1xi32>
    %436 = arith.cmpi eq, %31, %435 : vector<2x1xi32>
    %c32 = arith.constant 32 : index
    %437 = memref.load %arg2[%c32] : memref<98xf32, #tpu.memory_space<smem>>
    %c81_101 = arith.constant 81 : index
    %438 = memref.load %arg2[%c81_101] : memref<98xf32, #tpu.memory_space<smem>>
    %439 = vector.broadcast %437 : f32 to vector<2x1xf32>
    %440 = vector.broadcast %438 : f32 to vector<2x1xf32>
    %441 = arith.select %436, %439, %440 : vector<2x1xi1>, vector<2x1xf32>
    %c0_102 = arith.constant 0 : index
    %c145 = arith.constant 145 : index
    %442 = vector.load %arg4[%c0_102, %c145] : memref<2x435xf32, #tpu.memory_space<vmem>>, vector<2x256xf32>
    %443 = vector.broadcast %441 : vector<2x1xf32> to vector<2x256xf32>
    %444 = arith.mulf %443, %442 : vector<2x256xf32>
    %445 = arith.addf %434, %444 : vector<2x256xf32>
    %c0_i32_103 = arith.constant 0 : i32
    %446 = vector.broadcast %c0_i32_103 : i32 to vector<2x1xi32>
    %447 = arith.cmpi eq, %31, %446 : vector<2x1xi32>
    %c39 = arith.constant 39 : index
    %448 = memref.load %arg2[%c39] : memref<98xf32, #tpu.memory_space<smem>>
    %c88 = arith.constant 88 : index
    %449 = memref.load %arg2[%c88] : memref<98xf32, #tpu.memory_space<smem>>
    %450 = vector.broadcast %448 : f32 to vector<2x1xf32>
    %451 = vector.broadcast %449 : f32 to vector<2x1xf32>
    %452 = arith.select %447, %450, %451 : vector<2x1xi1>, vector<2x1xf32>
    %c0_104 = arith.constant 0 : index
    %c161 = arith.constant 161 : index
    %453 = vector.load %arg4[%c0_104, %c161] : memref<2x435xf32, #tpu.memory_space<vmem>>, vector<2x256xf32>
    %454 = vector.broadcast %452 : vector<2x1xf32> to vector<2x256xf32>
    %455 = arith.mulf %454, %453 : vector<2x256xf32>
    %456 = arith.addf %445, %455 : vector<2x256xf32>
    %c0_i32_105 = arith.constant 0 : i32
    %457 = vector.broadcast %c0_i32_105 : i32 to vector<2x1xi32>
    %458 = arith.cmpi eq, %31, %457 : vector<2x1xi32>
    %c46 = arith.constant 46 : index
    %459 = memref.load %arg2[%c46] : memref<98xf32, #tpu.memory_space<smem>>
    %c95_106 = arith.constant 95 : index
    %460 = memref.load %arg2[%c95_106] : memref<98xf32, #tpu.memory_space<smem>>
    %461 = vector.broadcast %459 : f32 to vector<2x1xf32>
    %462 = vector.broadcast %460 : f32 to vector<2x1xf32>
    %463 = arith.select %458, %461, %462 : vector<2x1xi1>, vector<2x1xf32>
    %c0_107 = arith.constant 0 : index
    %c177 = arith.constant 177 : index
    %464 = vector.load %arg4[%c0_107, %c177] : memref<2x435xf32, #tpu.memory_space<vmem>>, vector<2x256xf32>
    %465 = vector.broadcast %463 : vector<2x1xf32> to vector<2x256xf32>
    %466 = arith.mulf %465, %464 : vector<2x256xf32>
    %467 = arith.addf %456, %466 : vector<2x256xf32>
    %cst_108 = arith.constant 0.000000e+00 : f32
    %468 = vector.shape_cast %389 : vector<1x256xi1> to vector<1x256xi1>
    %469 = vector.broadcast %468 : vector<1x256xi1> to vector<2x256xi1>
    %470 = vector.broadcast %cst_108 : f32 to vector<2x256xf32>
    %471 = arith.select %469, %467, %470 : vector<2x256xi1>, vector<2x256xf32>
    %472 = arith.addf %384, %471 : vector<2x256xf32>
    %c-2_i32 = arith.constant -2 : i32
    %473 = vector.broadcast %c-2_i32 : i32 to vector<1x256xi32>
    %474 = arith.cmpi sge, %30, %473 : vector<1x256xi32>
    %c14_i32 = arith.constant 14 : i32
    %475 = vector.broadcast %c14_i32 : i32 to vector<1x256xi32>
    %476 = arith.cmpi slt, %30, %475 : vector<1x256xi32>
    %477 = arith.andi %474, %476 : vector<1x256xi1>
    %cst_109 = arith.constant 0.000000e+00 : f32
    %478 = vector.broadcast %cst_109 : f32 to vector<2x256xf32>
    %c0_i32_110 = arith.constant 0 : i32
    %479 = vector.broadcast %c0_i32_110 : i32 to vector<2x1xi32>
    %480 = arith.cmpi eq, %31, %479 : vector<2x1xi32>
    %c5 = arith.constant 5 : index
    %481 = memref.load %arg2[%c5] : memref<98xf32, #tpu.memory_space<smem>>
    %c54 = arith.constant 54 : index
    %482 = memref.load %arg2[%c54] : memref<98xf32, #tpu.memory_space<smem>>
    %483 = vector.broadcast %481 : f32 to vector<2x1xf32>
    %484 = vector.broadcast %482 : f32 to vector<2x1xf32>
    %485 = arith.select %480, %483, %484 : vector<2x1xi1>, vector<2x1xf32>
    %c0_111 = arith.constant 0 : index
    %c82 = arith.constant 82 : index
    %486 = vector.load %arg4[%c0_111, %c82] : memref<2x435xf32, #tpu.memory_space<vmem>>, vector<2x256xf32>
    %487 = vector.broadcast %485 : vector<2x1xf32> to vector<2x256xf32>
    %488 = arith.mulf %487, %486 : vector<2x256xf32>
    %489 = arith.addf %478, %488 : vector<2x256xf32>
    %c0_i32_112 = arith.constant 0 : i32
    %490 = vector.broadcast %c0_i32_112 : i32 to vector<2x1xi32>
    %491 = arith.cmpi eq, %31, %490 : vector<2x1xi32>
    %c12 = arith.constant 12 : index
    %492 = memref.load %arg2[%c12] : memref<98xf32, #tpu.memory_space<smem>>
    %c61 = arith.constant 61 : index
    %493 = memref.load %arg2[%c61] : memref<98xf32, #tpu.memory_space<smem>>
    %494 = vector.broadcast %492 : f32 to vector<2x1xf32>
    %495 = vector.broadcast %493 : f32 to vector<2x1xf32>
    %496 = arith.select %491, %494, %495 : vector<2x1xi1>, vector<2x1xf32>
    %c0_113 = arith.constant 0 : index
    %c98 = arith.constant 98 : index
    %497 = vector.load %arg4[%c0_113, %c98] : memref<2x435xf32, #tpu.memory_space<vmem>>, vector<2x256xf32>
    %498 = vector.broadcast %496 : vector<2x1xf32> to vector<2x256xf32>
    %499 = arith.mulf %498, %497 : vector<2x256xf32>
    %500 = arith.addf %489, %499 : vector<2x256xf32>
    %c0_i32_114 = arith.constant 0 : i32
    %501 = vector.broadcast %c0_i32_114 : i32 to vector<2x1xi32>
    %502 = arith.cmpi eq, %31, %501 : vector<2x1xi32>
    %c19 = arith.constant 19 : index
    %503 = memref.load %arg2[%c19] : memref<98xf32, #tpu.memory_space<smem>>
    %c68 = arith.constant 68 : index
    %504 = memref.load %arg2[%c68] : memref<98xf32, #tpu.memory_space<smem>>
    %505 = vector.broadcast %503 : f32 to vector<2x1xf32>
    %506 = vector.broadcast %504 : f32 to vector<2x1xf32>
    %507 = arith.select %502, %505, %506 : vector<2x1xi1>, vector<2x1xf32>
    %c0_115 = arith.constant 0 : index
    %c114 = arith.constant 114 : index
    %508 = vector.load %arg4[%c0_115, %c114] : memref<2x435xf32, #tpu.memory_space<vmem>>, vector<2x256xf32>
    %509 = vector.broadcast %507 : vector<2x1xf32> to vector<2x256xf32>
    %510 = arith.mulf %509, %508 : vector<2x256xf32>
    %511 = arith.addf %500, %510 : vector<2x256xf32>
    %c0_i32_116 = arith.constant 0 : i32
    %512 = vector.broadcast %c0_i32_116 : i32 to vector<2x1xi32>
    %513 = arith.cmpi eq, %31, %512 : vector<2x1xi32>
    %c26 = arith.constant 26 : index
    %514 = memref.load %arg2[%c26] : memref<98xf32, #tpu.memory_space<smem>>
    %c75 = arith.constant 75 : index
    %515 = memref.load %arg2[%c75] : memref<98xf32, #tpu.memory_space<smem>>
    %516 = vector.broadcast %514 : f32 to vector<2x1xf32>
    %517 = vector.broadcast %515 : f32 to vector<2x1xf32>
    %518 = arith.select %513, %516, %517 : vector<2x1xi1>, vector<2x1xf32>
    %c0_117 = arith.constant 0 : index
    %c130 = arith.constant 130 : index
    %519 = vector.load %arg4[%c0_117, %c130] : memref<2x435xf32, #tpu.memory_space<vmem>>, vector<2x256xf32>
    %520 = vector.broadcast %518 : vector<2x1xf32> to vector<2x256xf32>
    %521 = arith.mulf %520, %519 : vector<2x256xf32>
    %522 = arith.addf %511, %521 : vector<2x256xf32>
    %c0_i32_118 = arith.constant 0 : i32
    %523 = vector.broadcast %c0_i32_118 : i32 to vector<2x1xi32>
    %524 = arith.cmpi eq, %31, %523 : vector<2x1xi32>
    %c33 = arith.constant 33 : index
    %525 = memref.load %arg2[%c33] : memref<98xf32, #tpu.memory_space<smem>>
    %c82_119 = arith.constant 82 : index
    %526 = memref.load %arg2[%c82_119] : memref<98xf32, #tpu.memory_space<smem>>
    %527 = vector.broadcast %525 : f32 to vector<2x1xf32>
    %528 = vector.broadcast %526 : f32 to vector<2x1xf32>
    %529 = arith.select %524, %527, %528 : vector<2x1xi1>, vector<2x1xf32>
    %c0_120 = arith.constant 0 : index
    %c146 = arith.constant 146 : index
    %530 = vector.load %arg4[%c0_120, %c146] : memref<2x435xf32, #tpu.memory_space<vmem>>, vector<2x256xf32>
    %531 = vector.broadcast %529 : vector<2x1xf32> to vector<2x256xf32>
    %532 = arith.mulf %531, %530 : vector<2x256xf32>
    %533 = arith.addf %522, %532 : vector<2x256xf32>
    %c0_i32_121 = arith.constant 0 : i32
    %534 = vector.broadcast %c0_i32_121 : i32 to vector<2x1xi32>
    %535 = arith.cmpi eq, %31, %534 : vector<2x1xi32>
    %c40 = arith.constant 40 : index
    %536 = memref.load %arg2[%c40] : memref<98xf32, #tpu.memory_space<smem>>
    %c89 = arith.constant 89 : index
    %537 = memref.load %arg2[%c89] : memref<98xf32, #tpu.memory_space<smem>>
    %538 = vector.broadcast %536 : f32 to vector<2x1xf32>
    %539 = vector.broadcast %537 : f32 to vector<2x1xf32>
    %540 = arith.select %535, %538, %539 : vector<2x1xi1>, vector<2x1xf32>
    %c0_122 = arith.constant 0 : index
    %c162 = arith.constant 162 : index
    %541 = vector.load %arg4[%c0_122, %c162] : memref<2x435xf32, #tpu.memory_space<vmem>>, vector<2x256xf32>
    %542 = vector.broadcast %540 : vector<2x1xf32> to vector<2x256xf32>
    %543 = arith.mulf %542, %541 : vector<2x256xf32>
    %544 = arith.addf %533, %543 : vector<2x256xf32>
    %c0_i32_123 = arith.constant 0 : i32
    %545 = vector.broadcast %c0_i32_123 : i32 to vector<2x1xi32>
    %546 = arith.cmpi eq, %31, %545 : vector<2x1xi32>
    %c47 = arith.constant 47 : index
    %547 = memref.load %arg2[%c47] : memref<98xf32, #tpu.memory_space<smem>>
    %c96_124 = arith.constant 96 : index
    %548 = memref.load %arg2[%c96_124] : memref<98xf32, #tpu.memory_space<smem>>
    %549 = vector.broadcast %547 : f32 to vector<2x1xf32>
    %550 = vector.broadcast %548 : f32 to vector<2x1xf32>
    %551 = arith.select %546, %549, %550 : vector<2x1xi1>, vector<2x1xf32>
    %c0_125 = arith.constant 0 : index
    %c178 = arith.constant 178 : index
    %552 = vector.load %arg4[%c0_125, %c178] : memref<2x435xf32, #tpu.memory_space<vmem>>, vector<2x256xf32>
    %553 = vector.broadcast %551 : vector<2x1xf32> to vector<2x256xf32>
    %554 = arith.mulf %553, %552 : vector<2x256xf32>
    %555 = arith.addf %544, %554 : vector<2x256xf32>
    %cst_126 = arith.constant 0.000000e+00 : f32
    %556 = vector.shape_cast %477 : vector<1x256xi1> to vector<1x256xi1>
    %557 = vector.broadcast %556 : vector<1x256xi1> to vector<2x256xi1>
    %558 = vector.broadcast %cst_126 : f32 to vector<2x256xf32>
    %559 = arith.select %557, %555, %558 : vector<2x256xi1>, vector<2x256xf32>
    %560 = arith.addf %472, %559 : vector<2x256xf32>
    %c-3_i32 = arith.constant -3 : i32
    %561 = vector.broadcast %c-3_i32 : i32 to vector<1x256xi32>
    %562 = arith.cmpi sge, %30, %561 : vector<1x256xi32>
    %c13_i32 = arith.constant 13 : i32
    %563 = vector.broadcast %c13_i32 : i32 to vector<1x256xi32>
    %564 = arith.cmpi slt, %30, %563 : vector<1x256xi32>
    %565 = arith.andi %562, %564 : vector<1x256xi1>
    %cst_127 = arith.constant 0.000000e+00 : f32
    %566 = vector.broadcast %cst_127 : f32 to vector<2x256xf32>
    %c0_i32_128 = arith.constant 0 : i32
    %567 = vector.broadcast %c0_i32_128 : i32 to vector<2x1xi32>
    %568 = arith.cmpi eq, %31, %567 : vector<2x1xi32>
    %c6 = arith.constant 6 : index
    %569 = memref.load %arg2[%c6] : memref<98xf32, #tpu.memory_space<smem>>
    %c55 = arith.constant 55 : index
    %570 = memref.load %arg2[%c55] : memref<98xf32, #tpu.memory_space<smem>>
    %571 = vector.broadcast %569 : f32 to vector<2x1xf32>
    %572 = vector.broadcast %570 : f32 to vector<2x1xf32>
    %573 = arith.select %568, %571, %572 : vector<2x1xi1>, vector<2x1xf32>
    %c0_129 = arith.constant 0 : index
    %c83 = arith.constant 83 : index
    %574 = vector.load %arg4[%c0_129, %c83] : memref<2x435xf32, #tpu.memory_space<vmem>>, vector<2x256xf32>
    %575 = vector.broadcast %573 : vector<2x1xf32> to vector<2x256xf32>
    %576 = arith.mulf %575, %574 : vector<2x256xf32>
    %577 = arith.addf %566, %576 : vector<2x256xf32>
    %c0_i32_130 = arith.constant 0 : i32
    %578 = vector.broadcast %c0_i32_130 : i32 to vector<2x1xi32>
    %579 = arith.cmpi eq, %31, %578 : vector<2x1xi32>
    %c13 = arith.constant 13 : index
    %580 = memref.load %arg2[%c13] : memref<98xf32, #tpu.memory_space<smem>>
    %c62 = arith.constant 62 : index
    %581 = memref.load %arg2[%c62] : memref<98xf32, #tpu.memory_space<smem>>
    %582 = vector.broadcast %580 : f32 to vector<2x1xf32>
    %583 = vector.broadcast %581 : f32 to vector<2x1xf32>
    %584 = arith.select %579, %582, %583 : vector<2x1xi1>, vector<2x1xf32>
    %c0_131 = arith.constant 0 : index
    %c99 = arith.constant 99 : index
    %585 = vector.load %arg4[%c0_131, %c99] : memref<2x435xf32, #tpu.memory_space<vmem>>, vector<2x256xf32>
    %586 = vector.broadcast %584 : vector<2x1xf32> to vector<2x256xf32>
    %587 = arith.mulf %586, %585 : vector<2x256xf32>
    %588 = arith.addf %577, %587 : vector<2x256xf32>
    %c0_i32_132 = arith.constant 0 : i32
    %589 = vector.broadcast %c0_i32_132 : i32 to vector<2x1xi32>
    %590 = arith.cmpi eq, %31, %589 : vector<2x1xi32>
    %c20 = arith.constant 20 : index
    %591 = memref.load %arg2[%c20] : memref<98xf32, #tpu.memory_space<smem>>
    %c69 = arith.constant 69 : index
    %592 = memref.load %arg2[%c69] : memref<98xf32, #tpu.memory_space<smem>>
    %593 = vector.broadcast %591 : f32 to vector<2x1xf32>
    %594 = vector.broadcast %592 : f32 to vector<2x1xf32>
    %595 = arith.select %590, %593, %594 : vector<2x1xi1>, vector<2x1xf32>
    %c0_133 = arith.constant 0 : index
    %c115 = arith.constant 115 : index
    %596 = vector.load %arg4[%c0_133, %c115] : memref<2x435xf32, #tpu.memory_space<vmem>>, vector<2x256xf32>
    %597 = vector.broadcast %595 : vector<2x1xf32> to vector<2x256xf32>
    %598 = arith.mulf %597, %596 : vector<2x256xf32>
    %599 = arith.addf %588, %598 : vector<2x256xf32>
    %c0_i32_134 = arith.constant 0 : i32
    %600 = vector.broadcast %c0_i32_134 : i32 to vector<2x1xi32>
    %601 = arith.cmpi eq, %31, %600 : vector<2x1xi32>
    %c27 = arith.constant 27 : index
    %602 = memref.load %arg2[%c27] : memref<98xf32, #tpu.memory_space<smem>>
    %c76 = arith.constant 76 : index
    %603 = memref.load %arg2[%c76] : memref<98xf32, #tpu.memory_space<smem>>
    %604 = vector.broadcast %602 : f32 to vector<2x1xf32>
    %605 = vector.broadcast %603 : f32 to vector<2x1xf32>
    %606 = arith.select %601, %604, %605 : vector<2x1xi1>, vector<2x1xf32>
    %c0_135 = arith.constant 0 : index
    %c131 = arith.constant 131 : index
    %607 = vector.load %arg4[%c0_135, %c131] : memref<2x435xf32, #tpu.memory_space<vmem>>, vector<2x256xf32>
    %608 = vector.broadcast %606 : vector<2x1xf32> to vector<2x256xf32>
    %609 = arith.mulf %608, %607 : vector<2x256xf32>
    %610 = arith.addf %599, %609 : vector<2x256xf32>
    %c0_i32_136 = arith.constant 0 : i32
    %611 = vector.broadcast %c0_i32_136 : i32 to vector<2x1xi32>
    %612 = arith.cmpi eq, %31, %611 : vector<2x1xi32>
    %c34 = arith.constant 34 : index
    %613 = memref.load %arg2[%c34] : memref<98xf32, #tpu.memory_space<smem>>
    %c83_137 = arith.constant 83 : index
    %614 = memref.load %arg2[%c83_137] : memref<98xf32, #tpu.memory_space<smem>>
    %615 = vector.broadcast %613 : f32 to vector<2x1xf32>
    %616 = vector.broadcast %614 : f32 to vector<2x1xf32>
    %617 = arith.select %612, %615, %616 : vector<2x1xi1>, vector<2x1xf32>
    %c0_138 = arith.constant 0 : index
    %c147 = arith.constant 147 : index
    %618 = vector.load %arg4[%c0_138, %c147] : memref<2x435xf32, #tpu.memory_space<vmem>>, vector<2x256xf32>
    %619 = vector.broadcast %617 : vector<2x1xf32> to vector<2x256xf32>
    %620 = arith.mulf %619, %618 : vector<2x256xf32>
    %621 = arith.addf %610, %620 : vector<2x256xf32>
    %c0_i32_139 = arith.constant 0 : i32
    %622 = vector.broadcast %c0_i32_139 : i32 to vector<2x1xi32>
    %623 = arith.cmpi eq, %31, %622 : vector<2x1xi32>
    %c41 = arith.constant 41 : index
    %624 = memref.load %arg2[%c41] : memref<98xf32, #tpu.memory_space<smem>>
    %c90 = arith.constant 90 : index
    %625 = memref.load %arg2[%c90] : memref<98xf32, #tpu.memory_space<smem>>
    %626 = vector.broadcast %624 : f32 to vector<2x1xf32>
    %627 = vector.broadcast %625 : f32 to vector<2x1xf32>
    %628 = arith.select %623, %626, %627 : vector<2x1xi1>, vector<2x1xf32>
    %c0_140 = arith.constant 0 : index
    %c163 = arith.constant 163 : index
    %629 = vector.load %arg4[%c0_140, %c163] : memref<2x435xf32, #tpu.memory_space<vmem>>, vector<2x256xf32>
    %630 = vector.broadcast %628 : vector<2x1xf32> to vector<2x256xf32>
    %631 = arith.mulf %630, %629 : vector<2x256xf32>
    %632 = arith.addf %621, %631 : vector<2x256xf32>
    %c0_i32_141 = arith.constant 0 : i32
    %633 = vector.broadcast %c0_i32_141 : i32 to vector<2x1xi32>
    %634 = arith.cmpi eq, %31, %633 : vector<2x1xi32>
    %c48 = arith.constant 48 : index
    %635 = memref.load %arg2[%c48] : memref<98xf32, #tpu.memory_space<smem>>
    %c97_142 = arith.constant 97 : index
    %636 = memref.load %arg2[%c97_142] : memref<98xf32, #tpu.memory_space<smem>>
    %637 = vector.broadcast %635 : f32 to vector<2x1xf32>
    %638 = vector.broadcast %636 : f32 to vector<2x1xf32>
    %639 = arith.select %634, %637, %638 : vector<2x1xi1>, vector<2x1xf32>
    %c0_143 = arith.constant 0 : index
    %c179 = arith.constant 179 : index
    %640 = vector.load %arg4[%c0_143, %c179] : memref<2x435xf32, #tpu.memory_space<vmem>>, vector<2x256xf32>
    %641 = vector.broadcast %639 : vector<2x1xf32> to vector<2x256xf32>
    %642 = arith.mulf %641, %640 : vector<2x256xf32>
    %643 = arith.addf %632, %642 : vector<2x256xf32>
    %cst_144 = arith.constant 0.000000e+00 : f32
    %644 = vector.shape_cast %565 : vector<1x256xi1> to vector<1x256xi1>
    %645 = vector.broadcast %644 : vector<1x256xi1> to vector<2x256xi1>
    %646 = vector.broadcast %cst_144 : f32 to vector<2x256xf32>
    %647 = arith.select %645, %643, %646 : vector<2x256xi1>, vector<2x256xf32>
    %648 = arith.addf %560, %647 : vector<2x256xf32>
    %649 = vector.extract_strided_slice %648 {offsets = [0, 0], sizes = [1, 256], strides = [1, 1]} : vector<2x256xf32> to vector<1x256xf32>
    %650 = vector.extract_strided_slice %648 {offsets = [1, 0], sizes = [1, 256], strides = [1, 1]} : vector<2x256xf32> to vector<1x256xf32>
    %651 = arith.addf %649, %650 : vector<1x256xf32>
    %652 = arith.negf %651 : vector<1x256xf32>
    %653 = math.exp %652 : vector<1x256xf32>
    %cst_145 = arith.constant 1.000000e+00 : f32
    %654 = vector.broadcast %cst_145 : f32 to vector<1x256xf32>
    %655 = arith.addf %654, %653 : vector<1x256xf32>
    %656 = arith.divf %654, %655 : vector<1x256xf32>
    %c0_146 = arith.constant 0 : index
    %c0_147 = arith.constant 0 : index
    %c0_148 = arith.constant 0 : index
    %657 = vector.load %arg1[%c0_146, %c0_147, %c0_148] : memref<1x4x256xf32, #tpu.memory_space<vmem>>, vector<1x4x256xf32>
    %658 = vector.shape_cast %657 : vector<1x4x256xf32> to vector<4x256xf32>
    %659 = vector.broadcast %656 : vector<1x256xf32> to vector<4x256xf32>
    %660 = arith.mulf %658, %659 : vector<4x256xf32>
    %c0_149 = arith.constant 0 : index
    %c0_150 = arith.constant 0 : index
    %c0_151 = arith.constant 0 : index
    %661 = vector.load %arg3[%c0_149, %c0_150, %c0_151] : memref<1x4x256xf32, #tpu.memory_space<vmem>>, vector<1x4x256xf32>
    %662 = vector.shape_cast %661 : vector<1x4x256xf32> to vector<4x256xf32>
    %663 = vector.shape_cast %660 : vector<4x256xf32> to vector<1x4x256xf32>
    tpu.vector_store %arg3[%c0_149, %c0_150, %c0_151], %663 {strides = array<i32>} : memref<1x4x256xf32, #tpu.memory_space<vmem>>, vector<1x4x256xf32>,
    return
  }
  func.func @transform_0(%arg0: i32) -> (i32, i32, i32) {
    %c0_i32 = arith.constant 0 : i32
    %c0_i32_0 = arith.constant 0 : i32
    %c0_i32_1 = arith.constant 0 : i32
    return %arg0, %c0_i32, %c0_i32_0 : i32, i32, i32
  }
  func.func @transform_1(%arg0: i32) -> i32 {
    %c0_i32 = arith.constant 0 : i32
    %c0_i32_0 = arith.constant 0 : i32
    return %c0_i32 : i32
  }
  func.func @transform_2(%arg0: i32) -> (i32, i32, i32) {
    %c0_i32 = arith.constant 0 : i32
    %c0_i32_0 = arith.constant 0 : i32
    %c0_i32_1 = arith.constant 0 : i32
    return %arg0, %c0_i32, %c0_i32_0 : i32, i32, i32
  }
}

</mosaic_0001>

<bundles_post_ra>
// kernel: tpu_custom_call.1
= control target key start
LH: loop header
LB: loop body
LE: loop exit
PB: predicated region body
PF: predicated region fallthrough
CT: control target
= control target key end

     0   :  { %7 = vsyncpa [#allocation4], 0  ;;  %s2592_s0 = inlined_call_operand.hbm [shape: f32[2,4,256], index: 0, kind: input, shape index: {}]   ;;  %s2593_s1 = inlined_call_operand.hbm [shape: f32[98], index: 1, kind: input, shape index: {}]   ;;  %s2594_s2 = inlined_call_operand.hbm [shape: f32[2,4,256], index: 2, kind: output, shape index: {}]  }
   0x1   :  { %9 = vsyncpa [#allocation4 + $0x1], 0 }
   0x2   :  { %10 = vsyncpa [#allocation6], 0 }
   0x3   :  { %11 = vsyncpa [#allocation5], 0 }
   0x4   :  { %13 = vsyncpa [#allocation5 + $0x1], 0  ;;  %s2201_s9 = smov 0   ;;  %s2203_s10 = smov 0  }
   0x5   :  { %s2205_s11 = smov 0   ;;  %s2207_s12 = smov 0  }
   0x6 LB: > { %s2222_s13 = sadd.s32 4294967295, %s2134_s12   ;;  %s1788_s14 = sadd.s32 4294967294, %s2134_s12   ;;  %s2134_s12 = sphi %s2207_s12, %s2604_s12   ;;  %s2130_s11 = sphi %s2205_s11, %s2603_s11   ;;  %s2126_s10 = sphi %s2203_s10, %s2602_s10   ;;  %s2122_s9 = sphi %s2201_s9, %s2601_s9  }
   0x7   : > { %p39_p0 = scmp.ne.s32.totalorder %s2126_s10, %s2122_s9  ;;  %p40_p1 = scmp.eq.s32.totalorder %s2222_s13, 0 }
   0x8   : > { %p84_p2 = scmp.eq.s32.totalorder %s2222_s13, 1  ;;  %p90_p3 = scmp.eq.s32.totalorder %s1788_s14, 1 }
   0x9   : > { %p2231_p4 = por %p40_p1, %p39_p0  ;;  %p1789_p5 = scmp.ge.s32.totalorder %s2134_s12, 1 }
   0xa   : > { %p2236_p6 = por %p90_p3, %p39_p0  ;;  %p97_p7 = scmp.lt.s32.totalorder %s2134_s12, 3 }
   0xb   : > { %s109_s19 = sshll.u32 %s2593_s1, 4  ;;  %s2252_s21 = sadd.s32 1, %s2134_s12   ;;  %s110_s19 = int_to_ptr.hbm [resolvable:$true] %s109_s19 }
   0xc   : > { %p2244_p8 = pnand %p1789_p5, %p97_p7  ;;  %s23_s22 = ssub.s32 %s2134_s12, %s2252_s21 }
   0xd   : > { %p24_p12 = scmp.eq.s32.totalorder %s23_s22, 0  ;;  %s26_s23 = sadd.s32 1, %s2130_s11 }
   0xe   : > { %p1913_p10 = pneg %p2244_p8  ;;  %p33_p13 = scmp.ne.s32.totalorder %s2130_s11, %s2126_s10 }
   0xf   : > { %s2136_s24 = smov [#allocation7]   ;;  %p34_p0 = scmp.eq.s32.totalorder %s2134_s12, 0 }
  0x10   : > { %p1914_p11 = pnand %p1913_p10, %p40_p1  ;;  %p2267_p3 = por %p84_p2, %p33_p13 }
  0x11   : > { %s2262_s25 = scalar_select %p24_p12, %s2130_s11, %s26_s23  }
  0x12   : > { %1916 = dma.hbm_to_smem (!%p1914_p11), %s110_s19, 16, %s2136_s24, [#allocation6]  }
  0x13   : > { %s120_s27 = sand.u32 1, %s2130_s11   ;;  %p35_p5 = por %p34_p0, %p33_p13 }
  0x14   : > { %p1926_p7 = scmp.lt.s32.totalorder %s2134_s12, 2  ;;  %s1792_s28 = sshll.u32 %s120_s27, 3 }
  0x15   : > { %s1903_s29 = sshll.u32 %s2134_s12, 3  ;;  %s124_s6 = scalar_lea.vmem [#allocation3], %s1792_s28 }
  0x16   : > { %s129_s4 = scalar_lea.hbm %s2592_s0, %s1903_s29  ;;  %s133_s7 = sshll.u32 %s124_s6, 4  ;;  %s134_s7 = int_to_ptr.vmem [resolvable:$true] %s133_s7 }
  0x17   : > { %s131_s5 = sshll.u32 %s129_s4, 4  ;;  %p2277_p10 = pnand %p1926_p7, %p35_p5  ;;  %s132_s5 = int_to_ptr.hbm [resolvable:$true] %s131_s5 }
  0x18   : > { %s121_s14 = scalar_lea.sflag [#allocation4], %s120_s27  ;;  %s2034_s17 = sshra.s32 %s132_s5, 4  ;;  %s2035_s17 = int_to_ptr.hbm [resolvable:$true] %s2034_s17 }
  0x19   : > { %s2036_s18 = scalar_lea.hbm %s2035_s17, 8  ;;  %p2038_p11 = pneg %p2277_p10 }
  0x1a   : > { %p2037_p2 = scmp.ne.s32.totalorder %s2035_s17, %s2036_s18  ;;  %s2041_s23 = scalar_lea.hbm %s2592_s0, 16 }
  0x1b   : > { %p2042_p0 = scmp.lt.s32.totalorder %s2035_s17, %s2592_s0  ;;  %p2043_p5 = scmp.lt.s32.totalorder %s2041_s23, %s2036_s18 }
  0x1c   : > { %p2039_p12 = pnand %p2038_p11, %p2037_p2 }
  0x1d   : > { %p2044_p7 = por %p2043_p5, %p2042_p0 }
  0x1e   : > { %p2040_p13 = pneg %p2039_p12 }
  0x20   : > { %p2045_p9 = pnand %p2044_p7, %p2040_p13 }
  0x22   : > { %2048 = shalt.err (!%p2045_p9)
}
  0x23   : > { %1920 = dma.hbm_to_vmem [thread:$0]  (!%p2277_p10), %s132_s5, 128, %s134_s7, %s121_s14  }
  0x24   : > { %142 = sbr.rel (%p2244_p8) target bundleno = 693 (0x2b5), region = 28  ;;  %s2294_s27 = sand.u32 (!%p2244_p8), 1, %s2126_s10  }
  0x25   : > { %s1796_s29 = sshll.u32 (!%p2244_p8), %s2294_s27, 3  ;;  %s145_s30 = scalar_lea.sflag (!%p2244_p8), [#allocation4], %s2294_s27 }
  0x26   : > { %s2300_s3 = scalar_lea.vmem (!%p2244_p8), [#allocation3], %s1796_s29 }
  0x29   : > { %2109 = dma.done.wait (%p2231_p4), %s145_s30, 128  }
  0x2a   : > { %2111 = vsyncadd (%p2231_p4), %s145_s30, 4294967168 }
  0x2b   : > { %2113 = dma.done.wait (%p40_p1), [#allocation6], 16  }
  0x2c   : > { %2115 = vsyncadd (%p40_p1), [#allocation6], 4294967280 }
  0x2d   : > { %159 = sfence }
  0x2e   : > { %v176_v0 = vld [vmem:[%s2300_s3] sm:$0xff]  ;;  %v2137_v1 = vmov 0.0   ;;  %vm183_vm0 = vcmask 1043456   ;;  %v228_v22 = vlaneseq  ;;  %vm225_vm1 = vcmask 1040384   ;;  %s2138_s15 = smov 51   ;;  %s2139_s20 = smov 35  }
  0x2f   : > { %178 = vst [vmem:[#allocation1] ss:$2 sm:$0xff] %v176_v0  ;;  %vm220_vm3 = vcmask 410624   ;;  %s2140_s4 = smov 19   ;;  %s2141_s5 = smov 3   ;;  %vm320_vm4 = vcmask 285696  }
  0x30   : > { %219 = vst [vmem:[#allocation2] sm:$0x3] %v2137_v1  ;;  %vm230_vm2 = vcmp.lt.s32.totalorder %v228_v22, 256  ;;  %s2142_s6 = smov 115   ;;  %s2143_s7 = smov 99   ;;  %vm294_vm6 = vcmask 416768  }
  0x31   : > { %221 = vst.msk [vmem:[#allocation2 + $0x6] sm:$0x3] %vm220_vm3, %v2137_v1  ;;  %s2144_s8 = smov 83   ;;  %s2145_s14 = smov 50   ;;  %vm346_vm7 = vcmask 154624   ;;  %vm372_vm8 = vcmask 23552  }
  0x32   : > { %s2146_s17 = smov 34   ;;  %s2147_s18 = smov 18   ;;  %vm398_vm9 = vcmask 941056   ;;  %vm424_vm10 = vcmask 809984   ;;  %vm450_vm11 = vcmask 678912   ;;  %vm490_vm12 = vcmask 408576  }
  0x33   : > { %s2148_s19 = smov 2   ;;  %s2149_s22 = smov 114   ;;  %vm516_vm13 = vcmask 277504   ;;  %vm542_vm14 = vcmask 146432   ;;  %vm568_vm15 = vcmask 15360   ;;  %vm646_vm3 = vcmask 670720  }
  0x34   : > { %s2316_s23 = sld [smem:[#allocation7 + $0x7]]  ;;  %s2150_s24 = smov 98  }
  0x35   : > { %s1801_s28 = sld [smem:[#allocation7 + $0x38]] }
  0x36   : > { %v179_v2 = vld.sshfl [vmem:[#allocation1] sm:$0xff pattern:$0x75316420]  ;;  %v180_v3 = vld.sshfl [vmem:[#allocation1 + $0x8] sm:$0xff pattern:$0x75316420] }
  0x37   : > { %v184_v4 = vsel %vm183_vm0, %v179_v2, 0.0  ;;  %v191_v5 = vsel %vm183_vm0, %v180_v3, 0.0  ;;  %200 = vst [vmem:[#allocation1] ss:$2 sm:$0xff] %v176_v0  ;;  %s277_s30 = sld [smem:[#allocation7]] }
  0x38   : > { %v185_v6 = vrot.slane %v184_v4, 4  ;;  %v192_v7 = vrot.slane %v191_v5, 4 }
  0x3a   : > { %v186_v8 = vadd.f32 %v185_v6, %v184_v4  ;;  %v193_v9 = vadd.f32 %v192_v7, %v191_v5 }
  0x3c   : > { %v187_v10 = vrot.slane %v186_v8, 2  ;;  %v194_v11 = vrot.slane %v193_v9, 2 }
  0x3e   : > { %v188_v12 = vadd.f32 %v187_v10, %v186_v8  ;;  %v195_v13 = vadd.f32 %v194_v11, %v193_v9  ;;  %v201_v14 = vld.sshfl [vmem:[#allocation1] sm:$0xff pattern:$0x75316420]  ;;  %v202_v15 = vld.sshfl [vmem:[#allocation1 + $0x8] sm:$0xff pattern:$0x75316420] }
  0x3f   : > { %v205_v16 = vsel %vm183_vm0, %v201_v14, -inf  ;;  %v212_v17 = vsel %vm183_vm0, %v202_v15, -inf }
  0x40   : > { %v189_v18 = vrot.slane %v188_v12, 1  ;;  %v196_v19 = vrot.slane %v195_v13, 1  ;;  %v206_v20 = vrot.slane %v205_v16, 4  ;;  %v213_v21 = vrot.slane %v212_v17, 4 }
  0x42   : > { %v190_v23 = vadd.f32 %v189_v18, %v188_v12  ;;  %v197_v24 = vadd.f32 %v196_v19, %v195_v13  ;;  %v207_v25 = vmax.f32 %v205_v16, %v206_v20  ;;  %v214_v26 = vmax.f32 %v212_v17, %v213_v21 }
  0x44   : > { %v198_v27 = vmul.f32 0.25, %v190_v23  ;;  %v199_v28 = vmul.f32 0.25, %v197_v24  ;;  %v208_v29 = vrot.slane %v207_v25, 2  ;;  %v215_v30 = vrot.slane %v214_v26, 2 }
  0x46   : > { %v209_v31 = vmax.f32 %v207_v25, %v208_v29  ;;  %v216_v32 = vmax.f32 %v214_v26, %v215_v30  ;;  %v224_v33 = vrot.slane %v199_v28, 7 }
  0x48   : > { %v210_v34 = vrot.slane %v209_v31, 1  ;;  %v217_v35 = vrot.slane %v216_v32, 1  ;;  %v226_v36 = vsel %vm225_vm1, %v198_v27, %v224_v33 }
  0x49   : > { %233 = vst.msk [vmem:[#allocation2 + $0x2] ss:$2 sm:$0x3] %vm230_vm2, %v226_v36 }
  0x4a   : > { %v211_v37 = vmax.f32 %v209_v31, %v210_v34  ;;  %v218_v38 = vmax.f32 %v216_v32, %v217_v35  ;;  %v2320_v34 = vshrl.u32 %v228_v22, 7 }
  0x4c   : > { %v236_v39 = vrot.slane %v218_v38, 7  ;;  %vm276_vm5 = vcmp.eq.s32.totalorder %v2320_v34, 0 }
  0x4e   : > { %v237_v40 = vsel %vm225_vm1, %v211_v37, %v236_v39  ;;  %vm594_vm1 = vcmask 932864  }
  0x4f   : > { %240 = vst.msk [vmem:[#allocation2 + $0x3] ss:$2 sm:$0x3] %vm230_vm2, %v237_v40  ;;  %vm620_vm2 = vcmask 801792  }
  0x56   : > { %v282_v41 = vld [vmem:[#allocation2] sm:$0x3f] }
  0x57   : > { %284 = vst [vmem:[#allocation1] ss:$4 sm:$0xff] %v282_v41  ;;  %v308_v42 = vld [vmem:[#allocation2] sm:$0x3f]  ;;  %v305_v41 = vstv %s2316_s23  ;;  %s1809_s23 = sld [smem:[#allocation7 + $0x54]] }
  0x58   : > { %v334_v46 = vld [vmem:[#allocation2] sm:$0x3f] }
  0x59   : > { %v360_v50 = vld [vmem:[#allocation2] sm:$0x3f] }
  0x5a   : > { %v386_v54 = vld [vmem:[#allocation2 + $0x2] sm:$0x3f] }
  0x5b   : > { %v412_v58 = vld [vmem:[#allocation2 + $0x2] sm:$0x3f] }
  0x5c   : > { %v438_v62 = vld [vmem:[#allocation2 + $0x2] sm:$0x3f] }
  0x5d   : > { %v478_v2 = vld [vmem:[#allocation2] sm:$0x3f] }
  0x5e   : > { %v287_v43 = vld.sshfl [vmem:[#allocation1 + $0x10] sm:$0xff pattern:$0x73625140]  ;;  %v285_v44 = vld.sshfl [vmem:[#allocation1] sm:$0xff pattern:$0x73625140] }
  0x5f   : > { %292 = vrot.lane.b32.xlu1 %v287_v43, %s2138_s15  ;;  %288 = vrot.lane.b32.xlu0 %v285_v44, %s2138_s15  ;;  %v286_v45 = vld.sshfl [vmem:[#allocation1 + $0x8] sm:$0xff pattern:$0x73625140]  ;;  %v279_v44 = vstv %s277_s30  ;;  %s1811_s30 = sld [smem:[#allocation7 + $0x5b]] }
  0x60   : > { %310 = vst [vmem:[#allocation1] ss:$4 sm:$0xff] %v308_v42  ;;  %v504_v6 = vld [vmem:[#allocation2] sm:$0x3f]  ;;  %v306_v42 = vstv %s1801_s28  ;;  %s1810_s28 = sld [smem:[#allocation7 + $0x2a]] }
  0x61   : > { %v530_v10 = vld [vmem:[#allocation2] sm:$0x3f] }
  0x62   : > { %v556_v14 = vld [vmem:[#allocation2] sm:$0x3f] }
  0x63   : > { %v582_v18 = vld [vmem:[#allocation2 + $0x2] sm:$0x3f] }
  0x64   : > { %v608_v23 = vld [vmem:[#allocation2 + $0x2] sm:$0x3f] }
  0x65   : > { %v634_v28 = vld [vmem:[#allocation2 + $0x2] sm:$0x3f] }
  0x66   : > { %v674_v37 = vld [vmem:[#allocation2] sm:$0x3f] }
  0x67   : > { %290 = vrot.lane.b32.xlu0 %v286_v45, %s2138_s15  ;;  %v311_v47 = vld.sshfl [vmem:[#allocation1] sm:$0xff pattern:$0x73625140]  ;;  %v312_v48 = vld.sshfl [vmem:[#allocation1 + $0x8] sm:$0xff pattern:$0x73625140] }
  0x68   : > { %v313_v49 = vld.sshfl [vmem:[#allocation1 + $0x10] sm:$0xff pattern:$0x73625140]  ;;  %314 = vrot.lane.b32.xlu1 %v311_v47, %s2139_s20  ;;  %316 = vrot.lane.b32.xlu2 %v312_v48, %s2139_s20  ;;  %s1799_s15 = sld [smem:[#allocation7 + $0x31]] }
  0x69   : > { %336 = vst [vmem:[#allocation1] ss:$4 sm:$0xff] %v334_v46  ;;  %v307_v46 = vsel %vm276_vm5, %v305_v41, %v306_v42 }
  0x6e   : > { %v280_v45 = vstv %s1799_s15  ;;  %s2156_s15 = smov 113  }
  0x6f   : > { %v281_v47 = vsel %vm276_vm5, %v279_v44, %v280_v45 }
  0x70   : > { %v338_v51 = vld.sshfl [vmem:[#allocation1 + $0x8] sm:$0xff pattern:$0x73625140]  ;;  %v339_v52 = vld.sshfl [vmem:[#allocation1 + $0x10] sm:$0xff pattern:$0x73625140]  ;;  %318 = vrot.lane.b32.xlu2 %v313_v49, %s2139_s20 }
  0x71   : > { %342 = vrot.lane.b32.xlu1 %v338_v51, %s2140_s4  ;;  %v337_v53 = vld.sshfl [vmem:[#allocation1] sm:$0xff pattern:$0x73625140]  ;;  %s2151_s20 = smov 82  }
  0x72   : > { %340 = vrot.lane.b32.xlu0 %v337_v53, %s2140_s4  ;;  %362 = vst [vmem:[#allocation1] ss:$4 sm:$0xff] %v360_v50 }
  0x78   : > { %344 = vrot.lane.b32.xlu2 %v339_v52, %s2140_s4  ;;  %s1802_s4 = sld [smem:[#allocation7 + $0xe]] }
  0x79   : > { %v364_v55 = vld.sshfl [vmem:[#allocation1 + $0x8] sm:$0xff pattern:$0x73625140]  ;;  %v365_v56 = vld.sshfl [vmem:[#allocation1 + $0x10] sm:$0xff pattern:$0x73625140] }
  0x7a   : > { %368 = vrot.lane.b32.xlu1 %v364_v55, %s2141_s5  ;;  %v363_v57 = vld.sshfl [vmem:[#allocation1] sm:$0xff pattern:$0x73625140] }
  0x7b   : > { %366 = vrot.lane.b32.xlu0 %v363_v57, %s2141_s5  ;;  %388 = vst [vmem:[#allocation1] ss:$4 sm:$0xff] %v386_v54  ;;  %v700_v54 = vld [vmem:[#allocation2] sm:$0x3f] }
  0x80   : > { %370 = vrot.lane.b32.xlu2 %v365_v56, %s2141_s5  ;;  %s1803_s5 = sld [smem:[#allocation7 + $0x3f]] }
  0x82   : > { %v390_v59 = vld.sshfl [vmem:[#allocation1 + $0x8] sm:$0xff pattern:$0x73625140]  ;;  %v391_v60 = vld.sshfl [vmem:[#allocation1 + $0x10] sm:$0xff pattern:$0x73625140] }
  0x83   : > { %394 = vrot.lane.b32.xlu1 %v390_v59, %s2142_s6  ;;  %v389_v61 = vld.sshfl [vmem:[#allocation1] sm:$0xff pattern:$0x73625140] }
  0x84   : > { %392 = vrot.lane.b32.xlu0 %v389_v61, %s2142_s6  ;;  %414 = vst [vmem:[#allocation1] ss:$4 sm:$0xff] %v412_v58 }
  0x88   : > { %396 = vrot.lane.b32.xlu2 %v391_v60, %s2142_s6  ;;  %s2152_s6 = smov 49  }
  0x8b   : > { %v416_v63 = vld.sshfl [vmem:[#allocation1 + $0x8] sm:$0xff pattern:$0x73625140]  ;;  %v417_v0 = vld.sshfl [vmem:[#allocation1 + $0x10] sm:$0xff pattern:$0x73625140] }
  0x8c   : > { %420 = vrot.lane.b32.xlu1 %v416_v63, %s2143_s7  ;;  %v415_v1 = vld.sshfl [vmem:[#allocation1] sm:$0xff pattern:$0x73625140] }
  0x8d   : > { %418 = vrot.lane.b32.xlu0 %v415_v1, %s2143_s7  ;;  %440 = vst [vmem:[#allocation1] ss:$4 sm:$0xff] %v438_v62  ;;  %v332_v1 = vstv %s1803_s5  ;;  %s1813_s5 = sld [smem:[#allocation7 + $0x32]] }
  0x90   : > { %422 = vrot.lane.b32.xlu2 %v417_v0, %s2143_s7  ;;  %v331_v0 = vstv %s1802_s4  ;;  %s1804_s7 = sld [smem:[#allocation7 + $0x15]] }
  0x91   : > { %s1812_s4 = sld [smem:[#allocation7 + $0x1]] }
  0x94   : > { %v442_v3 = vld.sshfl [vmem:[#allocation1 + $0x8] sm:$0xff pattern:$0x73625140]  ;;  %v443_v4 = vld.sshfl [vmem:[#allocation1 + $0x10] sm:$0xff pattern:$0x73625140] }
  0x95   : > { %446 = vrot.lane.b32.xlu1 %v442_v3, %s2144_s8  ;;  %v441_v5 = vld.sshfl [vmem:[#allocation1] sm:$0xff pattern:$0x73625140] }
  0x96   : > { %444 = vrot.lane.b32.xlu0 %v441_v5, %s2144_s8  ;;  %480 = vst [vmem:[#allocation1] ss:$4 sm:$0xff] %v478_v2  ;;  %v333_v2 = vsel %vm276_vm5, %v331_v0, %v332_v1  ;;  %v726_v5 = vld [vmem:[#allocation2] sm:$0x3f] }
  0x98   : > { %448 = vrot.lane.b32.xlu2 %v443_v4, %s2144_s8  ;;  %s1805_s8 = sld [smem:[#allocation7 + $0x46]] }
  0x9d   : > { %v482_v7 = vld.sshfl [vmem:[#allocation1 + $0x8] sm:$0xff pattern:$0x73625140]  ;;  %v483_v8 = vld.sshfl [vmem:[#allocation1 + $0x10] sm:$0xff pattern:$0x73625140] }
  0x9e   : > { %486 = vrot.lane.b32.xlu1 %v482_v7, %s2145_s14  ;;  %v481_v9 = vld.sshfl [vmem:[#allocation1] sm:$0xff pattern:$0x73625140] }
  0x9f   : > { %484 = vrot.lane.b32.xlu0 %v481_v9, %s2145_s14  ;;  %506 = vst [vmem:[#allocation1] ss:$4 sm:$0xff] %v504_v6 }
  0xa0   : > { %488 = vrot.lane.b32.xlu2 %v483_v8, %s2145_s14  ;;  %s2153_s14 = smov 33  }
  0xa6   : > { %v508_v11 = vld.sshfl [vmem:[#allocation1 + $0x8] sm:$0xff pattern:$0x73625140]  ;;  %v509_v12 = vld.sshfl [vmem:[#allocation1 + $0x10] sm:$0xff pattern:$0x73625140] }
  0xa7   : > { %512 = vrot.lane.b32.xlu1 %v508_v11, %s2146_s17  ;;  %v507_v13 = vld.sshfl [vmem:[#allocation1] sm:$0xff pattern:$0x73625140] }
  0xa8   : > { %510 = vrot.lane.b32.xlu0 %v507_v13, %s2146_s17  ;;  %532 = vst [vmem:[#allocation1] ss:$4 sm:$0xff] %v530_v10  ;;  %514 = vrot.lane.b32.xlu2 %v509_v12, %s2146_s17  ;;  %s1806_s17 = sld [smem:[#allocation7 + $0x1c]] }
  0xaf   : > { %v534_v15 = vld.sshfl [vmem:[#allocation1 + $0x8] sm:$0xff pattern:$0x73625140]  ;;  %v535_v16 = vld.sshfl [vmem:[#allocation1 + $0x10] sm:$0xff pattern:$0x73625140] }
  0xb0   : > { %538 = vrot.lane.b32.xlu1 %v534_v15, %s2147_s18  ;;  %v533_v17 = vld.sshfl [vmem:[#allocation1] sm:$0xff pattern:$0x73625140]  ;;  %540 = vrot.lane.b32.xlu2 %v535_v16, %s2147_s18  ;;  %v357_v16 = vstv %s1804_s7  ;;  %s1815_s7 = sld [smem:[#allocation7 + $0x39]] }
  0xb1   : > { %536 = vrot.lane.b32.xlu0 %v533_v17, %s2147_s18  ;;  %558 = vst [vmem:[#allocation1] ss:$4 sm:$0xff] %v556_v14  ;;  %v358_v17 = vstv %s1805_s8  ;;  %s1807_s18 = sld [smem:[#allocation7 + $0x4d]]  ;;  %s2158_s8 = smov 81  }
  0xb8   : > { %v560_v19 = vld.sshfl [vmem:[#allocation1 + $0x8] sm:$0xff pattern:$0x73625140]  ;;  %v561_v20 = vld.sshfl [vmem:[#allocation1 + $0x10] sm:$0xff pattern:$0x73625140] }
  0xb9   : > { %564 = vrot.lane.b32.xlu1 %v560_v19, %s2148_s19  ;;  %v559_v21 = vld.sshfl [vmem:[#allocation1] sm:$0xff pattern:$0x73625140]  ;;  %566 = vrot.lane.b32.xlu2 %v561_v20, %s2148_s19 }
  0xba   : > { %562 = vrot.lane.b32.xlu0 %v559_v21, %s2148_s19  ;;  %584 = vst [vmem:[#allocation1] ss:$4 sm:$0xff] %v582_v18  ;;  %v359_v18 = vsel %vm276_vm5, %v357_v16, %v358_v17  ;;  %v752_v21 = vld [vmem:[#allocation2] sm:$0x3f]  ;;  %s2154_s19 = smov 17  }
  0xc1   : > { %v586_v24 = vld.sshfl [vmem:[#allocation1 + $0x8] sm:$0xff pattern:$0x73625140]  ;;  %v587_v25 = vld.sshfl [vmem:[#allocation1 + $0x10] sm:$0xff pattern:$0x73625140] }
  0xc2   : > { %590 = vrot.lane.b32.xlu1 %v586_v24, %s2149_s22  ;;  %v585_v26 = vld.sshfl [vmem:[#allocation1] sm:$0xff pattern:$0x73625140]  ;;  %592 = vrot.lane.b32.xlu2 %v587_v25, %s2149_s22  ;;  %v317_v27 = vpop.permute.xlu2 %316 }
  0xc3   : > { %588 = vrot.lane.b32.xlu0 %v585_v26, %s2149_s22  ;;  %610 = vst [vmem:[#allocation1] ss:$4 sm:$0xff] %v608_v23  ;;  %s1808_s22 = sld [smem:[#allocation7 + $0x23]] }
  0xca   : > { %v612_v29 = vld.sshfl [vmem:[#allocation1 + $0x8] sm:$0xff pattern:$0x73625140]  ;;  %v613_v30 = vld.sshfl [vmem:[#allocation1 + $0x10] sm:$0xff pattern:$0x73625140]  ;;  %v319_v31 = vpop.permute.xlu2 %318 }
  0xcb   : > { %616 = vrot.lane.b32.xlu1 %v612_v29, %s2150_s24  ;;  %v611_v32 = vld.sshfl [vmem:[#allocation1] sm:$0xff pattern:$0x73625140]  ;;  %618 = vrot.lane.b32.xlu2 %v613_v30, %s2150_s24  ;;  %v322_v33 = vsel %vm320_vm4, %v317_v27, %v319_v31 }
  0xcc   : > { %614 = vrot.lane.b32.xlu0 %v611_v32, %s2150_s24  ;;  %636 = vst [vmem:[#allocation1] ss:$4 sm:$0xff] %v634_v28  ;;  %v326_v49 = vmul.f32 %v322_v33, %v307_v46  ;;  %v383_v33 = vstv %s1806_s17  ;;  %s2155_s24 = smov 1   ;;  %s1817_s17 = sld [smem:[#allocation7 + $0x40]] }
  0xd1   : > { %v293_v35 = vpop.permute.xlu1 %292  ;;  %v289_v36 = vpop.permute.xlu0 %288 }
  0xd2   : > { %v345_v38 = vpop.permute.xlu2 %344 }
  0xd3   : > { %v638_v39 = vld.sshfl [vmem:[#allocation1 + $0x8] sm:$0xff pattern:$0x73625140]  ;;  %v639_v40 = vld.sshfl [vmem:[#allocation1 + $0x10] sm:$0xff pattern:$0x73625140] }
  0xd4   : > { %642 = vrot.lane.b32.xlu1 %v638_v39, %s2151_s20  ;;  %v637_v43 = vld.sshfl [vmem:[#allocation1] sm:$0xff pattern:$0x73625140]  ;;  %644 = vrot.lane.b32.xlu2 %v639_v40, %s2151_s20  ;;  %v778_v39 = vld [vmem:[#allocation2 + $0x2] sm:$0x3f] }
  0xd5   : > { %640 = vrot.lane.b32.xlu0 %v637_v43, %s2151_s20  ;;  %676 = vst [vmem:[#allocation1] ss:$4 sm:$0xff] %v674_v37  ;;  %s2157_s20 = smov 97  }
  0xd9   : > { %v291_v48 = vpop.permute.xlu0 %290 }
  0xda   : > { %v295_v50 = vsel %vm294_vm6, %v289_v36, %v291_v48  ;;  %v296_v51 = vsel %vm294_vm6, %v291_v48, %v293_v35  ;;  %v315_v52 = vpop.permute.xlu1 %314  ;;  %v371_v53 = vpop.permute.xlu2 %370  ;;  %v384_v35 = vstv %s1807_s18  ;;  %s2159_s18 = smov 48  }
  0xdb   : > { %v299_v55 = vmul.f32 %v295_v50, %v281_v47  ;;  %v300_v56 = vmul.f32 %v296_v51, %v281_v47  ;;  %v321_v57 = vsel %vm320_vm4, %v315_v52, %v317_v27  ;;  %v385_v36 = vsel %vm276_vm5, %v383_v33, %v384_v35 }
  0xdc   : > { %v678_v58 = vld.sshfl [vmem:[#allocation1 + $0x8] sm:$0xff pattern:$0x73625140]  ;;  %v679_v59 = vld.sshfl [vmem:[#allocation1 + $0x10] sm:$0xff pattern:$0x73625140]  ;;  %v325_v60 = vmul.f32 %v321_v57, %v307_v46  ;;  %v409_v50 = vstv %s1808_s22  ;;  %v410_v51 = vstv %s1809_s23 }
  0xdd   : > { %682 = vrot.lane.b32.xlu1 %v678_v58, %s2152_s6  ;;  %v677_v61 = vld.sshfl [vmem:[#allocation1] sm:$0xff pattern:$0x73625140]  ;;  %v328_v62 = vadd.f32 %v326_v49, %v300_v56  ;;  %684 = vrot.lane.b32.xlu2 %v679_v59, %s2152_s6  ;;  %s1819_s22 = sld [smem:[#allocation7 + $0x47]]  ;;  %s2160_s23 = smov 32  }
  0xde   : > { %680 = vrot.lane.b32.xlu0 %v677_v61, %s2152_s6  ;;  %702 = vst [vmem:[#allocation1] ss:$4 sm:$0xff] %v700_v54  ;;  %v327_v63 = vadd.f32 %v325_v60, %v299_v55  ;;  %v804_v55 = vld [vmem:[#allocation2 + $0x2] sm:$0x3f]  ;;  %s1814_s6 = sld [smem:[#allocation7 + $0x8]] }
  0xe2   : > { %v397_v3 = vpop.permute.xlu2 %396 }
  0xe3   : > { %v343_v4 = vpop.permute.xlu1 %342 }
  0xe4   : > { %v348_v6 = vsel %vm346_vm7, %v343_v4, %v345_v38  ;;  %v341_v7 = vpop.permute.xlu0 %340 }
  0xe5   : > { %v704_v8 = vld.sshfl [vmem:[#allocation1 + $0x8] sm:$0xff pattern:$0x73625140]  ;;  %v705_v9 = vld.sshfl [vmem:[#allocation1 + $0x10] sm:$0xff pattern:$0x73625140]  ;;  %v352_v10 = vmul.f32 %v348_v6, %v333_v2  ;;  %v347_v11 = vsel %vm346_vm7, %v341_v7, %v343_v4 }
  0xe6   : > { %708 = vrot.lane.b32.xlu1 %v704_v8, %s2153_s14  ;;  %v703_v12 = vld.sshfl [vmem:[#allocation1] sm:$0xff pattern:$0x73625140]  ;;  %v351_v13 = vmul.f32 %v347_v11, %v333_v2  ;;  %710 = vrot.lane.b32.xlu2 %v705_v9, %s2153_s14  ;;  %v435_v2 = vstv %s1810_s28  ;;  %v830_v7 = vld [vmem:[#allocation2 + $0x2] sm:$0x3f]  ;;  %s1821_s28 = sld [smem:[#allocation7 + $0x4e]] }
  0xe7   : > { %706 = vrot.lane.b32.xlu0 %v703_v12, %s2153_s14  ;;  %728 = vst [vmem:[#allocation1] ss:$4 sm:$0xff] %v726_v5  ;;  %v354_v14 = vadd.f32 %v352_v10, %v328_v62  ;;  %s2343_s14 = sld [smem:[#allocation7 + $0xf]] }
  0xe8   : > { %v353_v15 = vadd.f32 %v351_v13, %v327_v63 }
  0xea   : > { %v423_v19 = vpop.permute.xlu2 %422 }
  0xec   : > { %v369_v20 = vpop.permute.xlu1 %368 }
  0xed   : > { %v374_v23 = vsel %vm372_vm8, %v369_v20, %v371_v53  ;;  %v367_v24 = vpop.permute.xlu0 %366  ;;  %v411_v53 = vsel %vm276_vm5, %v409_v50, %v410_v51  ;;  %v527_v50 = vstv %s2343_s14  ;;  %v528_v51 = vstv %s1817_s17  ;;  %s1827_s14 = sld [smem:[#allocation7 + $0x33]] }
  0xee   : > { %v730_v25 = vld.sshfl [vmem:[#allocation1 + $0x8] sm:$0xff pattern:$0x73625140]  ;;  %v731_v26 = vld.sshfl [vmem:[#allocation1 + $0x10] sm:$0xff pattern:$0x73625140]  ;;  %v378_v27 = vmul.f32 %v374_v23, %v359_v18  ;;  %v373_v28 = vsel %vm372_vm8, %v367_v24, %v369_v20 }
  0xef   : > { %734 = vrot.lane.b32.xlu1 %v730_v25, %s2154_s19  ;;  %v729_v29 = vld.sshfl [vmem:[#allocation1] sm:$0xff pattern:$0x73625140]  ;;  %v377_v30 = vmul.f32 %v373_v28, %v359_v18  ;;  %736 = vrot.lane.b32.xlu2 %v731_v26, %s2154_s19  ;;  %v870_v20 = vld [vmem:[#allocation2] sm:$0x3f]  ;;  %v475_v28 = vstv %s1812_s4  ;;  %s1824_s4 = sld [smem:[#allocation7 + $0x2b]] }
  0xf0   : > { %732 = vrot.lane.b32.xlu0 %v729_v29, %s2154_s19  ;;  %754 = vst [vmem:[#allocation1] ss:$4 sm:$0xff] %v752_v21  ;;  %v380_v31 = vadd.f32 %v378_v27, %v354_v14  ;;  %v476_v29 = vstv %s1813_s5  ;;  %s1818_s19 = sld [smem:[#allocation7 + $0x16]] }
  0xf1   : > { %v379_v32 = vadd.f32 %v377_v30, %v353_v15  ;;  %v501_v30 = vstv %s1814_s6  ;;  %s1825_s5 = sld [smem:[#allocation7 + $0x5c]]  ;;  %s2162_s6 = smov 112  }
  0xf2   : > { %v449_v37 = vpop.permute.xlu2 %448  ;;  %s2375_s17 = sld [smem:[#allocation7 + $0x9]] }
  0xf5   : > { %v395_v38 = vpop.permute.xlu1 %394 }
  0xf6   : > { %v400_v40 = vsel %vm398_vm9, %v395_v38, %v397_v3  ;;  %v393_v41 = vpop.permute.xlu0 %392  ;;  %v436_v3 = vstv %s1811_s30  ;;  %s2161_s30 = smov 16  }
  0xf7   : > { %v756_v42 = vld.sshfl [vmem:[#allocation1 + $0x8] sm:$0xff pattern:$0x73625140]  ;;  %v757_v43 = vld.sshfl [vmem:[#allocation1 + $0x10] sm:$0xff pattern:$0x73625140]  ;;  %v404_v44 = vmul.f32 %v400_v40, %v385_v36  ;;  %v399_v45 = vsel %vm398_vm9, %v393_v41, %v395_v38  ;;  %v437_v5 = vsel %vm276_vm5, %v435_v2, %v436_v3  ;;  %v553_v2 = vstv %s1818_s19 }
  0xf8   : > { %760 = vrot.lane.b32.xlu1 %v756_v42, %s2155_s24  ;;  %v755_v46 = vld.sshfl [vmem:[#allocation1] sm:$0xff pattern:$0x73625140]  ;;  %v403_v47 = vmul.f32 %v399_v45, %v385_v36  ;;  %762 = vrot.lane.b32.xlu2 %v757_v43, %s2155_s24  ;;  %v896_v38 = vld [vmem:[#allocation2] sm:$0x3f]  ;;  %v554_v3 = vstv %s1819_s22  ;;  %vm686_vm9 = vcmask 400384  }
  0xf9   : > { %758 = vrot.lane.b32.xlu0 %v755_v46, %s2155_s24  ;;  %780 = vst [vmem:[#allocation1] ss:$4 sm:$0xff] %v778_v39  ;;  %v406_v48 = vadd.f32 %v404_v44, %v380_v31  ;;  %v502_v31 = vstv %s1815_s7  ;;  %s1820_s24 = sld [smem:[#allocation7 + $0x1d]]  ;;  %s2163_s7 = smov 96  }
  0xfa   : > { %v405_v49 = vadd.f32 %v403_v47, %v379_v32  ;;  %v489_v52 = vpop.permute.xlu2 %488  ;;  %v477_v32 = vsel %vm276_vm5, %v475_v28, %v476_v29  ;;  %v503_v35 = vsel %vm276_vm5, %v501_v30, %v502_v31  ;;  %s2164_s19 = smov 80   ;;  %s1830_s22 = sld [smem:[#allocation7 + $0x10]] }
  0xfe   : > { %v421_v54 = vpop.permute.xlu1 %420 }
  0xff   : > { %v426_v56 = vsel %vm424_vm10, %v421_v54, %v423_v19  ;;  %v419_v57 = vpop.permute.xlu0 %418 }
 0x100   : > { %v782_v58 = vld.sshfl [vmem:[#allocation1 + $0x8] sm:$0xff pattern:$0x73625140]  ;;  %v783_v59 = vld.sshfl [vmem:[#allocation1 + $0x10] sm:$0xff pattern:$0x73625140]  ;;  %v430_v60 = vmul.f32 %v426_v56, %v411_v53  ;;  %v425_v61 = vsel %vm424_vm10, %v419_v57, %v421_v54 }
 0x101   : > { %786 = vrot.lane.b32.xlu1 %v782_v58, %s2156_s15  ;;  %v781_v62 = vld.sshfl [vmem:[#allocation1] sm:$0xff pattern:$0x73625140]  ;;  %v429_v63 = vmul.f32 %v425_v61, %v411_v53  ;;  %788 = vrot.lane.b32.xlu2 %v783_v59, %s2156_s15  ;;  %v529_v53 = vsel %vm276_vm5, %v527_v50, %v528_v51  ;;  %vm712_vm10 = vcmask 269312  }
 0x102   : > { %784 = vrot.lane.b32.xlu0 %v781_v62, %s2156_s15  ;;  %806 = vst [vmem:[#allocation1] ss:$4 sm:$0xff] %v804_v55  ;;  %v432_v0 = vadd.f32 %v430_v60, %v406_v48  ;;  %v515_v4 = vpop.permute.xlu2 %514  ;;  %v922_v55 = vld [vmem:[#allocation2] sm:$0x3f]  ;;  %s1822_s15 = sld [smem:[#allocation7 + $0x24]] }
 0x103   : > { %v431_v1 = vadd.f32 %v429_v63, %v405_v49 }
 0x107   : > { %v447_v6 = vpop.permute.xlu1 %446 }
 0x108   : > { %v452_v8 = vsel %vm450_vm11, %v447_v6, %v449_v37  ;;  %v445_v9 = vpop.permute.xlu0 %444 }
 0x109   : > { %v808_v10 = vld.sshfl [vmem:[#allocation1 + $0x8] sm:$0xff pattern:$0x73625140]  ;;  %v809_v11 = vld.sshfl [vmem:[#allocation1 + $0x10] sm:$0xff pattern:$0x73625140]  ;;  %v456_v12 = vmul.f32 %v452_v8, %v437_v5  ;;  %v451_v13 = vsel %vm450_vm11, %v445_v9, %v447_v6 }
 0x10a   : > { %812 = vrot.lane.b32.xlu1 %v808_v10, %s2157_s20  ;;  %v807_v14 = vld.sshfl [vmem:[#allocation1] sm:$0xff pattern:$0x73625140]  ;;  %v455_v15 = vmul.f32 %v451_v13, %v437_v5  ;;  %814 = vrot.lane.b32.xlu2 %v809_v11, %s2157_s20  ;;  %v541_v18 = vpop.permute.xlu2 %540  ;;  %v555_v5 = vsel %vm276_vm5, %v553_v2, %v554_v3  ;;  %vm738_vm11 = vcmask 138240  }
 0x10b   : > { %810 = vrot.lane.b32.xlu0 %v807_v14, %s2157_s20  ;;  %832 = vst [vmem:[#allocation1] ss:$4 sm:$0xff] %v830_v7  ;;  %v2339_v16 = vadd.f32 %v456_v12, %v432_v0  ;;  %v948_v7 = vld [vmem:[#allocation2 + $0x2] sm:$0xf]  ;;  %s1823_s20 = sld [smem:[#allocation7 + $0x55]] }
 0x10c   : > { %v2341_v17 = vadd.f32 %v455_v15, %v431_v1 }
 0x110   : > { %v487_v19 = vpop.permute.xlu1 %486 }
 0x111   : > { %v492_v21 = vsel %vm490_vm12, %v487_v19, %v489_v52  ;;  %v485_v23 = vpop.permute.xlu0 %484 }
 0x112   : > { %v834_v24 = vld.sshfl [vmem:[#allocation1 + $0x8] sm:$0xff pattern:$0x73625140]  ;;  %v835_v25 = vld.sshfl [vmem:[#allocation1 + $0x10] sm:$0xff pattern:$0x73625140]  ;;  %v491_v26 = vsel %vm490_vm12, %v485_v23, %v487_v19  ;;  %v496_v36 = vmul.f32 %v492_v21, %v477_v32  ;;  %v580_v21 = vstv %s1821_s28 }
 0x113   : > { %838 = vrot.lane.b32.xlu1 %v834_v24, %s2158_s8  ;;  %v833_v27 = vld.sshfl [vmem:[#allocation1] sm:$0xff pattern:$0x73625140]  ;;  %840 = vrot.lane.b32.xlu2 %v835_v25, %s2158_s8  ;;  %v567_v33 = vpop.permute.xlu2 %566  ;;  %v495_v39 = vmul.f32 %v491_v26, %v477_v32  ;;  %v964_v25 = vld [vmem:[#allocation2 + $0x2] sm:$0x3f]  ;;  %s1832_s28 = sld [smem:[#allocation7 + $0x17]] }
 0x114   : > { %836 = vrot.lane.b32.xlu0 %v833_v27, %s2158_s8  ;;  %872 = vst [vmem:[#allocation1] ss:$4 sm:$0xff] %v870_v20  ;;  %v579_v20 = vstv %s1820_s24  ;;  %s2371_s8 = sld [smem:[#allocation7 + $0x2]]  ;;  %s2165_s24 = smov 47   ;;  %vm764_vm12 = vcmask 7168  }
 0x115   : > { %v581_v23 = vsel %vm276_vm5, %v579_v20, %v580_v21 }
 0x119   : > { %v513_v37 = vpop.permute.xlu1 %512 }
 0x11a   : > { %v518_v40 = vsel %vm516_vm13, %v513_v37, %v515_v4  ;;  %v511_v41 = vpop.permute.xlu0 %510 }
 0x11b   : > { %v874_v42 = vld.sshfl [vmem:[#allocation1 + $0x8] sm:$0xff pattern:$0x73625140]  ;;  %v875_v43 = vld.sshfl [vmem:[#allocation1 + $0x10] sm:$0xff pattern:$0x73625140]  ;;  %v522_v44 = vmul.f32 %v518_v40, %v503_v35  ;;  %v517_v45 = vsel %vm516_vm13, %v511_v41, %v513_v37  ;;  %v605_v37 = vstv %s1822_s15 }
 0x11c   : > { %878 = vrot.lane.b32.xlu1 %v874_v42, %s2159_s18  ;;  %v873_v46 = vld.sshfl [vmem:[#allocation1] sm:$0xff pattern:$0x73625140]  ;;  %v521_v47 = vmul.f32 %v517_v45, %v503_v35  ;;  %880 = vrot.lane.b32.xlu2 %v875_v43, %s2159_s18  ;;  %v593_v52 = vpop.permute.xlu2 %592  ;;  %v990_v40 = vld [vmem:[#allocation2 + $0x2] sm:$0x3f]  ;;  %v242_v41 = vand.u32 127, %v228_v22  ;;  %v632_v22 = vstv %s1825_s5 }
 0x11d   : > { %876 = vrot.lane.b32.xlu0 %v873_v46, %s2159_s18  ;;  %898 = vst [vmem:[#allocation1] ss:$4 sm:$0xff] %v896_v38  ;;  %v524_v48 = vadd.f32 %v522_v44, %v496_v36  ;;  %v606_v38 = vstv %s1823_s20  ;;  %s1829_s18 = sld [smem:[#allocation7 + $0x3a]]  ;;  %s2166_s15 = smov 31   ;;  %vm790_vm13 = vcmask 924672  }
 0x11e   : > { %v523_v49 = vadd.f32 %v521_v47, %v495_v39  ;;  %v607_v39 = vsel %vm276_vm5, %v605_v37, %v606_v38  ;;  %s1834_s20 = sld [smem:[#allocation7 + $0x1e]]  ;;  %s2167_s5 = smov 15  }
 0x122   : > { %v539_v54 = vpop.permute.xlu1 %538 }
 0x123   : > { %v544_v56 = vsel %vm542_vm14, %v539_v54, %v541_v18  ;;  %v537_v57 = vpop.permute.xlu0 %536 }
 0x124   : > { %v900_v58 = vld.sshfl [vmem:[#allocation1 + $0x8] sm:$0xff pattern:$0x73625140]  ;;  %v901_v59 = vld.sshfl [vmem:[#allocation1 + $0x10] sm:$0xff pattern:$0x73625140]  ;;  %v548_v60 = vmul.f32 %v544_v56, %v529_v53  ;;  %v543_v61 = vsel %vm542_vm14, %v537_v57, %v539_v54 }
 0x125   : > { %904 = vrot.lane.b32.xlu1 %v900_v58, %s2160_s23  ;;  %v899_v62 = vld.sshfl [vmem:[#allocation1] sm:$0xff pattern:$0x73625140]  ;;  %v547_v63 = vmul.f32 %v543_v61, %v529_v53  ;;  %906 = vrot.lane.b32.xlu2 %v901_v59, %s2160_s23  ;;  %v619_v4 = vpop.permute.xlu2 %618  ;;  %v1016_v58 = vld [vmem:[#allocation2 + $0x2] sm:$0x3f]  ;;  %v2367_v59 = vand.u32 15, %v242_v41 }
 0x126   : > { %902 = vrot.lane.b32.xlu0 %v899_v62, %s2160_s23  ;;  %924 = vst [vmem:[#allocation1] ss:$4 sm:$0xff] %v922_v55  ;;  %v550_v0 = vadd.f32 %v548_v60, %v524_v48  ;;  %v631_v55 = vstv %s1824_s4  ;;  %s1831_s23 = sld [smem:[#allocation7 + $0x41]]  ;;  %vm816_vm14 = vcmask 793600  }
 0x127   : > { %v549_v1 = vadd.f32 %v547_v63, %v523_v49  ;;  %v633_v57 = vsel %vm276_vm5, %v631_v55, %v632_v22  ;;  %vm270_vm7 = vcmp.ge.s32.totalorder %v2367_v59, 3  ;;  %vm467_vm8 = vcmp.ge.s32.totalorder %v2367_v59, 2  ;;  %s1835_s4 = sld [smem:[#allocation7 + $0x4f]] }
 0x12b   : > { %v565_v6 = vpop.permute.xlu1 %564 }
 0x12c   : > { %v570_v8 = vsel %vm568_vm15, %v565_v6, %v567_v33  ;;  %v563_v9 = vpop.permute.xlu0 %562 }
 0x12d   : > { %v926_v10 = vld.sshfl [vmem:[#allocation1 + $0x8] sm:$0xff pattern:$0x73625140]  ;;  %v927_v11 = vld.sshfl [vmem:[#allocation1 + $0x10] sm:$0xff pattern:$0x73625140]  ;;  %v574_v12 = vmul.f32 %v570_v8, %v555_v5  ;;  %v569_v13 = vsel %vm568_vm15, %v563_v9, %v565_v6 }
 0x12e   : > { %930 = vrot.lane.b32.xlu1 %v926_v10, %s2161_s30  ;;  %v925_v14 = vld.sshfl [vmem:[#allocation1] sm:$0xff pattern:$0x73625140]  ;;  %v573_v15 = vmul.f32 %v569_v13, %v555_v5  ;;  %932 = vrot.lane.b32.xlu2 %v927_v11, %s2161_s30  ;;  %v645_v24 = vpop.permute.xlu2 %644  ;;  %v463_v10 = vsel %vm270_vm7, %v2341_v17, 0.0  ;;  %vm842_vm15 = vcmask 662528   ;;  %vm976_vm7 = vcmask 916480  }
 0x12f   : > { %928 = vrot.lane.b32.xlu0 %v925_v14, %s2161_s30  ;;  %950 = vst [vmem:[#allocation1] ss:$4 sm:$0xff] %v948_v7  ;;  %v576_v18 = vadd.f32 %v574_v12, %v550_v0  ;;  %v1056_v14 = vld [vmem:[#allocation2] sm:$0x3f]  ;;  %s1833_s30 = sld [smem:[#allocation7 + $0x48]] }
 0x130   : > { %v575_v19 = vadd.f32 %v573_v15, %v549_v1 }
 0x134   : > { %v591_v26 = vpop.permute.xlu1 %590 }
 0x135   : > { %v596_v27 = vsel %vm594_vm1, %v591_v26, %v593_v52  ;;  %v589_v28 = vpop.permute.xlu0 %588  ;;  %v243_v52 = vadd.s32 128, %v242_v41 }
 0x136   : > { %v2356_v29 = vld.sshfl [vmem:[#allocation1] sm:$0xff pattern:$0x73625140]  ;;  %v2358_v30 = vld.sshfl [vmem:[#allocation1 + $0x8] sm:$0xff pattern:$0x73625140]  ;;  %v600_v31 = vmul.f32 %v596_v27, %v581_v23  ;;  %v595_v32 = vsel %vm594_vm1, %v589_v28, %v591_v26  ;;  %v697_v26 = vstv %s2375_s17  ;;  %v698_v27 = vstv %s1829_s18 }
 0x137   : > { %966 = vst [vmem:[#allocation1] ss:$4 sm:$0xff] %v964_v25  ;;  %v599_v33 = vmul.f32 %v595_v32, %v581_v23  ;;  %v685_v43 = vpop.permute.xlu2 %684  ;;  %v2363_v56 = vand.u32 15, %v243_v52  ;;  %v672_v25 = vstv %s1827_s14  ;;  %v1082_v32 = vld [vmem:[#allocation2] sm:$0x3f]  ;;  %s1838_s14 = sld [smem:[#allocation7 + $0x2c]] }
 0x138   : > { %v602_v35 = vadd.f32 %v600_v31, %v576_v18  ;;  %v699_v31 = vsel %vm276_vm5, %v697_v26, %v698_v27  ;;  %s1839_s17 = sld [smem:[#allocation7 + $0x5d]]  ;;  %s2169_s18 = smov 111  }
 0x139   : > { %v601_v36 = vadd.f32 %v599_v33, %v575_v19  ;;  %vm271_vm4 = vcmp.ge.s32.totalorder %v2363_v56, 3  ;;  %vm468_vm6 = vcmp.ge.s32.totalorder %v2363_v56, 2  ;;  %vm664_vm1 = vcmp.ge.s32.totalorder %v2363_v56, 1 }
 0x13a   : > { %v464_v8 = vsel %vm271_vm4, %v2339_v16, 0.0  ;;  %vm908_vm4 = vcmask 261120  }
 0x13d   : > { %v617_v42 = vpop.permute.xlu1 %616 }
 0x13e   : > { %v968_v44 = vld.sshfl [vmem:[#allocation1 + $0x8] sm:$0xff pattern:$0x73625140]  ;;  %v969_v45 = vld.sshfl [vmem:[#allocation1 + $0x10] sm:$0xff pattern:$0x73625140]  ;;  %v622_v46 = vsel %vm620_vm2, %v617_v42, %v619_v4  ;;  %v615_v47 = vpop.permute.xlu0 %614 }
 0x13f   : > { %972 = vrot.lane.b32.xlu1 %v968_v44, %s2162_s6  ;;  %v967_v48 = vld.sshfl [vmem:[#allocation1] sm:$0xff pattern:$0x73625140]  ;;  %v626_v49 = vmul.f32 %v622_v46, %v607_v39  ;;  %v621_v50 = vsel %vm620_vm2, %v615_v47, %v617_v42  ;;  %974 = vrot.lane.b32.xlu2 %v969_v45, %s2162_s6  ;;  %vm663_vm2 = vcmp.ge.s32.totalorder %v2367_v59, 1 }
 0x140   : > { %970 = vrot.lane.b32.xlu0 %v967_v48, %s2162_s6  ;;  %992 = vst [vmem:[#allocation1] ss:$4 sm:$0xff] %v990_v40  ;;  %v625_v51 = vmul.f32 %v621_v50, %v607_v39  ;;  %v711_v1 = vpop.permute.xlu2 %710  ;;  %v723_v48 = vstv %s1830_s22  ;;  %s1836_s6 = sld [smem:[#allocation7 + $0x25]] }
 0x141   : > { %v628_v53 = vadd.f32 %v626_v49, %v602_v35  ;;  %v724_v49 = vstv %s1831_s23  ;;  %s2400_s22 = sld [smem:[#allocation7 + $0x3]] }
 0x142   : > { %v627_v54 = vadd.f32 %v625_v51, %v601_v36  ;;  %v725_v50 = vsel %vm276_vm5, %v723_v48, %v724_v49  ;;  %v1108_v51 = vld [vmem:[#allocation2] sm:$0x3f]  ;;  %s1841_s23 = sld [smem:[#allocation7 + $0x34]] }
 0x146   : > { %v643_v60 = vpop.permute.xlu1 %642 }
 0x147   : > { %v994_v61 = vld.sshfl [vmem:[#allocation1 + $0x8] sm:$0xff pattern:$0x73625140]  ;;  %v995_v62 = vld.sshfl [vmem:[#allocation1 + $0x10] sm:$0xff pattern:$0x73625140]  ;;  %v648_v63 = vsel %vm646_vm3, %v643_v60, %v645_v24  ;;  %v641_v0 = vpop.permute.xlu0 %640  ;;  %v671_v24 = vstv %s2371_s8 }
 0x148   : > { %998 = vrot.lane.b32.xlu1 %v994_v61, %s2163_s7  ;;  %v993_v2 = vld.sshfl [vmem:[#allocation1] sm:$0xff pattern:$0x73625140]  ;;  %v652_v3 = vmul.f32 %v648_v63, %v633_v57  ;;  %v647_v4 = vsel %vm646_vm3, %v641_v0, %v643_v60  ;;  %1000 = vrot.lane.b32.xlu2 %v995_v62, %s2163_s7  ;;  %v673_v28 = vsel %vm276_vm5, %v671_v24, %v672_v25  ;;  %s2168_s8 = smov 127   ;;  %vm882_vm3 = vcmask 392192  }
 0x149   : > { %996 = vrot.lane.b32.xlu0 %v993_v2, %s2163_s7  ;;  %1018 = vst [vmem:[#allocation1] ss:$4 sm:$0xff] %v1016_v58  ;;  %v651_v5 = vmul.f32 %v647_v4, %v633_v57  ;;  %v737_v17 = vpop.permute.xlu2 %736  ;;  %v750_v2 = vstv %s1833_s30  ;;  %v1134_v4 = vld [vmem:[#allocation2 + $0x2] sm:$0x3f]  ;;  %s1837_s7 = sld [smem:[#allocation7 + $0x56]]  ;;  %s2171_s30 = smov 79  }
 0x14a   : > { %v654_v6 = vadd.f32 %v652_v3, %v628_v53 }
 0x14b   : > { %v653_v7 = vadd.f32 %v651_v5, %v627_v54 }
 0x14c   : > { %v660_v9 = vsel %vm468_vm6, %v654_v6, 0.0  ;;  %vm934_vm6 = vcmask 130048  }
 0x14d   : > { %v2379_v11 = vadd.f32 %v660_v9, %v464_v8  ;;  %v659_v12 = vsel %vm467_vm8, %v653_v7, 0.0  ;;  %vm1002_vm8 = vcmask 785408  }
 0x14e   : > { %v2381_v13 = vadd.f32 %v659_v12, %v463_v10 }
 0x14f   : > { %v683_v15 = vpop.permute.xlu1 %682 }
 0x150   : > { %v1020_v18 = vld.sshfl [vmem:[#allocation1 + $0x8] sm:$0xff pattern:$0x73625140]  ;;  %v1021_v19 = vld.sshfl [vmem:[#allocation1 + $0x10] sm:$0xff pattern:$0x73625140]  ;;  %v688_v20 = vsel %vm686_vm9, %v683_v15, %v685_v43  ;;  %v681_v21 = vpop.permute.xlu0 %680 }
 0x151   : > { %1024 = vrot.lane.b32.xlu1 %v1020_v18, %s2164_s19  ;;  %v1019_v16 = vld.sshfl [vmem:[#allocation1] sm:$0xff pattern:$0x73625140]  ;;  %v687_v23 = vsel %vm686_vm9, %v681_v21, %v683_v15  ;;  %1026 = vrot.lane.b32.xlu2 %v1021_v19, %s2164_s19  ;;  %v692_v33 = vmul.f32 %v688_v20, %v673_v28  ;;  %v775_v20 = vstv %s1834_s20  ;;  %v776_v21 = vstv %s1835_s4  ;;  %s1845_s20 = sld [smem:[#allocation7 + $0x42]]  ;;  %s2172_s4 = smov 46  }
 0x152   : > { %1022 = vrot.lane.b32.xlu0 %v1019_v16, %s2164_s19  ;;  %1058 = vst [vmem:[#allocation1] ss:$4 sm:$0xff] %v1056_v14  ;;  %v691_v38 = vmul.f32 %v687_v23, %v673_v28  ;;  %v763_v45 = vpop.permute.xlu2 %762  ;;  %v777_v23 = vsel %vm276_vm5, %v775_v20, %v776_v21  ;;  %s2170_s19 = smov 95   ;;  %vm1028_vm9 = vcmask 654336  }
 0x158   : > { %v709_v35 = vpop.permute.xlu1 %708 }
 0x159   : > { %v1060_v36 = vld.sshfl [vmem:[#allocation1 + $0x8] sm:$0xff pattern:$0x73625140]  ;;  %v1061_v37 = vld.sshfl [vmem:[#allocation1 + $0x10] sm:$0xff pattern:$0x73625140]  ;;  %v714_v39 = vsel %vm712_vm10, %v709_v35, %v711_v1  ;;  %v707_v40 = vpop.permute.xlu0 %706  ;;  %v749_v1 = vstv %s1832_s28 }
 0x15a   : > { %1064 = vrot.lane.b32.xlu1 %v1060_v36, %s2165_s24  ;;  %v1059_v41 = vld.sshfl [vmem:[#allocation1] sm:$0xff pattern:$0x73625140]  ;;  %v718_v42 = vmul.f32 %v714_v39, %v699_v31  ;;  %v713_v43 = vsel %vm712_vm10, %v707_v40, %v709_v35  ;;  %1066 = vrot.lane.b32.xlu2 %v1061_v37, %s2165_s24  ;;  %v751_v3 = vsel %vm276_vm5, %v749_v1, %v750_v2  ;;  %v802_v39 = vstv %s1837_s7  ;;  %s1843_s28 = sld [smem:[#allocation7 + $0x3b]]  ;;  %s2173_s7 = smov 30  }
 0x15b   : > { %1062 = vrot.lane.b32.xlu0 %v1059_v41, %s2165_s24  ;;  %1084 = vst [vmem:[#allocation1] ss:$4 sm:$0xff] %v1082_v32  ;;  %v717_v44 = vmul.f32 %v713_v43, %v699_v31  ;;  %v789_v63 = vpop.permute.xlu2 %788  ;;  %s1842_s24 = sld [smem:[#allocation7 + $0xa]]  ;;  %vm1068_vm10 = vcmask 384000  }
 0x15c   : > { %v720_v46 = vadd.f32 %v718_v42, %v692_v33  ;;  %v1186_v42 = vld [vmem:[#allocation2 + $0x2] sm:$0x3f] }
 0x15d   : > { %v719_v47 = vadd.f32 %v717_v44, %v691_v38  ;;  %v801_v38 = vstv %s1836_s6  ;;  %s1847_s6 = sld [smem:[#allocation7 + $0x49]] }
 0x15e   : > { %v803_v41 = vsel %vm276_vm5, %v801_v38, %v802_v39 }
 0x161   : > { %v735_v52 = vpop.permute.xlu1 %734 }
 0x162   : > { %v1086_v53 = vld.sshfl [vmem:[#allocation1 + $0x8] sm:$0xff pattern:$0x73625140]  ;;  %v1087_v54 = vld.sshfl [vmem:[#allocation1 + $0x10] sm:$0xff pattern:$0x73625140]  ;;  %v740_v55 = vsel %vm738_vm11, %v735_v52, %v737_v17  ;;  %v733_v22 = vpop.permute.xlu0 %732 }
 0x163   : > { %1090 = vrot.lane.b32.xlu1 %v1086_v53, %s2166_s15  ;;  %v1085_v57 = vld.sshfl [vmem:[#allocation1] sm:$0xff pattern:$0x73625140]  ;;  %v744_v58 = vmul.f32 %v740_v55, %v725_v50  ;;  %v739_v60 = vsel %vm738_vm11, %v733_v22, %v735_v52  ;;  %1092 = vrot.lane.b32.xlu2 %v1087_v54, %s2166_s15  ;;  %v1160_v17 = vld [vmem:[#allocation2 + $0x2] sm:$0x3f]  ;;  %v827_v54 = vstv %s1838_s14  ;;  %v828_v55 = vstv %s1839_s17  ;;  %s1849_s14 = sld [smem:[#allocation7 + $0x50]] }
 0x164   : > { %1088 = vrot.lane.b32.xlu0 %v1085_v57, %s2166_s15  ;;  %1110 = vst [vmem:[#allocation1] ss:$4 sm:$0xff] %v1108_v51  ;;  %v743_v61 = vmul.f32 %v739_v60, %v725_v50  ;;  %v815_v16 = vpop.permute.xlu2 %814  ;;  %v829_v57 = vsel %vm276_vm5, %v827_v54, %v828_v55  ;;  %s1844_s15 = sld [smem:[#allocation7 + $0x11]]  ;;  %s2174_s17 = smov 14   ;;  %vm1094_vm11 = vcmask 252928  }
 0x165   : > { %v746_v62 = vadd.f32 %v744_v58, %v720_v46  ;;  %v1212_v58 = vld [vmem:[#allocation2 + $0x2] sm:$0x3f] }
 0x166   : > { %v745_v0 = vadd.f32 %v743_v61, %v719_v47 }
 0x16a   : > { %v761_v5 = vpop.permute.xlu1 %760 }
 0x16b   : > { %v1112_v6 = vld.sshfl [vmem:[#allocation1 + $0x8] sm:$0xff pattern:$0x73625140]  ;;  %v1113_v7 = vld.sshfl [vmem:[#allocation1 + $0x10] sm:$0xff pattern:$0x73625140]  ;;  %v766_v8 = vsel %vm764_vm12, %v761_v5, %v763_v45  ;;  %v759_v9 = vpop.permute.xlu0 %758 }
 0x16c   : > { %1116 = vrot.lane.b32.xlu1 %v1112_v6, %s2167_s5  ;;  %v1111_v10 = vld.sshfl [vmem:[#allocation1] sm:$0xff pattern:$0x73625140]  ;;  %v770_v12 = vmul.f32 %v766_v8, %v751_v3  ;;  %v765_v14 = vsel %vm764_vm12, %v759_v9, %v761_v5  ;;  %1118 = vrot.lane.b32.xlu2 %v1113_v7, %s2167_s5  ;;  %vm1120_vm12 = vcmask 121856  }
 0x16d   : > { %1114 = vrot.lane.b32.xlu0 %v1111_v10, %s2167_s5  ;;  %1136 = vst [vmem:[#allocation1] ss:$4 sm:$0xff] %v1134_v4  ;;  %v769_v15 = vmul.f32 %v765_v14, %v751_v3  ;;  %v841_v40 = vpop.permute.xlu2 %840  ;;  %v1252_v14 = vld [vmem:[#allocation2] sm:$0x3f]  ;;  %s2416_s5 = sld [smem:[#allocation7 + $0x18]] }
 0x16e   : > { %v772_v18 = vadd.f32 %v770_v12, %v746_v62 }
 0x16f   : > { %v771_v19 = vadd.f32 %v769_v15, %v745_v0 }
 0x173   : > { %v787_v24 = vpop.permute.xlu1 %786 }
 0x174   : > { %v1138_v25 = vld.sshfl [vmem:[#allocation1 + $0x8] sm:$0xff pattern:$0x73625140]  ;;  %v1139_v26 = vld.sshfl [vmem:[#allocation1 + $0x10] sm:$0xff pattern:$0x73625140]  ;;  %v792_v27 = vsel %vm790_vm13, %v787_v24, %v789_v63  ;;  %v785_v28 = vpop.permute.xlu0 %784 }
 0x175   : > { %1142 = vrot.lane.b32.xlu1 %v1138_v25, %s2168_s8  ;;  %v1137_v31 = vld.sshfl [vmem:[#allocation1] sm:$0xff pattern:$0x73625140]  ;;  %v796_v32 = vmul.f32 %v792_v27, %v777_v23  ;;  %v791_v33 = vsel %vm790_vm13, %v785_v28, %v787_v24  ;;  %1144 = vrot.lane.b32.xlu2 %v1139_v26, %s2168_s8  ;;  %v893_v24 = vstv %s1842_s24  ;;  %v894_v25 = vstv %s1843_s28  ;;  %v1278_v28 = vld [vmem:[#allocation2] sm:$0x3f]  ;;  %s1853_s24 = sld [smem:[#allocation7 + $0x5e]] }
 0x176   : > { %1140 = vrot.lane.b32.xlu0 %v1137_v31, %s2168_s8  ;;  %1162 = vst [vmem:[#allocation1] ss:$4 sm:$0xff] %v1160_v17  ;;  %v795_v35 = vmul.f32 %v791_v33, %v777_v23  ;;  %v881_v22 = vpop.permute.xlu2 %880  ;;  %v868_v17 = vstv %s1841_s23  ;;  %v895_v27 = vsel %vm276_vm5, %v893_v24, %v894_v25  ;;  %s1848_s8 = sld [smem:[#allocation7 + $0x1f]]  ;;  %s2176_s28 = smov 110   ;;  %vm1146_vm13 = vcmask 1039360  }
 0x177   : > { %v798_v36 = vadd.f32 %v796_v32, %v772_v18  ;;  %s1852_s23 = sld [smem:[#allocation7 + $0x2d]] }
 0x178   : > { %v797_v37 = vadd.f32 %v795_v35, %v771_v19 }
 0x17c   : > { %v813_v43 = vpop.permute.xlu1 %812 }
 0x17d   : > { %v1164_v44 = vld.sshfl [vmem:[#allocation1 + $0x8] sm:$0xff pattern:$0x73625140]  ;;  %v1165_v45 = vld.sshfl [vmem:[#allocation1 + $0x10] sm:$0xff pattern:$0x73625140]  ;;  %v818_v46 = vsel %vm816_vm14, %v813_v43, %v815_v16  ;;  %v811_v47 = vpop.permute.xlu0 %810 }
 0x17e   : > { %1168 = vrot.lane.b32.xlu1 %v1164_v44, %s2169_s18  ;;  %v1163_v48 = vld.sshfl [vmem:[#allocation1] sm:$0xff pattern:$0x73625140]  ;;  %v822_v49 = vmul.f32 %v818_v46, %v803_v41  ;;  %v817_v50 = vsel %vm816_vm14, %v811_v47, %v813_v43  ;;  %1170 = vrot.lane.b32.xlu2 %v1165_v45, %s2169_s18  ;;  %v919_v45 = vstv %s1844_s15  ;;  %v920_v46 = vstv %s1845_s20  ;;  %s1854_s15 = sld [smem:[#allocation7 + $0x4]] }
 0x17f   : > { %1166 = vrot.lane.b32.xlu0 %v1163_v48, %s2169_s18  ;;  %1188 = vst [vmem:[#allocation1] ss:$4 sm:$0xff] %v1186_v42  ;;  %v821_v51 = vmul.f32 %v817_v50, %v803_v41  ;;  %v907_v8 = vpop.permute.xlu2 %906  ;;  %v921_v48 = vsel %vm276_vm5, %v919_v45, %v920_v46  ;;  %s1850_s18 = sld [smem:[#allocation7 + $0x26]]  ;;  %v1013_v46 = vstv %s1852_s23  ;;  %vm1172_vm14 = vcmask 908288  }
 0x180   : > { %v824_v52 = vadd.f32 %v822_v49, %v798_v36  ;;  %v1304_v49 = vld [vmem:[#allocation2] sm:$0x3f]  ;;  %s1855_s20 = sld [smem:[#allocation7 + $0x35]] }
 0x181   : > { %v823_v53 = vadd.f32 %v821_v51, %v797_v37  ;;  %s1863_s23 = sld [smem:[#allocation7 + $0x51]] }
 0x185   : > { %v839_v60 = vpop.permute.xlu1 %838 }
 0x186   : > { %v1190_v61 = vld.sshfl [vmem:[#allocation1 + $0x8] sm:$0xff pattern:$0x73625140]  ;;  %v1191_v62 = vld.sshfl [vmem:[#allocation1 + $0x10] sm:$0xff pattern:$0x73625140]  ;;  %v844_v63 = vsel %vm842_vm15, %v839_v60, %v841_v40  ;;  %v837_v0 = vpop.permute.xlu0 %836 }
 0x187   : > { %1194 = vrot.lane.b32.xlu1 %v1190_v61, %s2170_s19  ;;  %v1189_v1 = vld.sshfl [vmem:[#allocation1] sm:$0xff pattern:$0x73625140]  ;;  %v848_v2 = vmul.f32 %v844_v63, %v829_v57  ;;  %v843_v3 = vsel %vm842_vm15, %v837_v0, %v839_v60  ;;  %1196 = vrot.lane.b32.xlu2 %v1191_v62, %s2170_s19  ;;  %v1330_v63 = vld [vmem:[#allocation2 + $0x2] sm:$0x3f]  ;;  %v945_v0 = vstv %s2416_s5  ;;  %s1857_s5 = sld [smem:[#allocation7 + $0x3c]] }
 0x188   : > { %1192 = vrot.lane.b32.xlu0 %v1189_v1, %s2170_s19  ;;  %1214 = vst [vmem:[#allocation1] ss:$4 sm:$0xff] %v1212_v58  ;;  %v847_v4 = vmul.f32 %v843_v3, %v829_v57  ;;  %v933_v26 = vpop.permute.xlu2 %932  ;;  %v946_v1 = vstv %s1847_s6  ;;  %s1851_s19 = sld [smem:[#allocation7 + $0x57]]  ;;  %s2178_s6 = smov 78   ;;  %vm1198_vm15 = vcmask 777216  }
 0x189   : > { %v850_v5 = vadd.f32 %v848_v2, %v824_v52 }
 0x18a   : > { %v849_v6 = vadd.f32 %v847_v4, %v823_v53 }
 0x18b   : > { %v856_v7 = vsel %vm664_vm1, %v850_v5, 0.0  ;;  %v947_v5 = vsel %vm276_vm5, %v945_v0, %v946_v1  ;;  %vm1224_vm1 = vcmask 646144  }
 0x18c   : > { %v2404_v9 = vadd.f32 %v856_v7, %v2379_v11  ;;  %v855_v10 = vsel %vm663_vm2, %v849_v6, 0.0  ;;  %v867_v11 = vstv %s2400_s22  ;;  %v961_v6 = vstv %s1848_s8  ;;  %s2175_s22 = smov 126   ;;  %s1859_s8 = sld [smem:[#allocation7 + $0x43]] }
 0x18d   : > { %v2407_v12 = vadd.f32 %v855_v10, %v2381_v13  ;;  %v869_v13 = vsel %vm276_vm5, %v867_v11, %v868_v17  ;;  %v962_v7 = vstv %s1849_s14  ;;  %s2179_s14 = smov 45   ;;  %vm1048_vm2 = vcmp.lt.s32.totalorder %v2363_v56, 15 }
 0x18e   : > { %v879_v15 = vpop.permute.xlu1 %878  ;;  %v963_v10 = vsel %vm276_vm5, %v961_v6, %v962_v7 }
 0x18f   : > { %v1216_v18 = vld.sshfl [vmem:[#allocation1 + $0x8] sm:$0xff pattern:$0x73625140]  ;;  %v1217_v19 = vld.sshfl [vmem:[#allocation1 + $0x10] sm:$0xff pattern:$0x73625140]  ;;  %v884_v20 = vsel %vm882_vm3, %v879_v15, %v881_v22  ;;  %v877_v21 = vpop.permute.xlu0 %876 }
 0x190   : > { %1220 = vrot.lane.b32.xlu1 %v1216_v18, %s2171_s30  ;;  %v1215_v16 = vld.sshfl [vmem:[#allocation1] sm:$0xff pattern:$0x73625140]  ;;  %v883_v23 = vsel %vm882_vm3, %v877_v21, %v879_v15  ;;  %1222 = vrot.lane.b32.xlu2 %v1217_v19, %s2171_s30  ;;  %v888_v31 = vmul.f32 %v884_v20, %v869_v13  ;;  %v1356_v19 = vld [vmem:[#allocation2 + $0x2] sm:$0x3f]  ;;  %vm1047_vm3 = vcmp.lt.s32.totalorder %v2367_v59, 15 }
 0x191   : > { %1218 = vrot.lane.b32.xlu0 %v1215_v16, %s2171_s30  ;;  %1254 = vst [vmem:[#allocation1] ss:$4 sm:$0xff] %v1252_v14  ;;  %v887_v36 = vmul.f32 %v883_v23, %v869_v13  ;;  %v955_v14 = vmul.f32 %v2356_v29, %v947_v5  ;;  %v987_v29 = vstv %s1850_s18  ;;  %s2177_s30 = smov 94   ;;  %s1861_s18 = sld [smem:[#allocation7 + $0x4a]] }
 0x197   : > { %v905_v32 = vpop.permute.xlu1 %904 }
 0x198   : > { %v1256_v33 = vld.sshfl [vmem:[#allocation1 + $0x8] sm:$0xff pattern:$0x73625140]  ;;  %v1257_v35 = vld.sshfl [vmem:[#allocation1 + $0x10] sm:$0xff pattern:$0x73625140]  ;;  %v910_v37 = vsel %vm908_vm4, %v905_v32, %v907_v8  ;;  %v903_v38 = vpop.permute.xlu0 %902  ;;  %v956_v8 = vmul.f32 %v2358_v30, %v947_v5 }
 0x199   : > { %1260 = vrot.lane.b32.xlu1 %v1256_v33, %s2172_s4  ;;  %v1255_v39 = vld.sshfl [vmem:[#allocation1] sm:$0xff pattern:$0x73625140]  ;;  %v914_v40 = vmul.f32 %v910_v37, %v895_v27  ;;  %v909_v41 = vsel %vm908_vm4, %v903_v38, %v905_v32  ;;  %1262 = vrot.lane.b32.xlu2 %v1257_v35, %s2172_s4  ;;  %v975_v47 = vpop.permute.xlu2 %974  ;;  %v1382_v35 = vld [vmem:[#allocation2 + $0x2] sm:$0x3f]  ;;  %vm1264_vm4 = vcmask 375808  }
 0x19a   : > { %1258 = vrot.lane.b32.xlu0 %v1255_v39, %s2172_s4  ;;  %1280 = vst [vmem:[#allocation1] ss:$4 sm:$0xff] %v1278_v28  ;;  %v913_v42 = vmul.f32 %v909_v41, %v895_v27  ;;  %v988_v28 = vstv %s1851_s19  ;;  %s1856_s4 = sld [smem:[#allocation7 + $0xb]]  ;;  %s2180_s19 = smov 29  }
 0x19b   : > { %v916_v43 = vadd.f32 %v914_v40, %v888_v31  ;;  %v989_v31 = vsel %vm276_vm5, %v987_v29, %v988_v28 }
 0x19c   : > { %v915_v44 = vadd.f32 %v913_v42, %v887_v36 }
 0x1a0   : > { %v931_v50 = vpop.permute.xlu1 %930 }
 0x1a1   : > { %v1282_v51 = vld.sshfl [vmem:[#allocation1 + $0x8] sm:$0xff pattern:$0x73625140]  ;;  %v1283_v52 = vld.sshfl [vmem:[#allocation1 + $0x10] sm:$0xff pattern:$0x73625140]  ;;  %v936_v53 = vsel %vm934_vm6, %v931_v50, %v933_v26  ;;  %v929_v54 = vpop.permute.xlu0 %928 }
 0x1a2   : > { %1286 = vrot.lane.b32.xlu1 %v1282_v51, %s2173_s7  ;;  %v1281_v55 = vld.sshfl [vmem:[#allocation1] sm:$0xff pattern:$0x73625140]  ;;  %v940_v22 = vmul.f32 %v936_v53, %v921_v48  ;;  %v935_v57 = vsel %vm934_vm6, %v929_v54, %v931_v50  ;;  %1288 = vrot.lane.b32.xlu2 %v1283_v52, %s2173_s7  ;;  %v1001_v62 = vpop.permute.xlu2 %1000  ;;  %v1408_v50 = vld [vmem:[#allocation2 + $0x2] sm:$0x3f]  ;;  %vm1290_vm6 = vcmask 244736  }
 0x1a3   : > { %1284 = vrot.lane.b32.xlu0 %v1281_v55, %s2173_s7  ;;  %1306 = vst [vmem:[#allocation1] ss:$4 sm:$0xff] %v1304_v49  ;;  %v939_v58 = vmul.f32 %v935_v57, %v921_v48  ;;  %s1858_s7 = sld [smem:[#allocation7 + $0x12]] }
 0x1a4   : > { %v942_v60 = vadd.f32 %v940_v22, %v916_v43 }
 0x1a5   : > { %v941_v61 = vadd.f32 %v939_v58, %v915_v44 }
 0x1a6   : > { %v958_v11 = vadd.f32 %v956_v8, %v942_v60 }
 0x1a7   : > { %v957_v30 = vadd.f32 %v955_v14, %v941_v61  ;;  %v1053_v14 = vstv %s1854_s15  ;;  %s2182_s15 = smov 125  }
 0x1aa   : > { %v1308_v2 = vld.sshfl [vmem:[#allocation1 + $0x8] sm:$0xff pattern:$0x73625140]  ;;  %v1309_v3 = vld.sshfl [vmem:[#allocation1 + $0x10] sm:$0xff pattern:$0x73625140] }
 0x1ab   : > { %1312 = vrot.lane.b32.xlu1 %v1308_v2, %s2174_s17  ;;  %v1307_v4 = vld.sshfl [vmem:[#allocation1] sm:$0xff pattern:$0x73625140]  ;;  %1314 = vrot.lane.b32.xlu2 %v1309_v3, %s2174_s17  ;;  %v1027_v15 = vpop.permute.xlu2 %1026  ;;  %v1448_v2 = vld [vmem:[#allocation2] sm:$0x3f] }
 0x1ac   : > { %1310 = vrot.lane.b32.xlu0 %v1307_v4, %s2174_s17  ;;  %1332 = vst [vmem:[#allocation1] ss:$4 sm:$0xff] %v1330_v63  ;;  %s1860_s17 = sld [smem:[#allocation7 + $0x19]] }
 0x1b1   : > { %v973_v18 = vpop.permute.xlu1 %972 }
 0x1b2   : > { %v978_v20 = vsel %vm976_vm7, %v973_v18, %v975_v47  ;;  %v971_v21 = vpop.permute.xlu0 %970  ;;  %v1014_v47 = vstv %s1853_s24  ;;  %s2181_s24 = smov 13  }
 0x1b3   : > { %v1333_v16 = vld.sshfl [vmem:[#allocation1] sm:$0xff pattern:$0x73625140]  ;;  %v1334_v23 = vld.sshfl [vmem:[#allocation1 + $0x8] sm:$0xff pattern:$0x73625140]  ;;  %v982_v17 = vmul.f32 %v978_v20, %v963_v10  ;;  %v977_v24 = vsel %vm976_vm7, %v971_v21, %v973_v18  ;;  %v1015_v48 = vsel %vm276_vm5, %v1013_v46, %v1014_v47 }
 0x1b4   : > { %1336 = vrot.lane.b32.xlu0 %v1333_v16, %s2175_s22  ;;  %v1335_v25 = vld.sshfl [vmem:[#allocation1 + $0x10] sm:$0xff pattern:$0x73625140]  ;;  %v981_v13 = vmul.f32 %v977_v24, %v963_v10  ;;  %1338 = vrot.lane.b32.xlu2 %v1334_v23, %s2175_s22  ;;  %v1067_v33 = vpop.permute.xlu2 %1066  ;;  %v1474_v16 = vld [vmem:[#allocation2] sm:$0x3f]  ;;  %vm1316_vm7 = vcmask 113664  }
 0x1b5   : > { %1358 = vst [vmem:[#allocation1] ss:$4 sm:$0xff] %v1356_v19  ;;  %v984_v26 = vadd.f32 %v982_v17, %v958_v11 }
 0x1b6   : > { %v983_v27 = vadd.f32 %v981_v13, %v957_v30 }
 0x1ba   : > { %v999_v32 = vpop.permute.xlu1 %998 }
 0x1bb   : > { %v1004_v36 = vsel %vm1002_vm8, %v999_v32, %v1001_v62  ;;  %v997_v37 = vpop.permute.xlu0 %996 }
 0x1bc   : > { %1340 = vrot.lane.b32.xlu0 %v1335_v25, %s2175_s22  ;;  %v1359_v38 = vld.sshfl [vmem:[#allocation1] sm:$0xff pattern:$0x73625140]  ;;  %v1360_v39 = vld.sshfl [vmem:[#allocation1 + $0x8] sm:$0xff pattern:$0x73625140]  ;;  %v1008_v40 = vmul.f32 %v1004_v36, %v989_v31  ;;  %v1003_v41 = vsel %vm1002_vm8, %v997_v37, %v999_v32  ;;  %v1105_v32 = vstv %s1858_s7 }
 0x1bd   : > { %1362 = vrot.lane.b32.xlu1 %v1359_v38, %s2176_s28  ;;  %v1361_v42 = vld.sshfl [vmem:[#allocation1 + $0x10] sm:$0xff pattern:$0x73625140]  ;;  %v1007_v43 = vmul.f32 %v1003_v41, %v989_v31  ;;  %1364 = vrot.lane.b32.xlu2 %v1360_v39, %s2176_s28  ;;  %v1093_v53 = vpop.permute.xlu2 %1092  ;;  %v1500_v37 = vld [vmem:[#allocation2] sm:$0x3f]  ;;  %s1862_s22 = sld [smem:[#allocation7 + $0x20]] }
 0x1be   : > { %1384 = vst [vmem:[#allocation1] ss:$4 sm:$0xff] %v1382_v35  ;;  %v1010_v44 = vadd.f32 %v1008_v40, %v984_v26  ;;  %s2184_s7 = smov 93   ;;  %vm1342_vm8 = vcmask 1031168  }
 0x1bf   : > { %v1009_v45 = vadd.f32 %v1007_v43, %v983_v27 }
 0x1c3   : > { %v1025_v49 = vpop.permute.xlu1 %1024 }
 0x1c4   : > { %1366 = vrot.lane.b32.xlu0 %v1361_v42, %s2176_s28  ;;  %v1030_v51 = vsel %vm1028_vm9, %v1025_v49, %v1027_v15  ;;  %v1023_v52 = vpop.permute.xlu0 %1022  ;;  %v1079_v15 = vstv %s1856_s4  ;;  %s1864_s28 = sld [smem:[#allocation7 + $0x27]] }
 0x1c5   : > { %v1385_v54 = vld.sshfl [vmem:[#allocation1] sm:$0xff pattern:$0x73625140]  ;;  %v1386_v55 = vld.sshfl [vmem:[#allocation1 + $0x8] sm:$0xff pattern:$0x73625140]  ;;  %v1034_v22 = vmul.f32 %v1030_v51, %v1015_v48  ;;  %v1029_v57 = vsel %vm1028_vm9, %v1023_v52, %v1025_v49  ;;  %v1131_v49 = vstv %s1860_s17 }
 0x1c6   : > { %1388 = vrot.lane.b32.xlu1 %v1385_v54, %s2177_s30  ;;  %v1387_v58 = vld.sshfl [vmem:[#allocation1 + $0x10] sm:$0xff pattern:$0x73625140]  ;;  %v1033_v60 = vmul.f32 %v1029_v57, %v1015_v48  ;;  %1390 = vrot.lane.b32.xlu2 %v1386_v55, %s2177_s30  ;;  %v1119_v8 = vpop.permute.xlu2 %1118  ;;  %s1867_s4 = sld [smem:[#allocation7 + $0x5f]]  ;;  %vm1368_vm9 = vcmask 900096  }
 0x1c7   : > { %1410 = vst [vmem:[#allocation1] ss:$4 sm:$0xff] %v1408_v50  ;;  %v1036_v61 = vadd.f32 %v1034_v22, %v1010_v44  ;;  %v1132_v50 = vstv %s1861_s18  ;;  %s1871_s17 = sld [smem:[#allocation7 + $0x3d]]  ;;  %s2185_s18 = smov 77  }
 0x1c8   : > { %v1035_v62 = vadd.f32 %v1033_v60, %v1009_v45  ;;  %v1133_v51 = vsel %vm276_vm5, %v1131_v49, %v1132_v50 }
 0x1c9   : > { %v2430_v63 = vadd.f32 %v1036_v61, %v2404_v9  ;;  %v1054_v9 = vstv %s1855_s20  ;;  %s1866_s20 = sld [smem:[#allocation7 + $0x2e]] }
 0x1ca   : > { %v2433_v0 = vadd.f32 %v1035_v62, %v2407_v12  ;;  %v1080_v12 = vstv %s1857_s5  ;;  %v1055_v18 = vsel %vm276_vm5, %v1053_v14, %v1054_v9  ;;  %s2183_s5 = smov 109  }
 0x1cb   : > { %v1081_v19 = vsel %vm276_vm5, %v1079_v15, %v1080_v12 }
 0x1cc   : > { %1392 = vrot.lane.b32.xlu0 %v1387_v58, %s2177_s30  ;;  %v1065_v1 = vpop.permute.xlu1 %1064  ;;  %s1865_s30 = sld [smem:[#allocation7 + $0x58]] }
 0x1cd   : > { %v1070_v3 = vsel %vm1068_vm10, %v1065_v1, %v1067_v33  ;;  %v1063_v4 = vpop.permute.xlu0 %1062  ;;  %v1106_v33 = vstv %s1859_s8  ;;  %s1869_s8 = sld [smem:[#allocation7 + $0x36]] }
 0x1ce   : > { %v1411_v5 = vld.sshfl [vmem:[#allocation1] sm:$0xff pattern:$0x73625140]  ;;  %v1412_v6 = vld.sshfl [vmem:[#allocation1 + $0x8] sm:$0xff pattern:$0x73625140]  ;;  %v1069_v7 = vsel %vm1068_vm10, %v1063_v4, %v1065_v1  ;;  %v1074_v20 = vmul.f32 %v1070_v3, %v1055_v18  ;;  %v1107_v35 = vsel %vm276_vm5, %v1105_v32, %v1106_v33  ;;  %v1157_v3 = vstv %s1862_s22 }
 0x1cf   : > { %1414 = vrot.lane.b32.xlu1 %v1411_v5, %s2178_s6  ;;  %v1413_v10 = vld.sshfl [vmem:[#allocation1 + $0x10] sm:$0xff pattern:$0x73625140]  ;;  %1416 = vrot.lane.b32.xlu2 %v1412_v6, %s2178_s6  ;;  %v1073_v23 = vmul.f32 %v1069_v7, %v1055_v18  ;;  %v1145_v29 = vpop.permute.xlu2 %1144  ;;  %v1158_v4 = vstv %s1863_s23  ;;  %s1873_s22 = sld [smem:[#allocation7 + $0x44]]  ;;  %vm1394_vm10 = vcmask 769024  }
 0x1d0   : > { %1450 = vst [vmem:[#allocation1] ss:$4 sm:$0xff] %v1448_v2  ;;  %v1159_v6 = vsel %vm276_vm5, %v1157_v3, %v1158_v4  ;;  %s1874_s23 = sld [smem:[#allocation7 + $0x1a]] }
 0x1d3   : > { %v1250_v4 = vstv %s1869_s8  ;;  %s1885_s8 = sld [smem:[#allocation7 + $0x3e]] }
 0x1d4   : > { %1418 = vrot.lane.b32.xlu0 %v1413_v10, %s2178_s6  ;;  %s2458_s6 = sld [smem:[#allocation7 + $0x5]] }
 0x1d5   : > { %v1091_v21 = vpop.permute.xlu1 %1090 }
 0x1d6   : > { %v1096_v11 = vsel %vm1094_vm11, %v1091_v21, %v1093_v53  ;;  %v1089_v17 = vpop.permute.xlu0 %1088  ;;  %v1526_v53 = vld [vmem:[#allocation2 + $0x2] sm:$0x3f] }
 0x1d7   : > { %v1452_v24 = vld.sshfl [vmem:[#allocation1 + $0x8] sm:$0xff pattern:$0x73625140]  ;;  %v1453_v25 = vld.sshfl [vmem:[#allocation1 + $0x10] sm:$0xff pattern:$0x73625140]  ;;  %v1100_v30 = vmul.f32 %v1096_v11, %v1081_v19  ;;  %v1095_v13 = vsel %vm1094_vm11, %v1089_v17, %v1091_v21  ;;  %v1184_v11 = vstv %s1865_s30 }
 0x1d8   : > { %1456 = vrot.lane.b32.xlu1 %v1452_v24, %s2179_s14  ;;  %v1451_v26 = vld.sshfl [vmem:[#allocation1] sm:$0xff pattern:$0x73625140]  ;;  %v1099_v27 = vmul.f32 %v1095_v13, %v1081_v19  ;;  %1458 = vrot.lane.b32.xlu2 %v1453_v25, %s2179_s14  ;;  %v1171_v47 = vpop.permute.xlu2 %1170  ;;  %s1877_s30 = sld [smem:[#allocation7 + $0x52]]  ;;  %vm1420_vm11 = vcmask 637952  }
 0x1d9   : > { %1476 = vst [vmem:[#allocation1] ss:$4 sm:$0xff] %v1474_v16  ;;  %v1102_v28 = vadd.f32 %v1100_v30, %v1074_v20  ;;  %v1578_v30 = vld [vmem:[#allocation2 + $0x2] sm:$0x3f] }
 0x1da   : > { %v1101_v31 = vadd.f32 %v1099_v27, %v1073_v23  ;;  %v1183_v23 = vstv %s1864_s28  ;;  %v1249_v3 = vstv %s2458_s6  ;;  %s1876_s28 = sld [smem:[#allocation7 + $0x21]] }
 0x1db   : > { %v1185_v24 = vsel %vm276_vm5, %v1183_v23, %v1184_v11  ;;  %v1302_v11 = vstv %s1873_s22  ;;  %s1882_s6 = sld [smem:[#allocation7 + $0x6]] }
 0x1dc   : > { %s2501_s22 = sld [smem:[#allocation7 + $0x4c]] }
 0x1de   : > { %v1117_v36 = vpop.permute.xlu1 %1116 }
 0x1df   : > { %v1122_v38 = vsel %vm1120_vm12, %v1117_v36, %v1119_v8  ;;  %v1115_v39 = vpop.permute.xlu0 %1114  ;;  %v1552_v8 = vld [vmem:[#allocation2 + $0x2] sm:$0x3f] }
 0x1e0   : > { %1454 = vrot.lane.b32.xlu1 %v1451_v26, %s2179_s14  ;;  %v1478_v40 = vld.sshfl [vmem:[#allocation1 + $0x8] sm:$0xff pattern:$0x73625140]  ;;  %v1477_v41 = vld.sshfl [vmem:[#allocation1] sm:$0xff pattern:$0x73625140]  ;;  %v1126_v42 = vmul.f32 %v1122_v38, %v1107_v35  ;;  %v1121_v43 = vsel %vm1120_vm12, %v1115_v39, %v1117_v36  ;;  %v1210_v38 = vstv %s1867_s4 }
 0x1e1   : > { %1482 = vrot.lane.b32.xlu0 %v1478_v40, %s2180_s19  ;;  %v1479_v44 = vld.sshfl [vmem:[#allocation1 + $0x10] sm:$0xff pattern:$0x73625140]  ;;  %v1125_v45 = vmul.f32 %v1121_v43, %v1107_v35  ;;  %1480 = vrot.lane.b32.xlu2 %v1477_v41, %s2180_s19  ;;  %v1197_v5 = vpop.permute.xlu2 %1196  ;;  %s1870_s14 = sld [smem:[#allocation7 + $0xc]]  ;;  %vm1243_vm12 = vcmp.lt.s32.totalorder %v2367_v59, 14 }
 0x1e2   : > { %1502 = vst [vmem:[#allocation1] ss:$4 sm:$0xff] %v1500_v37  ;;  %v1128_v46 = vadd.f32 %v1126_v42, %v1102_v28  ;;  %v1209_v37 = vstv %s1866_s20  ;;  %v1604_v42 = vld [vmem:[#allocation2 + $0x2] sm:$0x3f]  ;;  %s1879_s20 = sld [smem:[#allocation7 + $0x59]] }
 0x1e3   : > { %v1127_v48 = vadd.f32 %v1125_v45, %v1101_v31  ;;  %v1211_v40 = vsel %vm276_vm5, %v1209_v37, %v1210_v38  ;;  %s1880_s4 = sld [smem:[#allocation7 + $0x2f]] }
 0x1e7   : > { %v1143_v52 = vpop.permute.xlu1 %1142 }
 0x1e8   : > { %1484 = vrot.lane.b32.xlu1 %v1479_v44, %s2180_s19  ;;  %v1148_v54 = vsel %vm1146_vm13, %v1143_v52, %v1145_v29  ;;  %v1141_v55 = vpop.permute.xlu0 %1140  ;;  %s1872_s19 = sld [smem:[#allocation7 + $0x13]] }
 0x1e9   : > { %v1504_v22 = vld.sshfl [vmem:[#allocation1 + $0x8] sm:$0xff pattern:$0x73625140]  ;;  %v1503_v57 = vld.sshfl [vmem:[#allocation1] sm:$0xff pattern:$0x73625140]  ;;  %v1152_v58 = vmul.f32 %v1148_v54, %v1133_v51  ;;  %v1147_v60 = vsel %vm1146_vm13, %v1141_v55, %v1143_v52 }
 0x1ea   : > { %1508 = vrot.lane.b32.xlu0 %v1504_v22, %s2181_s24  ;;  %v1505_v61 = vld.sshfl [vmem:[#allocation1 + $0x10] sm:$0xff pattern:$0x73625140]  ;;  %v1151_v62 = vmul.f32 %v1147_v60, %v1133_v51  ;;  %v1223_v17 = vpop.permute.xlu2 %1222  ;;  %vm1244_vm13 = vcmp.lt.s32.totalorder %v2363_v56, 14 }
 0x1eb   : > { %1528 = vst [vmem:[#allocation1] ss:$4 sm:$0xff] %v1526_v53  ;;  %v1154_v1 = vadd.f32 %v1152_v58, %v1128_v46 }
 0x1ec   : > { %v1153_v2 = vadd.f32 %v1151_v62, %v1127_v48 }
 0x1ee   : > { %v1301_v23 = vstv %s1872_s19  ;;  %s2499_s19 = sld [smem:[#allocation7 + $0x1b]] }
 0x1f0   : > { %1510 = vrot.lane.b32.xlu1 %v1505_v61, %s2181_s24  ;;  %v1169_v7 = vpop.permute.xlu1 %1168 }
 0x1f1   : > { %v1174_v10 = vsel %vm1172_vm14, %v1169_v7, %v1171_v47  ;;  %v1167_v14 = vpop.permute.xlu0 %1166 }
 0x1f2   : > { %v1531_v9 = vld.sshfl [vmem:[#allocation1 + $0x10] sm:$0xff pattern:$0x73625140]  ;;  %v1529_v15 = vld.sshfl [vmem:[#allocation1] sm:$0xff pattern:$0x73625140]  ;;  %v1178_v12 = vmul.f32 %v1174_v10, %v1159_v6  ;;  %v1173_v18 = vsel %vm1172_vm14, %v1167_v14, %v1169_v7 }
 0x1f3   : > { %1536 = vrot.lane.b32.xlu0 %v1531_v9, %s2182_s15  ;;  %v1530_v19 = vld.sshfl [vmem:[#allocation1 + $0x8] sm:$0xff pattern:$0x73625140]  ;;  %v1177_v20 = vmul.f32 %v1173_v18, %v1159_v6  ;;  %v1263_v39 = vpop.permute.xlu2 %1262  ;;  %vm1486_vm14 = vcmask 236544  }
 0x1f4   : > { %1554 = vst [vmem:[#allocation1] ss:$4 sm:$0xff] %v1552_v8  ;;  %v1180_v21 = vadd.f32 %v1178_v12, %v1154_v1  ;;  %1534 = vrot.lane.b32.xlu2 %v1530_v19, %s2182_s15 }
 0x1f5   : > { %v1179_v16 = vadd.f32 %v1177_v20, %v1153_v2 }
 0x1f8   : > { %1506 = vrot.lane.b32.xlu1 %v1503_v57, %s2181_s24  ;;  %s1875_s24 = sld [smem:[#allocation7 + $0x4b]] }
 0x1f9   : > { %v1195_v25 = vpop.permute.xlu1 %1194 }
 0x1fa   : > { %v1200_v13 = vsel %vm1198_vm15, %v1195_v25, %v1197_v5  ;;  %v1193_v26 = vpop.permute.xlu0 %1192  ;;  %v1276_v5 = vstv %s1871_s17  ;;  %s2495_s17 = sld [smem:[#allocation7 + $0x14]] }
 0x1fb   : > { %v1557_v27 = vld.sshfl [vmem:[#allocation1 + $0x10] sm:$0xff pattern:$0x73625140]  ;;  %v1555_v29 = vld.sshfl [vmem:[#allocation1] sm:$0xff pattern:$0x73625140]  ;;  %v1204_v28 = vmul.f32 %v1200_v13, %v1185_v24  ;;  %v1199_v31 = vsel %vm1198_vm15, %v1193_v26, %v1195_v25 }
 0x1fc   : > { %1562 = vrot.lane.b32.xlu0 %v1557_v27, %s2183_s5  ;;  %v1556_v32 = vld.sshfl [vmem:[#allocation1 + $0x8] sm:$0xff pattern:$0x73625140]  ;;  %v1203_v33 = vmul.f32 %v1199_v31, %v1185_v24  ;;  %v1289_v57 = vpop.permute.xlu2 %1288  ;;  %vm1460_vm15 = vcmask 367616  }
 0x1fd   : > { %1580 = vst [vmem:[#allocation1] ss:$4 sm:$0xff] %v1578_v30  ;;  %v1206_v35 = vadd.f32 %v1204_v28, %v1180_v21  ;;  %1560 = vrot.lane.b32.xlu2 %v1556_v32, %s2183_s5  ;;  %v1327_v32 = vstv %s1874_s23  ;;  %s2505_s23 = sld [smem:[#allocation7 + $0x22]] }
 0x1fe   : > { %v1205_v36 = vadd.f32 %v1203_v33, %v1179_v16  ;;  %v1328_v33 = vstv %s1875_s24  ;;  %s2507_s24 = sld [smem:[#allocation7 + $0x53]] }
 0x200   : > { %1532 = vrot.lane.b32.xlu1 %v1529_v15, %s2182_s15  ;;  %s1878_s15 = sld [smem:[#allocation7 + $0x28]] }
 0x202   : > { %v1221_v41 = vpop.permute.xlu1 %1220 }
 0x203   : > { %v1226_v43 = vsel %vm1224_vm1, %v1221_v41, %v1223_v17  ;;  %v1219_v44 = vpop.permute.xlu0 %1218  ;;  %v1303_v17 = vsel %vm276_vm5, %v1301_v23, %v1302_v11 }
 0x204   : > { %v1581_v45 = vld.sshfl [vmem:[#allocation1] sm:$0xff pattern:$0x73625140]  ;;  %v1582_v46 = vld.sshfl [vmem:[#allocation1 + $0x8] sm:$0xff pattern:$0x73625140]  ;;  %v1230_v47 = vmul.f32 %v1226_v43, %v1211_v40  ;;  %v1225_v48 = vsel %vm1224_vm1, %v1219_v44, %v1221_v41  ;;  %v1353_v41 = vstv %s1876_s28 }
 0x205   : > { %v1583_v49 = vld.sshfl [vmem:[#allocation1 + $0x10] sm:$0xff pattern:$0x73625140]  ;;  %v1229_v50 = vmul.f32 %v1225_v48, %v1211_v40  ;;  %1586 = vrot.lane.b32.xlu2 %v1582_v46, %s2184_s7  ;;  %v1315_v14 = vpop.permute.xlu2 %1314  ;;  %s2509_s28 = sld [smem:[#allocation7 + $0x29]]  ;;  %vm1512_vm1 = vcmask 105472  }
 0x206   : > { %1588 = vrot.lane.b32.xlu0 %v1583_v49, %s2184_s7  ;;  %1606 = vst [vmem:[#allocation1] ss:$4 sm:$0xff] %v1604_v42  ;;  %v1232_v51 = vadd.f32 %v1230_v47, %v1206_v35  ;;  %v1329_v35 = vsel %vm276_vm5, %v1327_v32, %v1328_v33  ;;  %v1354_v42 = vstv %s1877_s30  ;;  %s2515_s30 = sld [smem:[#allocation7 + $0x5a]] }
 0x207   : > { %v1231_v52 = vadd.f32 %v1229_v50, %v1205_v36  ;;  %v1355_v44 = vsel %vm276_vm5, %v1353_v41, %v1354_v42 }
 0x208   : > { %1558 = vrot.lane.b32.xlu1 %v1555_v29, %s2183_s5  ;;  %v1238_v53 = vsel %vm1048_vm2, %v1232_v51, 0.0  ;;  %s1881_s5 = sld [smem:[#allocation7 + $0x60]]  ;;  %vm1538_vm2 = vcmask 1022976  }
 0x209   : > { %v2463_v54 = vadd.f32 %v1238_v53, %v2430_v63  ;;  %v1237_v55 = vsel %vm1047_vm3, %v1231_v52, 0.0  ;;  %v1275_v63 = vstv %s1870_s14  ;;  %v1379_v53 = vstv %s1878_s15  ;;  %s1883_s14 = sld [smem:[#allocation7 + $0x37]] }
 0x20a   : > { %v2466_v22 = vadd.f32 %v1237_v55, %v2433_v0  ;;  %v1251_v0 = vsel %vm276_vm5, %v1249_v3, %v1250_v4  ;;  %v1277_v7 = vsel %vm276_vm5, %v1275_v63, %v1276_v5  ;;  %v1380_v55 = vstv %s1879_s20  ;;  %s2521_s15 = sld [smem:[#allocation7 + $0x30]] }
 0x20b   : > { %v1261_v58 = vpop.permute.xlu1 %1260  ;;  %v1405_v5 = vstv %s1880_s4  ;;  %s2526_s20 = sld [smem:[#allocation7 + $0x61]]  ;;  %vm1564_vm3 = vcmask 891904   ;;  %s1904_s4 = sshll.u32 %s2222_s13, 3 }
 0x20c   : > { %v1266_v60 = vsel %vm1264_vm4, %v1261_v58, %v1263_v39  ;;  %v1259_v61 = vpop.permute.xlu0 %1258  ;;  %s175_s13 = scalar_lea.vmem [#allocation8], %s1796_s29  ;;  %s2084_s29 = scalar_lea.hbm %s2594_s2, 16 }
 0x20d   : > { %v1608_v62 = vld.sshfl [vmem:[#allocation1 + $0x8] sm:$0xff pattern:$0x73625140]  ;;  %v1609_v1 = vld.sshfl [vmem:[#allocation1 + $0x10] sm:$0xff pattern:$0x73625140]  ;;  %v1265_v2 = vsel %vm1264_vm4, %v1259_v61, %v1261_v58  ;;  %1584 = vrot.lane.b32.xlu2 %v1581_v45, %s2184_s7  ;;  %v1270_v8 = vmul.f32 %v1266_v60, %v1251_v0  ;;  %v1381_v60 = vsel %vm276_vm5, %v1379_v53, %v1380_v55 }
 0x20e   : > { %1612 = vrot.lane.b32.xlu0 %v1608_v62, %s2185_s18  ;;  %v1607_v6 = vld.sshfl [vmem:[#allocation1] sm:$0xff pattern:$0x73625140]  ;;  %v1269_v9 = vmul.f32 %v1265_v2, %v1251_v0  ;;  %v1339_v13 = vpop.permute.xlu2 %1338  ;;  %v1406_v0 = vstv %s1881_s5  ;;  %s1884_s7 = sld [smem:[#allocation7 + $0xd]]  ;;  %vm1590_vm4 = vcmask 760832  }
 0x210   : > { %1614 = vrot.lane.b32.xlu1 %v1609_v1, %s2185_s18 }
 0x214   : > { %v1287_v10 = vpop.permute.xlu1 %1286 }
 0x215   : > { %v1292_v15 = vsel %vm1290_vm6, %v1287_v10, %v1289_v57  ;;  %v1285_v12 = vpop.permute.xlu0 %1284  ;;  %1610 = vrot.lane.b32.xlu2 %v1607_v6, %s2185_s18  ;;  %s2497_s18 = sld [smem:[#allocation7 + $0x45]] }
 0x216   : > { %v1296_v18 = vmul.f32 %v1292_v15, %v1277_v7  ;;  %v1291_v19 = vsel %vm1290_vm6, %v1285_v12, %v1287_v10  ;;  %vm1616_vm6 = vcmask 629760  }
 0x217   : > { %v1295_v20 = vmul.f32 %v1291_v19, %v1277_v7  ;;  %v1365_v39 = vpop.permute.xlu2 %1364  ;;  %v1407_v7 = vsel %vm276_vm5, %v1405_v5, %v1406_v0 }
 0x218   : > { %v1298_v21 = vadd.f32 %v1296_v18, %v1270_v8 }
 0x219   : > { %v1297_v16 = vadd.f32 %v1295_v20, %v1269_v9 }
 0x21d   : > { %v1313_v24 = vpop.permute.xlu1 %1312 }
 0x21e   : > { %v1318_v25 = vsel %vm1316_vm7, %v1313_v24, %v1315_v14  ;;  %v1311_v30 = vpop.permute.xlu0 %1310 }
 0x21f   : > { %v1322_v26 = vmul.f32 %v1318_v25, %v1303_v17  ;;  %v1317_v27 = vsel %vm1316_vm7, %v1311_v30, %v1313_v24  ;;  %vm1439_vm7 = vcmp.lt.s32.totalorder %v2367_v59, 13 }
 0x220   : > { %v1321_v29 = vmul.f32 %v1317_v27, %v1303_v17  ;;  %v1391_v51 = vpop.permute.xlu2 %1390 }
 0x221   : > { %v1324_v28 = vadd.f32 %v1322_v26, %v1298_v21 }
 0x222   : > { %v1323_v31 = vadd.f32 %v1321_v29, %v1297_v16 }
 0x226   : > { %v1337_v36 = vpop.permute.xlu0 %1336 }
 0x227   : > { %v1343_v37 = vsel %vm1342_vm8, %v1337_v36, %v1339_v13  ;;  %v1471_v36 = vstv %s1884_s7  ;;  %s1701_s7 = scalar_lea.hbm %s2594_s2, %s1904_s4 }
 0x228   : > { %v1347_v38 = vmul.f32 %v1343_v37, %v1329_v35  ;;  %v1472_v37 = vstv %s1885_s8  ;;  %s1703_s8 = sshll.u32 %s175_s13, 4  ;;  %s1704_s8 = int_to_ptr.vmem [resolvable:$true] %s1703_s8 }
 0x229   : > { %v1417_v63 = vpop.permute.xlu2 %1416  ;;  %v1473_v42 = vsel %vm276_vm5, %v1471_v36, %v1472_v37 }
 0x22a   : > { %v1349_v40 = vadd.f32 %v1347_v38, %v1323_v31 }
 0x22e   : > { %v1341_v43 = vpop.permute.xlu0 %1340 }
 0x22f   : > { %v1344_v45 = vsel %vm1342_vm8, %v1339_v13, %v1341_v43  ;;  %v1363_v46 = vpop.permute.xlu1 %1362  ;;  %vm1440_vm8 = vcmp.lt.s32.totalorder %v2363_v56, 13 }
 0x230   : > { %v1348_v47 = vmul.f32 %v1344_v45, %v1329_v35  ;;  %v1369_v48 = vsel %vm1368_vm9, %v1363_v46, %v1365_v39  ;;  %v1497_v45 = vstv %s2495_s17  ;;  %v1498_v46 = vstv %s2497_s18  ;;  %s1690_s17 = scalar_lea.sflag [#allocation5], %s2294_s27 }
 0x231   : > { %v1373_v49 = vmul.f32 %v1369_v48, %v1355_v44 }
 0x232   : > { %v1350_v50 = vadd.f32 %v1348_v47, %v1324_v28  ;;  %v1459_v19 = vpop.permute.xlu2 %1458 }
 0x233   : > { %v1375_v52 = vadd.f32 %v1373_v49, %v1349_v40  ;;  %v1446_v40 = vstv %s1883_s14  ;;  %v1523_v49 = vstv %s2499_s19  ;;  %s1705_s14 = sshll.u32 %s1701_s7, 4  ;;  %s1706_s14 = int_to_ptr.hbm [resolvable:$true] %s1705_s14 }
 0x234   : > { %s2078_s18 = sshra.s32 %s1706_s14, 4  ;;  %s2079_s18 = int_to_ptr.hbm [resolvable:$true] %s2078_s18 }
 0x235   : > { %s2080_s19 = scalar_lea.hbm %s2079_s18, 8  ;;  %p2085_p9 = scmp.lt.s32.totalorder %s2079_s18, %s2594_s2 }
 0x236   : > { %v1367_v57 = vpop.permute.xlu0 %1366  ;;  %p2081_p1 = scmp.ne.s32.totalorder %s2079_s18, %s2080_s19  ;;  %p2086_p10 = scmp.lt.s32.totalorder %s2084_s29, %s2080_s19 }
 0x237   : > { %v1370_v58 = vsel %vm1368_vm9, %v1365_v39, %v1367_v57  ;;  %v1445_v39 = vstv %s1882_s6  ;;  %v1499_v57 = vsel %vm276_vm5, %v1497_v45, %v1498_v46 }
 0x238   : > { %v1374_v61 = vmul.f32 %v1370_v58, %v1355_v44  ;;  %v1389_v62 = vpop.permute.xlu1 %1388  ;;  %v1447_v44 = vsel %vm276_vm5, %v1445_v39, %v1446_v40  ;;  %p2082_p4 = pnand %p2081_p1, %p2267_p3  ;;  %p2087_p2 = por %p2086_p10, %p2085_p9 }
 0x239   : > { %v1395_v1 = vsel %vm1394_vm10, %v1389_v62, %v1391_v51 }
 0x23a   : > { %v1376_v2 = vadd.f32 %v1374_v61, %v1350_v50  ;;  %v1399_v3 = vmul.f32 %v1395_v1, %v1381_v60  ;;  %v1524_v50 = vstv %s2501_s22  ;;  %v1549_v1 = vstv %s2505_s23  ;;  %p2083_p8 = pneg %p2082_p4 }
 0x23b   : > { %v1481_v13 = vpop.permute.xlu2 %1480 }
 0x23c   : > { %v1401_v4 = vadd.f32 %v1399_v3, %v1375_v52  ;;  %p2088_p11 = pnand %p2087_p2, %p2083_p8 }
 0x23e   : > { %v1393_v6 = vpop.permute.xlu0 %1392 }
 0x23f   : > { %v1396_v8 = vsel %vm1394_vm10, %v1391_v51, %v1393_v6 }
 0x240   : > { %v1400_v15 = vmul.f32 %v1396_v8, %v1381_v60 }
 0x241   : > { %v1415_v10 = vpop.permute.xlu1 %1414 }
 0x242   : > { %v1421_v14 = vsel %vm1420_vm11, %v1415_v10, %v1417_v63  ;;  %v1402_v16 = vadd.f32 %v1400_v15, %v1376_v2  ;;  %v1550_v2 = vstv %s2507_s24 }
 0x243   : > { %v1425_v9 = vmul.f32 %v1421_v14, %v1407_v7  ;;  %v1551_v10 = vsel %vm276_vm5, %v1549_v1, %v1550_v2  ;;  %v1575_v14 = vstv %s2509_s28 }
 0x245   : > { %v1427_v12 = vadd.f32 %v1425_v9, %v1401_v4  ;;  %v1576_v9 = vstv %s2515_s30 }
 0x246   : > { %v1419_v18 = vpop.permute.xlu0 %1418 }
 0x247   : > { %v1433_v20 = vsel %vm1243_vm12, %v1427_v12, 0.0  ;;  %v1422_v21 = vsel %vm1420_vm11, %v1417_v63, %v1419_v18  ;;  %v1525_v63 = vsel %vm276_vm5, %v1523_v49, %v1524_v50 }
 0x248   : > { %v2487_v23 = vadd.f32 %v1433_v20, %v2466_v22  ;;  %v1426_v11 = vmul.f32 %v1422_v21, %v1407_v7 }
 0x24a   : > { %v1428_v17 = vadd.f32 %v1426_v11, %v1402_v16  ;;  %v1457_v24 = vpop.permute.xlu1 %1456  ;;  %v1602_v11 = vstv %s2526_s20 }
 0x24b   : > { %v1462_v52 = vsel %vm1460_vm15, %v1457_v24, %v1459_v19  ;;  %v1601_v19 = vstv %s2521_s15 }
 0x24c   : > { %v1434_v25 = vsel %vm1244_vm13, %v1428_v17, 0.0  ;;  %v1466_v4 = vmul.f32 %v1462_v52, %v1447_v44 }
 0x24d   : > { %v2491_v30 = vadd.f32 %v1434_v25, %v2463_v54 }
 0x24e   : > { %v1535_v29 = vpop.permute.xlu2 %1534 }
 0x252   : > { %v1455_v26 = vpop.permute.xlu1 %1454 }
 0x253   : > { %v1483_v27 = vpop.permute.xlu0 %1482  ;;  %v1461_v41 = vsel %vm1460_vm15, %v1455_v26, %v1457_v24  ;;  %v1577_v26 = vsel %vm276_vm5, %v1575_v14, %v1576_v9 }
 0x254   : > { %v1487_v43 = vsel %vm1486_vm14, %v1481_v13, %v1483_v27  ;;  %v1465_v53 = vmul.f32 %v1461_v41, %v1447_v44 }
 0x255   : > { %v1491_v55 = vmul.f32 %v1487_v43, %v1473_v42 }
 0x257   : > { %v2493_v33 = vpop.permute.xlu2 %1560  ;;  %v1493_v5 = vadd.f32 %v1491_v55, %v1465_v53 }
 0x25a   : > { %v1485_v28 = vpop.permute.xlu1 %1484 }
 0x25b   : > { %v1488_v48 = vsel %vm1486_vm14, %v1483_v27, %v1485_v28 }
 0x25c   : > { %v1509_v31 = vpop.permute.xlu0 %1508  ;;  %v1492_v61 = vmul.f32 %v1488_v48, %v1473_v42 }
 0x25e   : > { %v1494_v15 = vadd.f32 %v1492_v61, %v1466_v4 }
 0x25f   : > { %v2503_v35 = vpop.permute.xlu2 %1586 }
 0x262   : > { %v1511_v32 = vpop.permute.xlu1 %1510 }
 0x263   : > { %v1514_v58 = vsel %vm1512_vm1, %v1509_v31, %v1511_v32 }
 0x264   : > { %v1518_v0 = vmul.f32 %v1514_v58, %v1499_v57 }
 0x265   : > { %v1537_v22 = vpop.permute.xlu0 %1536 }
 0x266   : > { %v1540_v8 = vsel %vm1538_vm2, %v1535_v29, %v1537_v22  ;;  %v1520_v17 = vadd.f32 %v1518_v0, %v1494_v15  ;;  %v1603_v22 = vsel %vm276_vm5, %v1601_v19, %v1602_v11  ;;  %v1679_v19 = vld [vmem:[%s2300_s3] sm:$0xff] }
 0x267   : > { %v1585_v3 = vpop.permute.xlu2 %1584  ;;  %v1544_v24 = vmul.f32 %v1540_v8, %v1525_v63 }
 0x268   : > { %v1591_v21 = vsel %vm1590_vm4, %v1585_v3, %v2503_v35 }
 0x269   : > { %v1595_v28 = vmul.f32 %v1591_v21, %v1577_v26 }
 0x26a   : > { %v1507_v54 = vpop.permute.xlu1 %1506 }
 0x26b   : > { %v1513_v51 = vsel %vm1512_vm1, %v1507_v54, %v1509_v31  ;;  %v1546_v54 = vadd.f32 %v1544_v24, %v1520_v17 }
 0x26c   : > { %v1517_v62 = vmul.f32 %v1513_v51, %v1499_v57 }
 0x26e   : > { %v1563_v38 = vpop.permute.xlu0 %1562  ;;  %v1519_v12 = vadd.f32 %v1517_v62, %v1493_v5 }
 0x26f   : > { %v1566_v20 = vsel %vm1564_vm3, %v2493_v33, %v1563_v38  ;;  %v1611_v32 = vpop.permute.xlu2 %1610 }
 0x272   : > { %v1533_v47 = vpop.permute.xlu1 %1532 }
 0x273   : > { %v1539_v60 = vsel %vm1538_vm2, %v1533_v47, %v1535_v29  ;;  %v1570_v29 = vmul.f32 %v1566_v20, %v1551_v10 }
 0x274   : > { %v1543_v6 = vmul.f32 %v1539_v60, %v1525_v63 }
 0x275   : > { %v1572_v39 = vadd.f32 %v1570_v29, %v1546_v54 }
 0x276   : > { %v1545_v25 = vadd.f32 %v1543_v6, %v1519_v12 }
 0x278   : > { %v1589_v7 = vpop.permute.xlu0 %1588 }
 0x279   : > { %v1592_v27 = vsel %vm1590_vm4, %v2503_v35, %v1589_v7 }
 0x27a   : > { %v1559_v18 = vpop.permute.xlu1 %1558 }
 0x27b   : > { %v1565_v16 = vsel %vm1564_vm3, %v1559_v18, %v2493_v33  ;;  %v1596_v33 = vmul.f32 %v1592_v27, %v1577_v26 }
 0x27c   : > { %v1569_v13 = vmul.f32 %v1565_v16, %v1551_v10 }
 0x27d   : > { %v1598_v35 = vadd.f32 %v1596_v33, %v1572_v39 }
 0x27e   : > { %v1571_v31 = vadd.f32 %v1569_v13, %v1545_v25 }
 0x280   : > { %v1613_v36 = vpop.permute.xlu0 %1612  ;;  %v1597_v37 = vadd.f32 %v1595_v28, %v1571_v31 }
 0x281   : > { %v1617_v38 = vsel %vm1616_vm6, %v1611_v32, %v1613_v36 }
 0x282   : > { %v1621_v40 = vmul.f32 %v1617_v38, %v1603_v22  ;;  %v1615_v41 = vpop.permute.xlu1 %1614 }
 0x283   : > { %v1618_v42 = vsel %vm1616_vm6, %v1613_v36, %v1615_v41 }
 0x284   : > { %v1623_v43 = vadd.f32 %v1621_v40, %v1597_v37  ;;  %v1622_v44 = vmul.f32 %v1618_v42, %v1603_v22 }
 0x286   : > { %v1629_v45 = vsel %vm1439_vm7, %v1623_v43, 0.0  ;;  %v1624_v46 = vadd.f32 %v1622_v44, %v1598_v35 }
 0x287   : > { %v1631_v34 = vadd.f32 %v1629_v45, %v2487_v23 }
 0x288   : > { %v1630_v47 = vsel %vm1440_vm8, %v1624_v46, 0.0 }
 0x289   : > { %v1635_v48 = vrot.slane %v1631_v34, 1  ;;  %v1632_v49 = vadd.f32 %v1630_v47, %v2491_v30 }
 0x28b   : > { %v1639_v50 = vadd.f32 %v1635_v48, %v1631_v34  ;;  %v1636_v51 = vrot.slane %v1632_v49, 1 }
 0x28d   : > { %v1896_v52 = vmul.f32 -1.442695, %v1639_v50  ;;  %v1640_v53 = vadd.f32 %v1636_v51, %v1632_v49 }
 0x28f   : > { %2011 = vpow2.f32 %v1896_v52  ;;  %v1897_v59 = vmul.f32 -1.442695, %v1640_v53 }
 0x291   : > { %2013 = vpow2.f32 %v1897_v59 }
 0x295   : > { %v2012_v55 = vpop.eup %2011 }
 0x296   : > { %v1647_v57 = vadd.f32 1.0, %v2012_v55 }
 0x297   : > { %v2014_v58 = vpop.eup %2013 }
 0x298   : > { %2015 = vrcp.f32 %v1647_v57  ;;  %v1648_v56 = vadd.f32 1.0, %v2014_v58  ;;  %vm1654_vm9 = vweird.f32 %v1647_v57  ;;  %v1658_v3 = vand.u32 2147483647, %v1647_v57 }
 0x299   : > { %v1660_v4 = vand.u32 2147483648, %v1647_v57 }
 0x29a   : > { %2017 = vrcp.f32 %v1648_v56  ;;  %v1675_v63 = vand.u32 2147483648, %v1648_v56  ;;  %v1673_v6 = vand.u32 2147483647, %v1648_v56  ;;  %vm1669_vm12 = vweird.f32 %v1648_v56 }
 0x29b   : > { %v1661_v10 = vor.u32 1.1754944e-38, %v1660_v4  ;;  %vm1659_vm14 = vcmp.eq.f32.partialorder %v1658_v3, 8.507059e+37 }
 0x29c   : > { %v1676_v14 = vor.u32 1.1754944e-38, %v1675_v63  ;;  %vm1674_vm15 = vcmp.eq.f32.partialorder %v1673_v6, 8.507059e+37 }
 0x29e   : > { %v2016_v60 = vpop.eup %2015 }
 0x29f   : > { %v1650_v61 = vmul.f32 %v2016_v60, %v1647_v57  ;;  %vm1655_vm5 = vweird.f32 %v2016_v60 }
 0x2a0   : > { %v2018_v23 = vpop.eup %2017  ;;  %vm1656_vm11 = vmor %vm1654_vm9, %vm1655_vm5 }
 0x2a1   : > { %v1651_v62 = vsub.f32 1.0, %v1650_v61  ;;  %v1665_v1 = vmul.f32 %v2018_v23, %v1648_v56  ;;  %vm1670_vm10 = vweird.f32 %v2018_v23 }
 0x2a2   : > { %vm1671_vm13 = vmor %vm1669_vm12, %vm1670_vm10 }
 0x2a3   : > { %v1652_v30 = vmul.f32 %v2016_v60, %v1651_v62  ;;  %v1666_v2 = vsub.f32 1.0, %v1665_v1 }
 0x2a5   : > { %v1653_v5 = vadd.f32 %v2016_v60, %v1652_v30  ;;  %v1667_v0 = vmul.f32 %v2018_v23, %v1666_v2 }
 0x2a7   : > { %v1657_v7 = vsel %vm1656_vm11, %v2016_v60, %v1653_v5  ;;  %v1668_v8 = vadd.f32 %v2018_v23, %v1667_v0 }
 0x2a8   : > { %v1662_v15 = vsel %vm1659_vm14, %v1661_v10, %v1657_v7 }
 0x2a9   : > { %v1672_v9 = vsel %vm1671_vm13, %v2018_v23, %v1668_v8  ;;  %v1680_v20 = vperm.slane %v1662_v15, 0 }
 0x2aa   : > { %v1677_v12 = vsel %vm1674_vm15, %v1676_v14, %v1672_v9 }
 0x2ab   : > { %v1681_v18 = vperm.slane %v1677_v12, 0 }
 0x2ad   : > { %v1684_v21 = vrot.slane %v1681_v18, 4 }
 0x2af   : > { %v1685_v16 = vsel %vm183_vm0, %v1680_v20, %v1684_v21 }
 0x2b0   : > { %v1687_v11 = vmul.f32 %v1685_v16, %v1679_v19 }
 0x2b2   : > { %1688 = vst [vmem:[%s175_s13] sm:$0xff] %v1687_v11 }
 0x2b3   : > { %2091 = shalt.err (!%p2088_p11)
}
 0x2b4   : > { %1911 = dma.vmem_to_hbm [thread:$0]  (%p2267_p3), %s1704_s8, 128, %s1706_s14, %s1690_s17  }
 0x2b5 PF: > { %s1717_s27 = sand.u32 1, %s2122_s9   ;;  %p2600_p12 = scmp.ge.s32.totalorder %s2134_s12, 2 }
 0x2b6   : > { %s1718_s28 = scalar_lea.sflag [#allocation5], %s1717_s27 }
 0x2b7   : > { %p1922_p13 = pnand %p2600_p12, %p2236_p6 }
 0x2b9   : > { %p1923_p0 = pneg %p1922_p13 }
 0x2bb   : > { %2117 = dma.done.wait (%p1923_p0), %s1718_s28, 128  }
 0x2bc   : > { %2119 = vsyncadd (%p1923_p0), %s1718_s28, 4294967168  ;;  %p16_p5 = scmp.ge.s32.totalorder %s2252_s21, 4   ;;  %s2601_s9 = smov %s2126_s10 }
 0x2bd   : > { %s2602_s10 = smov %s2130_s11  ;;  %s2603_s11 = smov %s2262_s25 }
 0x2be   : > { %s2604_s12 = smov %s2252_s21  ;;  %18 = sbr.rel (!%p16_p5) target bundleno = 6 (0x6), region = 80 }
 0x2c3   :  { %1724 = vsyncpa [#allocation4], 1 }
 0x2c4   :  { %1726 = vsyncpa [#allocation4 + $0x1], 1 }
 0x2c5   :  { %1727 = vsyncpa [#allocation5], 1 }
 0x2c6   :  { %1729 = vsyncpa [#allocation5 + $0x1], 1 }
 0x2c7   :  { %1730 = vsyncpa [#allocation6], 1 }
 0x2c8   :  { %1732 = vsyncpa [#allocation6 + $0x1], 1 }

</bundles_post_ra>
